<compile_context>
chip_gen: v5e
topology: v5e:2x2
jax: 0.10.0
libtpu: 0.0.40
codegen_flags: <defaults>
</compile_context>

<pallas_src>
import jax
import jax.numpy as jnp
from jax import lax
from jax.experimental import pallas as pl
from jax.experimental.pallas import tpu as pltpu

EPS = 1e-5
LANE = 128


def _round_up(x, m):
    return (x + m - 1) // m * m


def _pad_to(a, target_shape):
    return jnp.pad(a, [(0, t - s) for s, t in zip(a.shape, target_shape)])


def _vmem_capacity_bytes():
    """Per-core VMEM capacity, with a conservative (v7x) fallback."""
    try:
        info = pltpu.get_tpu_info()
        cap = getattr(info, "vmem_capacity_bytes", None)
        if cap:
            return int(cap)
    except Exception:
        pass
    return 64 * 1024 * 1024


def _choose_tile_rows(H, W, cin, cb_p, cout, vmem_budget, tile_rows=None):
    """Largest divisor of H whose per-step VMEM footprint fits the budget."""
    def footprint(th):
        return (2 * (th * W * cin * 2 + 2 * W * cin * 2)   # x blocks (x2 buffers)
                + 2 * th * W * cout * 4                    # out block (x2 buffers)
                + (th + 2) * (W + 2) * cb_p * 2            # h1 halo scratch
                + th * W * 9 * cb_p * 2)                   # im2col scratch
    divisors = [d for d in range(1, H + 1) if H % d == 0]
    cands = [d for d in divisors if footprint(d) <= vmem_budget]
    if not cands:
        cands = [1]
    if tile_rows is not None:
        cands = [d for d in cands if d <= tile_rows] or [1]
    return max(cands)


def _bottleneck_kernel(xm_ref, xt_ref, xb_ref, w1_ref, w3_ref, w2_ref, b_ref,
                       o_ref, pad_ref, col_ref):
    # xm_ref:  (1, TH, W, Cin)     bf16  this tile's rows
    # xt_ref:  (1, 1, W, Cin)      bf16  row above the tile (clamped at image top)
    # xb_ref:  (1, 1, W, Cin)      bf16  row below the tile (clamped at image bottom)
    # w1_ref:  (Cin, Cb_p)         bf16  1x1 down conv, BN1 scale folded in
    # w3_ref:  (9*Cb_p, Cb_p)      bf16  3x3 conv in im2col layout, BN2 scale folded in
    # w2_ref:  (Cb_p, Cout)        bf16  1x1 up conv
    # b_ref:   (2, Cb_p)           f32   rows = [BN1 bias, BN2 bias]
    # o_ref:   (1, TH, W, Cout)    f32
    # pad_ref: (TH+2, W+2, Cb_p)   bf16  zero-bordered h1 halo scratch
    # col_ref: (TH*W, 9*Cb_p)      bf16  im2col scratch
    _, TH, W, Cin = xm_ref.shape
    Cb_p = w1_ref.shape[1]
    Cout = w2_ref.shape[1]
    h = pl.program_id(1)
    nH = pl.num_programs(1)
    bf16 = pad_ref.dtype

    b1 = b_ref[0:1, :]
    b2 = b_ref[1:2, :]
    w1 = w1_ref[...]

    # --- 1x1 down conv (MXU, bf16 in / f32 acc) + BN1 bias + ReLU (f32) ------
    def down(x2d):  # (M, Cin) bf16 -> (M, Cb_p) f32
        y = jnp.dot(x2d, w1, preferred_element_type=jnp.float32)
        return jnp.maximum(y + b1, 0.0)

    h1m = down(xm_ref[0].reshape(TH * W, Cin))     # this tile's rows
    h1t = down(xt_ref[0, 0])                       # halo row above (recomputed)
    h1b = down(xb_ref[0, 0])                       # halo row below (recomputed)
    h1m_bf = h1m.astype(bf16)

    # --- fill the zero-bordered halo buffer ----------------------------------
    pad_ref[1:TH + 1, 1:W + 1, :] = h1m_bf.reshape(TH, W, Cb_p)
    pad_ref[0:1, 1:W + 1, :] = h1t.astype(bf16).reshape(1, W, Cb_p)
    pad_ref[TH + 1:TH + 2, 1:W + 1, :] = h1b.astype(bf16).reshape(1, W, Cb_p)

    # W border is always zero; H border rows are zero only on edge tiles.
    pad_ref[:, 0:1, :] = jnp.zeros((TH + 2, 1, Cb_p), bf16)
    pad_ref[:, W + 1:W + 2, :] = jnp.zeros((TH + 2, 1, Cb_p), bf16)

    @pl.when(h == 0)
    def _():
        pad_ref[0:1, :, :] = jnp.zeros((1, W + 2, Cb_p), bf16)

    @pl.when(h == nH - 1)
    def _():
        pad_ref[TH + 1:TH + 2, :, :] = jnp.zeros((1, W + 2, Cb_p), bf16)

    # --- im2col: 9 shifted taps; the center tap comes straight from h1 -------
    for ky in range(3):
        for kx in range(3):
            t = ky * 3 + kx
            if t == 4:
                col_ref[:, t * Cb_p:(t + 1) * Cb_p] = h1m_bf
            else:
                col_ref[:, t * Cb_p:(t + 1) * Cb_p] = (
                    pad_ref[ky:ky + TH, kx:kx + W, :].reshape(TH * W, Cb_p))

    # --- 3x3 conv as ONE matmul with K = 9*Cb_p + BN2 bias + ReLU (f32) ------
    h2 = jnp.dot(col_ref[...], w3_ref[...], preferred_element_type=jnp.float32)
    h2 = jnp.maximum(h2 + b2, 0.0)

    # --- 1x1 up conv; store only the real Cout channels ----------------------
    out = jnp.dot(h2.astype(bf16), w2_ref[...],
                  preferred_element_type=jnp.float32)
    o_ref[0] = out.reshape(TH, W, Cout).astype(o_ref.dtype)


def conv_bottleneck_pallas(x_nchw, params, tile_rows=None):
    (w1_oihw, g1, be1, rm1, rv1,
     w3_oihw, g2, be2, rm2, rv2,
     w2_oihw) = params

    N, Cin, H, W = x_nchw.shape
    Cb = w1_oihw.shape[0]
    Cout = w2_oihw.shape[0]
    Cb_p = _round_up(Cb, LANE)
    bf16 = jnp.bfloat16

    # Fold BatchNorm (inference) scales into the conv weights; keep biases.
    s1 = g1 / jnp.sqrt(rv1 + EPS)
    b1 = be1 - rm1 * s1
    s2 = g2 / jnp.sqrt(rv2 + EPS)
    b2 = be2 - rm2 * s2

    w1 = jnp.transpose(w1_oihw[:, :, 0, 0], (1, 0)) * s1[None, :]        # (Cin, Cb)
    w1 = _pad_to(w1, (Cin, Cb_p)).astype(bf16)
    w3 = jnp.transpose(w3_oihw, (2, 3, 1, 0)) * s2[None, None, None, :]  # (3,3,Cb,Cb)
    w3 = _pad_to(w3, (3, 3, Cb_p, Cb_p)).reshape(9 * Cb_p, Cb_p).astype(bf16)
    w2 = jnp.transpose(w2_oihw[:, :, 0, 0], (1, 0))                      # (Cb, Cout)
    w2 = _pad_to(w2, (Cb_p, Cout)).astype(bf16)
    bias = jnp.stack([_pad_to(b1, (Cb_p,)),
                      _pad_to(b2, (Cb_p,))], axis=0).astype(jnp.float32)  # (2, Cb_p)

    # Compact (no channel padding) NHWC bf16 input -- no padded copy in HBM.
    # In a full network, keep activations in NHWC between layers so this
    # transpose is paid once, not per layer.
    x = jnp.transpose(x_nchw, (0, 2, 3, 1)).astype(bf16)                 # (N,H,W,Cin)

    # Generation-specific tile-row count and VMEM limit.
    vmem_cap = _vmem_capacity_bytes()
    weight_bytes = 2 * 2 * (Cin * Cb_p + 9 * Cb_p * Cb_p + Cb_p * Cout) + 8 * Cb_p
    budget = int(0.6 * vmem_cap) - weight_bytes
    th = _choose_tile_rows(H, W, Cin, Cb_p, Cout, budget, tile_rows)
    nH = H // th
    vmem_limit = int(max(32 * 1024 * 1024,
                         min(int(0.8 * vmem_cap), 100 * 1024 * 1024)))

    in_specs = [
        # this tile's TH rows
        pl.BlockSpec((1, th, W, Cin), lambda n, h: (n, h, 0, 0)),
        # 1-row halos above/below (clamped at the image borders; the kernel
        # zeroes the corresponding pad rows on edge tiles, so the clamped
        # garbage rows are never used).
        pl.BlockSpec((1, 1, W, Cin),
                     lambda n, h: (n, jnp.maximum(h * th - 1, 0), 0, 0)),
        pl.BlockSpec((1, 1, W, Cin),
                     lambda n, h: (n, jnp.minimum((h + 1) * th, H - 1), 0, 0)),
        # constant blocks (index never changes -> DMA'd once per core)
        pl.BlockSpec((Cin, Cb_p), lambda n, h: (0, 0)),
        pl.BlockSpec((9 * Cb_p, Cb_p), lambda n, h: (0, 0)),
        pl.BlockSpec((Cb_p, Cout), lambda n, h: (0, 0)),
        pl.BlockSpec((2, Cb_p), lambda n, h: (0, 0)),
    ]
    out_spec = pl.BlockSpec((1, th, W, Cout), lambda n, h: (n, h, 0, 0))

    out_nhwc = pl.pallas_call(
        _bottleneck_kernel,
        out_shape=jax.ShapeDtypeStruct((N, H, W, Cout), jnp.float32),
        grid_spec=pltpu.PrefetchScalarGridSpec(
            num_scalar_prefetch=0,
            grid=(N, nH),
            in_specs=in_specs,
            out_specs=out_spec,
            scratch_shapes=[
                pltpu.VMEM((th + 2, W + 2, Cb_p), bf16),   # h1 halo buffer
                pltpu.VMEM((th * W, 9 * Cb_p), bf16),      # im2col buffer
            ],
        ),
        compiler_params=pltpu.CompilerParams(
            dimension_semantics=("parallel", "parallel"),
            vmem_limit_bytes=vmem_limit,
        ),
    )(x, x, x, w1, w3, w2, bias)

    # Back to the PyTorch NCHW convention.
    return jnp.transpose(out_nhwc, (0, 3, 1, 2))


def conv_bottleneck_ref(x, params, matmul_dtype=jnp.float32):
    """Pure-JAX reference matching the PyTorch forward in eval mode.

    With matmul_dtype=bf16 it mirrors the kernel's quantization points (BN
    scale folded into the weights before the bf16 cast, f32 accumulation);
    with f32 it is the exact eval-mode module forward.
    """
    (w1, g1, be1, rm1, rv1, w3, g2, be2, rm2, rv2, w2) = params
    dn = ("NCHW", "OIHW", "NCHW")

    s1 = g1 / jnp.sqrt(rv1 + EPS)
    b1 = be1 - rm1 * s1
    s2 = g2 / jnp.sqrt(rv2 + EPS)
    b2 = be2 - rm2 * s2
    w1f = w1 * s1[:, None, None, None]
    w3f = w3 * s2[:, None, None, None]

    def conv(y, w, pad):
        return lax.conv_general_dilated(
            y.astype(matmul_dtype), w.astype(matmul_dtype), (1, 1), pad,
            dimension_numbers=dn, preferred_element_type=jnp.float32)

    y = jax.nn.relu(conv(x, w1f, "VALID") + b1[None, :, None, None])
    y = jax.nn.relu(conv(y, w3f, ((1, 1), (1, 1))) + b2[None, :, None, None])
    y = conv(y, w2, "VALID")
    return y


def init_params(key, in_planes, out_planes, bottleneck):
    ks = jax.random.split(key, 9)
    w1 = jax.random.normal(ks[0], (bottleneck, in_planes, 1, 1), jnp.float32) * 0.2
    w3 = jax.random.normal(ks[1], (bottleneck, bottleneck, 3, 3), jnp.float32) * 0.2
    w2 = jax.random.normal(ks[2], (out_planes, bottleneck, 1, 1), jnp.float32) * 0.2
    g1 = jax.random.uniform(ks[3], (bottleneck,), jnp.float32, 0.5, 1.5)
    be1 = jax.random.normal(ks[4], (bottleneck,), jnp.float32) * 0.1
    rm1 = jax.random.normal(ks[5], (bottleneck,), jnp.float32) * 0.1
    rv1 = jax.random.uniform(ks[6], (bottleneck,), jnp.float32, 0.5, 1.5)
    g2 = jax.random.uniform(ks[7], (bottleneck,), jnp.float32, 0.5, 1.5)
    be2 = jax.random.normal(ks[8], (bottleneck,), jnp.float32) * 0.1
    rm2 = jnp.zeros((bottleneck,), jnp.float32)
    rv2 = jnp.ones((bottleneck,), jnp.float32)
    return (w1, g1, be1, rm1, rv1, w3, g2, be2, rm2, rv2, w2)


if __name__ == "__main__":
    key = jax.random.PRNGKey(0)
    kx, kp = jax.random.split(key)

    N, in_planes, out_planes, bottleneck, H, W = 2, 8, 16, 8, 16, 16
    x = jax.random.normal(kx, (N, in_planes, H, W), jnp.float32)
    params = init_params(kp, in_planes, out_planes, bottleneck)

    # Force 8-row tiles so the H-tile grid axis and halo handling are exercised.
    out = conv_bottleneck_pallas(x, params, tile_rows=8)
    out = jax.block_until_ready(out)
    assert out.shape == (N, out_planes, H, W), out.shape

    ref_bf16 = conv_bottleneck_ref(x, params, jnp.bfloat16)
    err = float(jnp.max(jnp.abs(out - ref_bf16)))
    assert jnp.allclose(out, ref_bf16, atol=5e-3, rtol=5e-3), err

    # Sanity check against the exact f32 eval-mode module (looser tolerance,
    # covering the bf16-quantization gap the matched reference hides).
    ref_f32 = conv_bottleneck_ref(x, params, jnp.float32)
    err32 = float(jnp.max(jnp.abs(out - ref_f32)))
    assert jnp.allclose(out, ref_f32, atol=2e-1, rtol=1e-1), err32

    # Auto tile-size path (single row tile at this small size).
    out2 = jax.block_until_ready(conv_bottleneck_pallas(x, params))
    assert jnp.allclose(out2, ref_bf16, atol=5e-3, rtol=5e-3)

    print("KERNEL_OK")
</pallas_src>

<mosaic_0001>
module attributes {stable_mosaic.version = 11 : i64} {
  func.func @_bottleneck_kernel(%arg0: i32, %arg1: i32, %arg2: memref<1x8x16x8xbf16, #tpu.memory_space<vmem>>, %arg3: memref<1x1x16x8xbf16, #tpu.memory_space<vmem>>, %arg4: memref<1x1x16x8xbf16, #tpu.memory_space<vmem>>, %arg5: memref<8x128xbf16, #tpu.memory_space<vmem>>, %arg6: memref<1152x128xbf16, #tpu.memory_space<vmem>>, %arg7: memref<128x16xbf16, #tpu.memory_space<vmem>>, %arg8: memref<2x128xf32, #tpu.memory_space<vmem>>, %arg9: memref<1x8x16x16xf32, #tpu.memory_space<vmem>>, %arg10: memref<10x18x128xbf16, #tpu.memory_space<vmem>>, %arg11: memref<128x1152xbf16, #tpu.memory_space<vmem>>) attributes {dimension_semantics = [#tpu.dimension_semantics<parallel>, #tpu.dimension_semantics<parallel>], iteration_bounds = array<i64: 2, 2>, scalar_prefetch = 0 : i64, scratch_operands = 2 : i64, tpu.core_type = #tpu.core_type<tc>, window_params = [{transform_indices = @transform_0, window_bounds = array<i64: 1, 8, 16, 8>}, {transform_indices = @transform_1, window_bounds = array<i64: 1, 1, 16, 8>}, {transform_indices = @transform_2, window_bounds = array<i64: 1, 1, 16, 8>}, {pipeline_mode = #tpu.pipeline_mode<synchronous>, transform_indices = @transform_3, window_bounds = array<i64: 8, 128>}, {pipeline_mode = #tpu.pipeline_mode<synchronous>, transform_indices = @transform_4, window_bounds = array<i64: 1152, 128>}, {pipeline_mode = #tpu.pipeline_mode<synchronous>, transform_indices = @transform_5, window_bounds = array<i64: 128, 16>}, {pipeline_mode = #tpu.pipeline_mode<synchronous>, transform_indices = @transform_6, window_bounds = array<i64: 2, 128>}, {transform_indices = @transform_7, window_bounds = array<i64: 1, 8, 16, 16>}]} {
    %c0 = arith.constant 0 : index
    %c0_0 = arith.constant 0 : index
    %0 = vector.load %arg8[%c0, %c0_0] : memref<2x128xf32, #tpu.memory_space<vmem>>, vector<1x128xf32>
    %c1 = arith.constant 1 : index
    %c0_1 = arith.constant 0 : index
    %1 = vector.load %arg8[%c1, %c0_1] : memref<2x128xf32, #tpu.memory_space<vmem>>, vector<1x128xf32>
    %c0_2 = arith.constant 0 : index
    %c0_3 = arith.constant 0 : index
    %2 = vector.load %arg5[%c0_2, %c0_3] : memref<8x128xbf16, #tpu.memory_space<vmem>>, vector<8x128xbf16>
    %c0_4 = arith.constant 0 : index
    %c0_5 = arith.constant 0 : index
    %c0_6 = arith.constant 0 : index
    %c0_7 = arith.constant 0 : index
    %3 = vector.load %arg2[%c0_4, %c0_5, %c0_6, %c0_7] : memref<1x8x16x8xbf16, #tpu.memory_space<vmem>>, vector<1x8x16x8xbf16>
    %4 = vector.shape_cast %3 : vector<1x8x16x8xbf16> to vector<8x16x8xbf16>
    %5 = vector.shape_cast %4 : vector<8x16x8xbf16> to vector<128x8xbf16>
    %cst = arith.constant dense<0.000000e+00> : vector<128x128xf32>
    %6 = tpu.matmul %5, %2, %cst {dimension_numbers = #tpu.dot_dimension_numbers<[1], [0], [0], [1], [0, 0, 1, 1], [], []>} : vector<128x8xbf16>, vector<8x128xbf16>, vector<128x128xf32> -> vector<128x128xf32>
    %7 = vector.broadcast %0 : vector<1x128xf32> to vector<128x128xf32>
    %8 = arith.addf %6, %7 : vector<128x128xf32>
    %cst_8 = arith.constant 0.000000e+00 : f32
    %9 = vector.broadcast %cst_8 : f32 to vector<128x128xf32>
    %10 = arith.maximumf %8, %9 : vector<128x128xf32>
    %c0_9 = arith.constant 0 : index
    %c0_10 = arith.constant 0 : index
    %c0_11 = arith.constant 0 : index
    %c0_12 = arith.constant 0 : index
    %11 = vector.load %arg3[%c0_9, %c0_10, %c0_11, %c0_12] : memref<1x1x16x8xbf16, #tpu.memory_space<vmem>>, vector<1x1x16x8xbf16>
    %12 = vector.shape_cast %11 : vector<1x1x16x8xbf16> to vector<16x8xbf16>
    %cst_13 = arith.constant dense<0.000000e+00> : vector<16x128xf32>
    %13 = tpu.matmul %12, %2, %cst_13 {dimension_numbers = #tpu.dot_dimension_numbers<[1], [0], [0], [1], [0, 0, 1, 1], [], []>} : vector<16x8xbf16>, vector<8x128xbf16>, vector<16x128xf32> -> vector<16x128xf32>
    %14 = vector.broadcast %0 : vector<1x128xf32> to vector<16x128xf32>
    %15 = arith.addf %13, %14 : vector<16x128xf32>
    %cst_14 = arith.constant 0.000000e+00 : f32
    %16 = vector.broadcast %cst_14 : f32 to vector<16x128xf32>
    %17 = arith.maximumf %15, %16 : vector<16x128xf32>
    %c0_15 = arith.constant 0 : index
    %c0_16 = arith.constant 0 : index
    %c0_17 = arith.constant 0 : index
    %c0_18 = arith.constant 0 : index
    %18 = vector.load %arg4[%c0_15, %c0_16, %c0_17, %c0_18] : memref<1x1x16x8xbf16, #tpu.memory_space<vmem>>, vector<1x1x16x8xbf16>
    %19 = vector.shape_cast %18 : vector<1x1x16x8xbf16> to vector<16x8xbf16>
    %cst_19 = arith.constant dense<0.000000e+00> : vector<16x128xf32>
    %20 = tpu.matmul %19, %2, %cst_19 {dimension_numbers = #tpu.dot_dimension_numbers<[1], [0], [0], [1], [0, 0, 1, 1], [], []>} : vector<16x8xbf16>, vector<8x128xbf16>, vector<16x128xf32> -> vector<16x128xf32>
    %21 = vector.broadcast %0 : vector<1x128xf32> to vector<16x128xf32>
    %22 = arith.addf %20, %21 : vector<16x128xf32>
    %cst_20 = arith.constant 0.000000e+00 : f32
    %23 = vector.broadcast %cst_20 : f32 to vector<16x128xf32>
    %24 = arith.maximumf %22, %23 : vector<16x128xf32>
    %25 = arith.truncf %10 : vector<128x128xf32> to vector<128x128xbf16>
    %26 = vector.shape_cast %25 : vector<128x128xbf16> to vector<8x16x128xbf16>
    %c1_21 = arith.constant 1 : index
    %c1_22 = arith.constant 1 : index
    %c0_23 = arith.constant 0 : index
    %27 = vector.load %arg10[%c1_21, %c1_22, %c0_23] : memref<10x18x128xbf16, #tpu.memory_space<vmem>>, vector<8x16x128xbf16>
    tpu.vector_store %arg10[%c1_21, %c1_22, %c0_23], %26 {strides = array<i32>} : memref<10x18x128xbf16, #tpu.memory_space<vmem>>, vector<8x16x128xbf16>,
    %28 = arith.truncf %17 : vector<16x128xf32> to vector<16x128xbf16>
    %29 = vector.shape_cast %28 : vector<16x128xbf16> to vector<1x16x128xbf16>
    %c0_24 = arith.constant 0 : index
    %c1_25 = arith.constant 1 : index
    %c0_26 = arith.constant 0 : index
    %30 = vector.load %arg10[%c0_24, %c1_25, %c0_26] : memref<10x18x128xbf16, #tpu.memory_space<vmem>>, vector<1x16x128xbf16>
    tpu.vector_store %arg10[%c0_24, %c1_25, %c0_26], %29 {strides = array<i32>} : memref<10x18x128xbf16, #tpu.memory_space<vmem>>, vector<1x16x128xbf16>,
    %31 = arith.truncf %24 : vector<16x128xf32> to vector<16x128xbf16>
    %32 = vector.shape_cast %31 : vector<16x128xbf16> to vector<1x16x128xbf16>
    %c9 = arith.constant 9 : index
    %c1_27 = arith.constant 1 : index
    %c0_28 = arith.constant 0 : index
    %33 = vector.load %arg10[%c9, %c1_27, %c0_28] : memref<10x18x128xbf16, #tpu.memory_space<vmem>>, vector<1x16x128xbf16>
    tpu.vector_store %arg10[%c9, %c1_27, %c0_28], %32 {strides = array<i32>} : memref<10x18x128xbf16, #tpu.memory_space<vmem>>, vector<1x16x128xbf16>,
    %cst_29 = arith.constant 0.000000e+00 : bf16
    %34 = vector.broadcast %cst_29 : bf16 to vector<10x1x128xbf16>
    %c0_30 = arith.constant 0 : index
    %c0_31 = arith.constant 0 : index
    %c0_32 = arith.constant 0 : index
    %35 = vector.load %arg10[%c0_30, %c0_31, %c0_32] : memref<10x18x128xbf16, #tpu.memory_space<vmem>>, vector<10x1x128xbf16>
    tpu.vector_store %arg10[%c0_30, %c0_31, %c0_32], %34 {strides = array<i32>} : memref<10x18x128xbf16, #tpu.memory_space<vmem>>, vector<10x1x128xbf16>,
    %cst_33 = arith.constant 0.000000e+00 : bf16
    %36 = vector.broadcast %cst_33 : bf16 to vector<10x1x128xbf16>
    %c0_34 = arith.constant 0 : index
    %c17 = arith.constant 17 : index
    %c0_35 = arith.constant 0 : index
    %37 = vector.load %arg10[%c0_34, %c17, %c0_35] : memref<10x18x128xbf16, #tpu.memory_space<vmem>>, vector<10x1x128xbf16>
    tpu.vector_store %arg10[%c0_34, %c17, %c0_35], %36 {strides = array<i32>} : memref<10x18x128xbf16, #tpu.memory_space<vmem>>, vector<10x1x128xbf16>,
    %c0_i32 = arith.constant 0 : i32
    %38 = arith.cmpi eq, %arg1, %c0_i32 : i32
    %39 = arith.extui %38 : i1 to i32
    %c0_i32_36 = arith.constant 0 : i32
    %40 = arith.cmpi ne, %39, %c0_i32_36 : i32
    scf.if %40 {
      %cst_84 = arith.constant 0.000000e+00 : bf16
      %83 = vector.broadcast %cst_84 : bf16 to vector<1x18x128xbf16>
      %c0_85 = arith.constant 0 : index
      %c0_86 = arith.constant 0 : index
      %c0_87 = arith.constant 0 : index
      %84 = vector.load %arg10[%c0_85, %c0_86, %c0_87] : memref<10x18x128xbf16, #tpu.memory_space<vmem>>, vector<1x18x128xbf16>
      tpu.vector_store %arg10[%c0_85, %c0_86, %c0_87], %83 {strides = array<i32>} : memref<10x18x128xbf16, #tpu.memory_space<vmem>>, vector<1x18x128xbf16>,
    } else {
    }
    %c1_i32 = arith.constant 1 : i32
    %41 = arith.cmpi eq, %arg1, %c1_i32 : i32
    %42 = arith.extui %41 : i1 to i32
    %c0_i32_37 = arith.constant 0 : i32
    %43 = arith.cmpi ne, %42, %c0_i32_37 : i32
    scf.if %43 {
      %cst_84 = arith.constant 0.000000e+00 : bf16
      %83 = vector.broadcast %cst_84 : bf16 to vector<1x18x128xbf16>
      %c9_85 = arith.constant 9 : index
      %c0_86 = arith.constant 0 : index
      %c0_87 = arith.constant 0 : index
      %84 = vector.load %arg10[%c9_85, %c0_86, %c0_87] : memref<10x18x128xbf16, #tpu.memory_space<vmem>>, vector<1x18x128xbf16>
      tpu.vector_store %arg10[%c9_85, %c0_86, %c0_87], %83 {strides = array<i32>} : memref<10x18x128xbf16, #tpu.memory_space<vmem>>, vector<1x18x128xbf16>,
    } else {
    }
    %c0_38 = arith.constant 0 : index
    %c0_39 = arith.constant 0 : index
    %c0_40 = arith.constant 0 : index
    %44 = vector.load %arg10[%c0_38, %c0_39, %c0_40] : memref<10x18x128xbf16, #tpu.memory_space<vmem>>, vector<8x16x128xbf16>
    %45 = vector.shape_cast %44 : vector<8x16x128xbf16> to vector<128x128xbf16>
    %c0_41 = arith.constant 0 : index
    %c0_42 = arith.constant 0 : index
    %46 = vector.load %arg11[%c0_41, %c0_42] : memref<128x1152xbf16, #tpu.memory_space<vmem>>, vector<128x128xbf16>
    tpu.vector_store %arg11[%c0_41, %c0_42], %45 {strides = array<i32>} : memref<128x1152xbf16, #tpu.memory_space<vmem>>, vector<128x128xbf16>,
    %c0_43 = arith.constant 0 : index
    %c1_44 = arith.constant 1 : index
    %c0_45 = arith.constant 0 : index
    %47 = vector.load %arg10[%c0_43, %c1_44, %c0_45] : memref<10x18x128xbf16, #tpu.memory_space<vmem>>, vector<8x16x128xbf16>
    %48 = vector.shape_cast %47 : vector<8x16x128xbf16> to vector<128x128xbf16>
    %c0_46 = arith.constant 0 : index
    %c128 = arith.constant 128 : index
    %49 = vector.load %arg11[%c0_46, %c128] : memref<128x1152xbf16, #tpu.memory_space<vmem>>, vector<128x128xbf16>
    tpu.vector_store %arg11[%c0_46, %c128], %48 {strides = array<i32>} : memref<128x1152xbf16, #tpu.memory_space<vmem>>, vector<128x128xbf16>,
    %c0_47 = arith.constant 0 : index
    %c2 = arith.constant 2 : index
    %c0_48 = arith.constant 0 : index
    %50 = vector.load %arg10[%c0_47, %c2, %c0_48] : memref<10x18x128xbf16, #tpu.memory_space<vmem>>, vector<8x16x128xbf16>
    %51 = vector.shape_cast %50 : vector<8x16x128xbf16> to vector<128x128xbf16>
    %c0_49 = arith.constant 0 : index
    %c256 = arith.constant 256 : index
    %52 = vector.load %arg11[%c0_49, %c256] : memref<128x1152xbf16, #tpu.memory_space<vmem>>, vector<128x128xbf16>
    tpu.vector_store %arg11[%c0_49, %c256], %51 {strides = array<i32>} : memref<128x1152xbf16, #tpu.memory_space<vmem>>, vector<128x128xbf16>,
    %c1_50 = arith.constant 1 : index
    %c0_51 = arith.constant 0 : index
    %c0_52 = arith.constant 0 : index
    %53 = vector.load %arg10[%c1_50, %c0_51, %c0_52] : memref<10x18x128xbf16, #tpu.memory_space<vmem>>, vector<8x16x128xbf16>
    %54 = vector.shape_cast %53 : vector<8x16x128xbf16> to vector<128x128xbf16>
    %c0_53 = arith.constant 0 : index
    %c384 = arith.constant 384 : index
    %55 = vector.load %arg11[%c0_53, %c384] : memref<128x1152xbf16, #tpu.memory_space<vmem>>, vector<128x128xbf16>
    tpu.vector_store %arg11[%c0_53, %c384], %54 {strides = array<i32>} : memref<128x1152xbf16, #tpu.memory_space<vmem>>, vector<128x128xbf16>,
    %c0_54 = arith.constant 0 : index
    %c512 = arith.constant 512 : index
    %56 = vector.load %arg11[%c0_54, %c512] : memref<128x1152xbf16, #tpu.memory_space<vmem>>, vector<128x128xbf16>
    tpu.vector_store %arg11[%c0_54, %c512], %25 {strides = array<i32>} : memref<128x1152xbf16, #tpu.memory_space<vmem>>, vector<128x128xbf16>,
    %c1_55 = arith.constant 1 : index
    %c2_56 = arith.constant 2 : index
    %c0_57 = arith.constant 0 : index
    %57 = vector.load %arg10[%c1_55, %c2_56, %c0_57] : memref<10x18x128xbf16, #tpu.memory_space<vmem>>, vector<8x16x128xbf16>
    %58 = vector.shape_cast %57 : vector<8x16x128xbf16> to vector<128x128xbf16>
    %c0_58 = arith.constant 0 : index
    %c640 = arith.constant 640 : index
    %59 = vector.load %arg11[%c0_58, %c640] : memref<128x1152xbf16, #tpu.memory_space<vmem>>, vector<128x128xbf16>
    tpu.vector_store %arg11[%c0_58, %c640], %58 {strides = array<i32>} : memref<128x1152xbf16, #tpu.memory_space<vmem>>, vector<128x128xbf16>,
    %c2_59 = arith.constant 2 : index
    %c0_60 = arith.constant 0 : index
    %c0_61 = arith.constant 0 : index
    %60 = vector.load %arg10[%c2_59, %c0_60, %c0_61] : memref<10x18x128xbf16, #tpu.memory_space<vmem>>, vector<8x16x128xbf16>
    %61 = vector.shape_cast %60 : vector<8x16x128xbf16> to vector<128x128xbf16>
    %c0_62 = arith.constant 0 : index
    %c768 = arith.constant 768 : index
    %62 = vector.load %arg11[%c0_62, %c768] : memref<128x1152xbf16, #tpu.memory_space<vmem>>, vector<128x128xbf16>
    tpu.vector_store %arg11[%c0_62, %c768], %61 {strides = array<i32>} : memref<128x1152xbf16, #tpu.memory_space<vmem>>, vector<128x128xbf16>,
    %c2_63 = arith.constant 2 : index
    %c1_64 = arith.constant 1 : index
    %c0_65 = arith.constant 0 : index
    %63 = vector.load %arg10[%c2_63, %c1_64, %c0_65] : memref<10x18x128xbf16, #tpu.memory_space<vmem>>, vector<8x16x128xbf16>
    %64 = vector.shape_cast %63 : vector<8x16x128xbf16> to vector<128x128xbf16>
    %c0_66 = arith.constant 0 : index
    %c896 = arith.constant 896 : index
    %65 = vector.load %arg11[%c0_66, %c896] : memref<128x1152xbf16, #tpu.memory_space<vmem>>, vector<128x128xbf16>
    tpu.vector_store %arg11[%c0_66, %c896], %64 {strides = array<i32>} : memref<128x1152xbf16, #tpu.memory_space<vmem>>, vector<128x128xbf16>,
    %c2_67 = arith.constant 2 : index
    %c2_68 = arith.constant 2 : index
    %c0_69 = arith.constant 0 : index
    %66 = vector.load %arg10[%c2_67, %c2_68, %c0_69] : memref<10x18x128xbf16, #tpu.memory_space<vmem>>, vector<8x16x128xbf16>
    %67 = vector.shape_cast %66 : vector<8x16x128xbf16> to vector<128x128xbf16>
    %c0_70 = arith.constant 0 : index
    %c1024 = arith.constant 1024 : index
    %68 = vector.load %arg11[%c0_70, %c1024] : memref<128x1152xbf16, #tpu.memory_space<vmem>>, vector<128x128xbf16>
    tpu.vector_store %arg11[%c0_70, %c1024], %67 {strides = array<i32>} : memref<128x1152xbf16, #tpu.memory_space<vmem>>, vector<128x128xbf16>,
    %c0_71 = arith.constant 0 : index
    %c0_72 = arith.constant 0 : index
    %69 = vector.load %arg11[%c0_71, %c0_72] : memref<128x1152xbf16, #tpu.memory_space<vmem>>, vector<128x1152xbf16>
    %c0_73 = arith.constant 0 : index
    %c0_74 = arith.constant 0 : index
    %70 = vector.load %arg6[%c0_73, %c0_74] : memref<1152x128xbf16, #tpu.memory_space<vmem>>, vector<1152x128xbf16>
    %cst_75 = arith.constant dense<0.000000e+00> : vector<128x128xf32>
    %71 = tpu.matmul %69, %70, %cst_75 {dimension_numbers = #tpu.dot_dimension_numbers<[1], [0], [0], [1], [0, 0, 1, 1], [], []>} : vector<128x1152xbf16>, vector<1152x128xbf16>, vector<128x128xf32> -> vector<128x128xf32>
    %72 = vector.broadcast %1 : vector<1x128xf32> to vector<128x128xf32>
    %73 = arith.addf %71, %72 : vector<128x128xf32>
    %cst_76 = arith.constant 0.000000e+00 : f32
    %74 = vector.broadcast %cst_76 : f32 to vector<128x128xf32>
    %75 = arith.maximumf %73, %74 : vector<128x128xf32>
    %76 = arith.truncf %75 : vector<128x128xf32> to vector<128x128xbf16>
    %c0_77 = arith.constant 0 : index
    %c0_78 = arith.constant 0 : index
    %77 = vector.load %arg7[%c0_77, %c0_78] : memref<128x16xbf16, #tpu.memory_space<vmem>>, vector<128x16xbf16>
    %cst_79 = arith.constant dense<0.000000e+00> : vector<128x16xf32>
    %78 = tpu.matmul %76, %77, %cst_79 {dimension_numbers = #tpu.dot_dimension_numbers<[1], [0], [0], [1], [0, 0, 1, 1], [], []>} : vector<128x128xbf16>, vector<128x16xbf16>, vector<128x16xf32> -> vector<128x16xf32>
    %79 = vector.shape_cast %78 : vector<128x16xf32> to vector<8x16x16xf32>
    %c0_80 = arith.constant 0 : index
    %c0_81 = arith.constant 0 : index
    %c0_82 = arith.constant 0 : index
    %c0_83 = arith.constant 0 : index
    %80 = vector.load %arg9[%c0_80, %c0_81, %c0_82, %c0_83] : memref<1x8x16x16xf32, #tpu.memory_space<vmem>>, vector<1x8x16x16xf32>
    %81 = vector.shape_cast %80 : vector<1x8x16x16xf32> to vector<8x16x16xf32>
    %82 = vector.shape_cast %79 : vector<8x16x16xf32> to vector<1x8x16x16xf32>
    tpu.vector_store %arg9[%c0_80, %c0_81, %c0_82, %c0_83], %82 {strides = array<i32>} : memref<1x8x16x16xf32, #tpu.memory_space<vmem>>, vector<1x8x16x16xf32>,
    return
  }
  func.func @transform_0(%arg0: i32, %arg1: i32) -> (i32, i32, i32, i32) {
    %c0_i32 = arith.constant 0 : i32
    %c0_i32_0 = arith.constant 0 : i32
    %c0_i32_1 = arith.constant 0 : i32
    return %arg0, %arg1, %c0_i32, %c0_i32_0 : i32, i32, i32, i32
  }
  func.func @transform_1(%arg0: i32, %arg1: i32) -> (i32, i32, i32, i32) {
    %c8_i32 = arith.constant 8 : i32
    %0 = arith.muli %arg1, %c8_i32 : i32
    %c1_i32 = arith.constant 1 : i32
    %1 = arith.subi %0, %c1_i32 : i32
    %c0_i32 = arith.constant 0 : i32
    %2 = arith.maxsi %1, %c0_i32 : i32
    %c0_i32_0 = arith.constant 0 : i32
    %c0_i32_1 = arith.constant 0 : i32
    %c0_i32_2 = arith.constant 0 : i32
    return %arg0, %2, %c0_i32_0, %c0_i32_1 : i32, i32, i32, i32
  }
  func.func @transform_2(%arg0: i32, %arg1: i32) -> (i32, i32, i32, i32) {
    %c1_i32 = arith.constant 1 : i32
    %0 = arith.addi %arg1, %c1_i32 : i32
    %c8_i32 = arith.constant 8 : i32
    %1 = arith.muli %0, %c8_i32 : i32
    %c15_i32 = arith.constant 15 : i32
    %2 = arith.minsi %1, %c15_i32 : i32
    %c0_i32 = arith.constant 0 : i32
    %c0_i32_0 = arith.constant 0 : i32
    %c0_i32_1 = arith.constant 0 : i32
    return %arg0, %2, %c0_i32, %c0_i32_0 : i32, i32, i32, i32
  }
  func.func @transform_3(%arg0: i32, %arg1: i32) -> (i32, i32) {
    %c0_i32 = arith.constant 0 : i32
    %c0_i32_0 = arith.constant 0 : i32
    %c0_i32_1 = arith.constant 0 : i32
    return %c0_i32, %c0_i32_0 : i32, i32
  }
  func.func @transform_4(%arg0: i32, %arg1: i32) -> (i32, i32) {
    %c0_i32 = arith.constant 0 : i32
    %c0_i32_0 = arith.constant 0 : i32
    %c0_i32_1 = arith.constant 0 : i32
    return %c0_i32, %c0_i32_0 : i32, i32
  }
  func.func @transform_5(%arg0: i32, %arg1: i32) -> (i32, i32) {
    %c0_i32 = arith.constant 0 : i32
    %c0_i32_0 = arith.constant 0 : i32
    %c0_i32_1 = arith.constant 0 : i32
    return %c0_i32, %c0_i32_0 : i32, i32
  }
  func.func @transform_6(%arg0: i32, %arg1: i32) -> (i32, i32) {
    %c0_i32 = arith.constant 0 : i32
    %c0_i32_0 = arith.constant 0 : i32
    %c0_i32_1 = arith.constant 0 : i32
    return %c0_i32, %c0_i32_0 : i32, i32
  }
  func.func @transform_7(%arg0: i32, %arg1: i32) -> (i32, i32, i32, i32) {
    %c0_i32 = arith.constant 0 : i32
    %c0_i32_0 = arith.constant 0 : i32
    %c0_i32_1 = arith.constant 0 : i32
    return %arg0, %arg1, %c0_i32, %c0_i32_0 : i32, i32, i32, i32
  }
}

</mosaic_0001>

<bundles_post_ra>
// kernel: tpu_custom_call.1
= control target key start
LH: loop header
LB: loop body
LE: loop exit
PB: predicated region body
PF: predicated region fallthrough
CT: control target
= control target key end

     0   :  { %s5959_s0 = inlined_call_operand.vmem [shape: bf16[2,16,16,8], index: 0, kind: input, shape index: {}]   ;;  %s5960_s1 = inlined_call_operand.vmem [shape: bf16[2,16,16,8], index: 1, kind: input, shape index: {}]   ;;  %s5961_s2 = inlined_call_operand.vmem [shape: bf16[2,16,16,8], index: 2, kind: input, shape index: {}]   ;;  %s5962_s3 = inlined_call_operand.vmem [shape: bf16[8,128], index: 3, kind: input, shape index: {}]   ;;  %s5963_s4 = inlined_call_operand.vmem [shape: bf16[1152,128], index: 4, kind: input, shape index: {}]   ;;  %s5964_s5 = inlined_call_operand.vmem [shape: bf16[128,16], index: 5, kind: input, shape index: {}]   ;;  %s5965_s6 = inlined_call_operand.vmem [shape: f32[2,128], index: 6, kind: input, shape index: {}]   ;;  %s5966_s7 = inlined_call_operand.hbm [shape: f32[2,16,16,16], index: 7, kind: output, shape index: {}]  }
   0x1   :  { %5972 = sst [smem:[#allocation12_spill]] %s5959_s0 }
   0x2   :  { %5973 = sst [smem:[#allocation13_spill]] %s5962_s3 }
   0x3   :  { %12 = vsyncpa [#allocation5], 0 }
   0x4   :  { %14 = vsyncpa [#allocation5 + $0x1], 0  ;;  %s4933_s24 = smov 0   ;;  %s4935_s25 = smov 0  }
   0x5   :  { %s4937_s26 = smov 0   ;;  %s4939_s27 = smov 0  }
   0x6   :  { %s4941_s28 = smov 0   ;;  %s4943_s29 = smov 0  }
   0x7   :  { %s4945_s30 = smov 0   ;;  %s4947_s8 = smov 0  }
   0x8 LB: > { %5974 = sst [smem:[#allocation7_spill]] %s4879_s29  ;;  %s3806_s9 = sadd.s32 4294967295, %s4887_s8   ;;  %s4887_s8 = sphi %s4947_s8, %s20_s8   ;;  %s4883_s30 = sphi %s4945_s30, %s6000_s30   ;;  %s4879_s29 = sphi %s4943_s29, %s5999_s29   ;;  %s4875_s28 = sphi %s4941_s28, %s5998_s28   ;;  %s4871_s27 = sphi %s4939_s27, %s5997_s27   ;;  %s4867_s26 = sphi %s4937_s26, %s6003_s26   ;;  %s4863_s25 = sphi %s4935_s25, %s6002_s25   ;;  %s4859_s24 = sphi %s4933_s24, %s6001_s24  }
   0x9   : > { %5975 = sst [smem:[#allocation8_spill]] %s4883_s30  ;;  %s3807_s10 = sadd.s32 4294967294, %s4887_s8  }
   0xa   : > { %s29_s11 = sadd.s32 1, %s4879_s29  ;;  %s32_s12 = sadd.s32 1, %s4883_s30 }
   0xb   : > { %p30_p0 = scmp.ge.s32.totalorder %s29_s11, 2  ;;  %p235_p1 = scmp.ne.s32.totalorder %s4867_s26, %s4863_s25 }
   0xc   : > { %p236_p2 = scmp.eq.s32.totalorder %s3806_s9, 3  ;;  %p241_p5 = scmp.ne.s32.totalorder %s4863_s25, %s4859_s24 }
   0xd   : > { %s6005_s11 = smov (%p30_p0, %s29_s11), 0  ;;  %s6007_s12 = smov (!%p30_p0, %s32_s12), %s4883_s30 }
   0xe   : > { %5976 = sst [smem:[#allocation9_spill]] %s6005_s11  ;;  %s221_s13 = ssub.s32 %s4879_s29, %s6005_s11 }
   0xf   : > { %p4984_p3 = por %p236_p2, %p235_p1  ;;  %p34_p4 = scmp.ge.s32.totalorder %s6007_s12, 2 }
  0x10   : > { %p242_p6 = scmp.eq.s32.totalorder %s3807_s10, 3  ;;  %p3816_p7 = scmp.ge.s32.totalorder %s4887_s8, 1 }
  0x11   : > { %s6009_s12 = smov (%p34_p4, %s6007_s12), 0  ;;  %p326_p9 = scmp.lt.s32.totalorder %s4887_s8, 5 }
  0x12   : > { %5978 = sst [smem:[#allocation10_spill]] %s6009_s12  ;;  %p4993_p8 = por %p242_p6, %p241_p5 }
  0x13   : > { %s220_s16 = ssub.s32 %s4883_s30, %s6009_s12  ;;  %s225_s17 = sadd.s32 1, %s4867_s26 }
  0x14   : > { %s222_s18 = sor.u32 %s221_s13, %s220_s16  ;;  %p327_p10 = pnand %p3816_p7, %p326_p9 }
  0x15   : > { %p223_p11 = scmp.eq.s32.totalorder %s222_s18, 0  ;;  %s5968_s20 = sand.u32 (!%p327_p10), 1, %s4863_s25  }
  0x16   : > { %330 = sbr.rel (%p327_p10) target bundleno = 978 (0x3d2), region = 48  ;;  %s5981_s3 = sld [smem:[#allocation13_spill]] (!%p327_p10) }
  0x17   : > { %s5002_s19 = scalar_select %p223_p11, %s4867_s26, %s225_s17  }
  0x18   : > { %s5015_s10 = sshll.u32 (!%p327_p10), %s5968_s20, 7  ;;  %s3818_s13 = sshll.u32 (!%p327_p10), %s4871_s27, 3 }
  0x19   : > { %5980 = sst [smem:[#allocation11_spill]] %s5002_s19  ;;  %p390_p12 = scmp.lt.s32.totalorder (!%p327_p10), %s4875_s28, 1 }
  0x1a   : > { %p392_p13 = scmp.lt.s32.totalorder (!%p327_p10), %s3818_s13, 15  ;;  %s5982_s0 = sld [smem:[#allocation12_spill]] (!%p327_p10) }
  0x1b   : > { %v5008_v0 = vld [vmem:[%s5965_s6 + $0x1] sm:$0x1]  ;;  %vm521_vm0 = vcmask 1043456   ;;  %s391_s16 = scalar_select %p390_p12, %s4875_s28, 1  ;;  %vm496_vm1 = vcmask 64512   ;;  %vm829_vm6 = vcmask 1040384  }
  0x1c   : > { %v438_v1 = vld [vmem:[%s5981_s3] sm:$0xf]  ;;  %s393_s17 = scalar_select %p392_p13, %s3818_s13, 15  ;;  %vm823_vm2 = vsmask.f32 7938 }
  0x1d   : > { %v523_v2 = vsel %vm521_vm0, %v438_v1, 0  ;;  %s3820_s18 = sshll.u32 %s391_s16, 5  ;;  %s4537_s16 = sadd.s32 8, %s3818_s13  ;;  %v5053_v13 = vld [vmem:[%s5965_s6] ss:$0 sm:$0xff]  ;;  %vm5063_vm3 = vmand %vm521_vm0, %vm823_vm2 }
  0x1e   : > { %532 = vmatpush.bf16.msra.mxu0 %v523_v2  ;;  %633 = vmatpush.bf16.msra.mxu2 %v523_v2  ;;  %s3819_s21 = sshll.u32 %s393_s17, 1  ;;  %s3823_s17 = sadd.s32 4294967295, %s3818_s13  ;;  %v825_v24 = vld [vmem:[#allocation2 + $0xc] sm:$0xf]  ;;  %vm658_vm4 = vsmask.f32 256  ;;  %vm5096_vm9 = vmand %vm829_vm6, %vm823_vm2 }
  0x1f   : > { %607 = vmatpush.bf16.msra.mxu1 %v523_v2  ;;  %s396_s22 = sadd.s32 %s3820_s18, %s3819_s21  ;;  %p419_p0 = scmp.lt.s32.totalorder %s4537_s16, 15  ;;  %vm659_vm5 = vsmask.f32 4368  ;;  %vm5079_vm8 = vmand %vm829_vm6, %vm658_vm4  ;;  %v831_v36 = vld [vmem:[#allocation2 + $0x14] sm:$0x1] }
  0x20   : > { %s3821_s12 = sshll.u32 %s396_s22, 2  ;;  %p402_p1 = scmp.gt.s32.totalorder %s3823_s17, 0  ;;  %vm5072_vm7 = vmor %vm658_vm4, %vm659_vm5  ;;  %v834_v51 = vld [vmem:[#allocation2 + $0x18] sm:$0xf]  ;;  %v838_v1 = vld [vmem:[#allocation2 + $0x20] sm:$0x1] }
  0x21   : > { %s5024_s3 = scalar_lea.vmem %s5982_s0, %s3821_s12  ;;  %s6011_s16 = smov (!%p419_p0, %s4537_s16), 15 }
  0x22   : > { %v4538_v3 = vld [vmem:[%s5024_s3] sm:$0xff]  ;;  %v4539_v4 = vld [vmem:[%s5024_s3 + $0x8] sm:$0xff]  ;;  %v4540_v5 = vld [vmem:[%s5024_s3 + $0x10] sm:$0xff]  ;;  %p3824_p2 = scmp.lt.s32.totalorder %s3823_s17, 15  ;;  %s6013_s17 = smov (!%p402_p1, %s3823_s17), 0 }
  0x23   : > { %3871 = vmatmul.msk.bf16.vlgmr.msra.gmra.mxu0 %vm496_vm1, %v4538_v3  ;;  %v4541_v6 = vld [vmem:[%s5024_s3 + $0x18] sm:$0xff]  ;;  %s6015_s16 = smov (!%p419_p0, %s6011_s16), 15  ;;  %v4542_v7 = vld [vmem:[%s5024_s3 + $0x20] sm:$0xff]  ;;  %v4543_v10 = vld [vmem:[%s5024_s3 + $0x28] sm:$0xff]  ;;  %p3889_p4 = scmp.ne.s32.totalorder %s4871_s27, 0 }
  0x24   : > { %s6017_s17 = smov (!%p3824_p2, %s6013_s17), 15  ;;  %s3836_s12 = sshll.u32 %s6015_s16, 1  ;;  %v4544_v11 = vld [vmem:[%s5024_s3 + $0x30] sm:$0xff]  ;;  %v4545_v12 = vld [vmem:[%s5024_s3 + $0x38] sm:$0xff] }
  0x25   : > { %s3829_s21 = sshll.u32 %s6017_s17, 1  ;;  %s427_s22 = sadd.s32 %s3836_s12, %s3820_s18 }
  0x26   : > { %s410_s23 = sadd.s32 %s3829_s21, %s3820_s18  ;;  %s3838_s9 = sshll.u32 %s427_s22, 2 }
  0x27   : > { %s3831_s13 = sshll.u32 %s410_s23, 2  ;;  %s429_s11 = scalar_lea.vmem %s5961_s2, %s3838_s9 }
  0x28   : > { %s412_s19 = scalar_lea.vmem %s5960_s1, %s3831_s13  ;;  %v4547_v8 = vld [vmem:[%s429_s11] sm:$0xff]  ;;  %s5261_s3 = scalar_lea.vmem [#allocation4], %s5015_s10 }
  0x29   : > { %3888 = vmatmul.msk.bf16.vlgmr.msra.gmra.mxu2 %vm496_vm1, %v4547_v8  ;;  %v4546_v9 = vld [vmem:[%s412_s19] sm:$0xff] }
  0x2a   : > { %3883 = vmatmul.msk.bf16.vlgmr.msra.gmra.mxu1 %vm496_vm1, %v4546_v9 }
  0x33   : > { %3872 = vmatmul.msk.bf16.gmra.mxu0 %vm496_vm1, %v4539_v4 }
  0x43   : > { %3873 = vmatmul.msk.bf16.gmra.mxu0 %vm496_vm1, %v4540_v5 }
  0x53   : > { %3874 = vmatmul.msk.bf16.gmra.mxu0 %vm496_vm1, %v4541_v6 }
  0x63   : > { %3875 = vmatmul.msk.bf16.gmra.mxu0 %vm496_vm1, %v4542_v7 }
  0x73   : > { %3876 = vmatmul.msk.bf16.gmra.mxu0 %vm496_vm1, %v4543_v10 }
  0x83   : > { %3877 = vmatmul.msk.bf16.gmra.mxu0 %vm496_vm1, %v4544_v11 }
  0x93   : > { %3878 = vmatmul.msk.bf16.gmra.mxu0 %vm496_vm1, %v4545_v12 }
  0xa0   : > { %v534_v14 = vpop.f32.mrf.mxu0 }
  0xa1   : > { %v535_v15 = vadd.f32 %v5053_v13, %v534_v14 }
  0xa3   : > { %v574_v16 = vmax.f32 %v535_v15, 0.0 }
  0xa5   : > { %v5056_v17 = vpack.c.bf16 %v574_v16, %v574_v16 }
  0xa7   : > { %v662_v18 = vshrl.u32 %v5056_v17, 16  ;;  %v665_v21 = vshll.u32 %v5056_v17, 16 }
  0xa8   : > { %v536_v19 = vpop.f32.mrf.mxu0 }
  0xa9   : > { %v664_v20 = vrot.slane %v662_v18, 7  ;;  %v537_v22 = vadd.f32 %v5053_v13, %v536_v19  ;;  %v841_v18 = vld [vmem:[#allocation2 + $0x24] sm:$0xf] }
  0xab   : > { %v667_v25 = vor.u32 %v665_v21, %v664_v20  ;;  %v575_v26 = vmax.f32 %v537_v22, 0.0  ;;  %v668_v37 = vrot.slane %v664_v20, 4 }
  0xad   : > { %v826_v27 = vsel %vm5063_vm3, %v667_v25, %v825_v24  ;;  %v5069_v28 = vpack.c.bf16 %v575_v26, %v575_v26 }
  0xae   : > { %827 = vst [vmem:[#allocation2 + $0xc] sm:$0xf] %v826_v27 }
  0xaf   : > { %v670_v29 = vshrl.u32 %v5069_v28, 16  ;;  %v673_v33 = vshll.u32 %v5069_v28, 16 }
  0xb0   : > { %v539_v30 = vpop.f32.mrf.mxu0 }
  0xb1   : > { %v672_v32 = vrot.slane %v670_v29, 7  ;;  %v540_v34 = vadd.f32 %v5053_v13, %v539_v30 }
  0xb3   : > { %v675_v38 = vor.u32 %v673_v33, %v672_v32  ;;  %v677_v39 = vrot.slane %v672_v32, 4  ;;  %v576_v40 = vmax.f32 %v540_v34, 0.0  ;;  %v845_v33 = vld [vmem:[#allocation2 + $0x2c] sm:$0x1] }
  0xb5   : > { %v945_v41 = vld [vmem:[#allocation2 + $0xc] sm:$0x1]  ;;  %v676_v42 = vsel %vm5072_vm7, %v668_v37, %v675_v38  ;;  %v832_v43 = vsel %vm5079_vm8, %v677_v39, %v831_v36  ;;  %v5087_v44 = vpack.c.bf16 %v576_v40, %v576_v40 }
  0xb6   : > { %v946_v45 = vsel %vm5079_vm8, 0, %v945_v41  ;;  %828 = vst [vmem:[#allocation2 + $0x10] sm:$0xf] %v676_v42 }
  0xb7   : > { %947 = vst [vmem:[#allocation2 + $0xc] sm:$0x1] %v946_v45  ;;  %v679_v46 = vshrl.u32 %v5087_v44, 16  ;;  %v682_v49 = vshll.u32 %v5087_v44, 16 }
  0xb8   : > { %833 = vst [vmem:[#allocation2 + $0x14] sm:$0x1] %v832_v43  ;;  %v541_v47 = vpop.f32.mrf.mxu0 }
  0xb9   : > { %v681_v48 = vrot.slane %v679_v46, 7  ;;  %v542_v50 = vadd.f32 %v5053_v13, %v541_v47 }
  0xbb   : > { %v684_v52 = vor.u32 %v682_v49, %v681_v48  ;;  %v577_v53 = vmax.f32 %v542_v50, 0.0  ;;  %v685_v2 = vrot.slane %v681_v48, 4  ;;  %v848_v50 = vld [vmem:[#allocation2 + $0x30] sm:$0xf] }
  0xbd   : > { %v835_v55 = vsel %vm5063_vm3, %v684_v52, %v834_v51  ;;  %v5102_v56 = vpack.c.bf16 %v577_v53, %v577_v53 }
  0xbe   : > { %836 = vst [vmem:[#allocation2 + $0x18] sm:$0xf] %v835_v55 }
  0xbf   : > { %v976_v57 = vld [vmem:[#allocation2 + $0x14] sm:$0x1]  ;;  %v687_v58 = vshrl.u32 %v5102_v56, 16  ;;  %v690_v62 = vshll.u32 %v5102_v56, 16 }
  0xc0   : > { %v977_v59 = vsel %vm5096_vm9, 0, %v976_v57  ;;  %v544_v60 = vpop.f32.mrf.mxu0 }
  0xc1   : > { %978 = vst [vmem:[#allocation2 + $0x14] sm:$0x1] %v977_v59  ;;  %v689_v61 = vrot.slane %v687_v58, 7  ;;  %v545_v63 = vadd.f32 %v5053_v13, %v544_v60 }
  0xc3   : > { %v692_v3 = vor.u32 %v690_v62, %v689_v61  ;;  %v694_v4 = vrot.slane %v689_v61, 4  ;;  %v578_v5 = vmax.f32 %v545_v63, 0.0 }
  0xc5   : > { %v948_v6 = vld [vmem:[#allocation2 + $0x18] sm:$0x1]  ;;  %v693_v7 = vsel %vm5072_vm7, %v685_v2, %v692_v3  ;;  %v839_v8 = vsel %vm5079_vm8, %v694_v4, %v838_v1  ;;  %v5113_v9 = vpack.c.bf16 %v578_v5, %v578_v5 }
  0xc6   : > { %v949_v10 = vsel %vm5079_vm8, 0, %v948_v6  ;;  %837 = vst [vmem:[#allocation2 + $0x1c] sm:$0xf] %v693_v7  ;;  %v852_v1 = vld [vmem:[#allocation2 + $0x38] sm:$0x1] }
  0xc7   : > { %950 = vst [vmem:[#allocation2 + $0x18] sm:$0x1] %v949_v10  ;;  %v696_v11 = vshrl.u32 %v5113_v9, 16  ;;  %v699_v15 = vshll.u32 %v5113_v9, 16 }
  0xc8   : > { %840 = vst [vmem:[#allocation2 + $0x20] sm:$0x1] %v839_v8  ;;  %v546_v12 = vpop.f32.mrf.mxu0 }
  0xc9   : > { %v698_v14 = vrot.slane %v696_v11, 7  ;;  %v547_v16 = vadd.f32 %v5053_v13, %v546_v12 }
  0xcb   : > { %v701_v19 = vor.u32 %v699_v15, %v698_v14  ;;  %v579_v20 = vmax.f32 %v547_v16, 0.0  ;;  %v702_v34 = vrot.slane %v698_v14, 4  ;;  %v609_v15 = vpop.f32.mrf.mxu1 }
  0xcd   : > { %v842_v21 = vsel %vm5063_vm3, %v701_v19, %v841_v18  ;;  %v5122_v22 = vpack.c.bf16 %v579_v20, %v579_v20  ;;  %v635_v20 = vpop.f32.mrf.mxu2 }
  0xce   : > { %843 = vst [vmem:[#allocation2 + $0x24] sm:$0xf] %v842_v21  ;;  %v855_v21 = vld [vmem:[#allocation2 + $0x3c] sm:$0xf] }
  0xcf   : > { %v979_v24 = vld [vmem:[#allocation2 + $0x20] sm:$0x1]  ;;  %v704_v25 = vshrl.u32 %v5122_v22, 16  ;;  %v707_v30 = vshll.u32 %v5122_v22, 16 }
  0xd0   : > { %v980_v26 = vsel %vm5096_vm9, 0, %v979_v24  ;;  %v549_v27 = vpop.f32.mrf.mxu0 }
  0xd1   : > { %981 = vst [vmem:[#allocation2 + $0x20] sm:$0x1] %v980_v26  ;;  %v706_v29 = vrot.slane %v704_v25, 7  ;;  %v550_v32 = vadd.f32 %v5053_v13, %v549_v27 }
  0xd3   : > { %v709_v36 = vor.u32 %v707_v30, %v706_v29  ;;  %v711_v37 = vrot.slane %v706_v29, 4  ;;  %v580_v38 = vmax.f32 %v550_v32, 0.0 }
  0xd5   : > { %v951_v39 = vld [vmem:[#allocation2 + $0x24] sm:$0x1]  ;;  %v710_v40 = vsel %vm5072_vm7, %v702_v34, %v709_v36  ;;  %v846_v41 = vsel %vm5079_vm8, %v711_v37, %v845_v33  ;;  %v5133_v42 = vpack.c.bf16 %v580_v38, %v580_v38  ;;  %v611_v36 = vpop.f32.mrf.mxu1 }
  0xd6   : > { %v952_v43 = vsel %vm5079_vm8, 0, %v951_v39  ;;  %844 = vst [vmem:[#allocation2 + $0x28] sm:$0xf] %v710_v40  ;;  %v610_v39 = vadd.f32 %v5053_v13, %v609_v15  ;;  %v636_v40 = vadd.f32 %v5053_v13, %v635_v20  ;;  %v862_v15 = vld [vmem:[#allocation2 + $0x48] sm:$0xf] }
  0xd7   : > { %953 = vst [vmem:[#allocation2 + $0x24] sm:$0x1] %v952_v43  ;;  %v713_v45 = vshrl.u32 %v5133_v42, 16  ;;  %v716_v48 = vshll.u32 %v5133_v42, 16  ;;  %v905_v20 = vld [vmem:[#allocation2] sm:$0xf] }
  0xd8   : > { %847 = vst [vmem:[#allocation2 + $0x2c] sm:$0x1] %v846_v41  ;;  %v551_v46 = vpop.f32.mrf.mxu0  ;;  %v637_v41 = vpop.f32.mrf.mxu2 }
  0xd9   : > { %v715_v47 = vrot.slane %v713_v45, 7  ;;  %v552_v49 = vadd.f32 %v5053_v13, %v551_v46  ;;  %v859_v45 = vld [vmem:[#allocation2 + $0x44] sm:$0x1]  ;;  %v612_v46 = vadd.f32 %v5053_v13, %v611_v36 }
  0xdb   : > { %v718_v51 = vor.u32 %v716_v48, %v715_v47  ;;  %v581_v52 = vmax.f32 %v552_v49, 0.0  ;;  %v719_v2 = vrot.slane %v715_v47, 4  ;;  %v638_v47 = vadd.f32 %v5053_v13, %v637_v41 }
  0xdd   : > { %v849_v53 = vsel %vm5063_vm3, %v718_v51, %v848_v50  ;;  %v5142_v55 = vpack.c.bf16 %v581_v52, %v581_v52  ;;  %v614_v51 = vmax.f32 %v610_v39, 0.0  ;;  %v640_v52 = vmax.f32 %v636_v40, 0.0 }
  0xde   : > { %850 = vst [vmem:[#allocation2 + $0x30] sm:$0xf] %v849_v53  ;;  %v615_v53 = vmax.f32 %v612_v46, 0.0 }
  0xdf   : > { %v982_v57 = vld [vmem:[#allocation2 + $0x2c] sm:$0x1]  ;;  %v721_v58 = vshrl.u32 %v5142_v55, 16  ;;  %v724_v62 = vshll.u32 %v5142_v55, 16 }
  0xe0   : > { %v983_v59 = vsel %vm5096_vm9, 0, %v982_v57  ;;  %v554_v60 = vpop.f32.mrf.mxu0  ;;  %v641_v57 = vmax.f32 %v638_v47, 0.0 }
  0xe1   : > { %984 = vst [vmem:[#allocation2 + $0x2c] sm:$0x1] %v983_v59  ;;  %v723_v61 = vrot.slane %v721_v58, 7  ;;  %v555_v63 = vadd.f32 %v5053_v13, %v554_v60 }
  0xe3   : > { %v726_v3 = vor.u32 %v724_v62, %v723_v61  ;;  %v728_v4 = vrot.slane %v723_v61, 4  ;;  %v582_v5 = vmax.f32 %v555_v63, 0.0  ;;  %v883_v62 = vpack.c.bf16 %v614_v51, %v614_v51 }
  0xe5   : > { %v954_v6 = vld [vmem:[#allocation2 + $0x30] sm:$0x1]  ;;  %v727_v7 = vsel %vm5072_vm7, %v719_v2, %v726_v3  ;;  %v853_v8 = vsel %vm5079_vm8, %v728_v4, %v852_v1  ;;  %v5153_v10 = vpack.c.bf16 %v582_v5, %v582_v5  ;;  %v912_v1 = vpack.c.bf16 %v640_v52, %v640_v52 }
  0xe6   : > { %v955_v11 = vsel %vm5079_vm8, 0, %v954_v6  ;;  %851 = vst [vmem:[#allocation2 + $0x34] sm:$0xf] %v727_v7  ;;  %v884_v2 = vpack.c.bf16 %v615_v53, %v615_v53  ;;  %v913_v3 = vpack.c.bf16 %v641_v57, %v641_v57  ;;  %v886_v5 = vshrl.u32 %v883_v62, 16 }
  0xe7   : > { %956 = vst [vmem:[#allocation2 + $0x30] sm:$0x1] %v955_v11  ;;  %v730_v12 = vshrl.u32 %v5153_v10, 16  ;;  %v733_v18 = vshll.u32 %v5153_v10, 16  ;;  %v889_v6 = vshll.u32 %v883_v62, 16  ;;  %v915_v11 = vshrl.u32 %v912_v1, 16 }
  0xe8   : > { %854 = vst [vmem:[#allocation2 + $0x38] sm:$0x1] %v853_v8  ;;  %v556_v14 = vpop.f32.mrf.mxu0 }
  0xe9   : > { %v732_v16 = vrot.slane %v730_v12, 7  ;;  %v557_v19 = vadd.f32 %v5053_v13, %v556_v14  ;;  %v918_v12 = vshll.u32 %v912_v1, 16 }
  0xeb   : > { %v735_v24 = vor.u32 %v733_v18, %v732_v16  ;;  %v583_v25 = vmax.f32 %v557_v19, 0.0  ;;  %v736_v43 = vrot.slane %v732_v16, 4  ;;  %v888_v18 = vrot.slane %v886_v5, 7 }
  0xec   : > { %v894_v19 = vshrl.u32 %v884_v2, 16 }
  0xed   : > { %v856_v26 = vsel %vm5063_vm3, %v735_v24, %v855_v21  ;;  %v5162_v27 = vpack.c.bf16 %v583_v25, %v583_v25  ;;  %v917_v21 = vrot.slane %v915_v11, 7  ;;  %v897_v24 = vshll.u32 %v884_v2, 16 }
  0xee   : > { %857 = vst [vmem:[#allocation2 + $0x3c] sm:$0xf] %v856_v26  ;;  %v923_v25 = vshrl.u32 %v913_v3, 16 }
  0xef   : > { %v985_v29 = vld [vmem:[#allocation2 + $0x38] sm:$0x1]  ;;  %v738_v30 = vshrl.u32 %v5162_v27, 16  ;;  %v741_v33 = vshll.u32 %v5162_v27, 16  ;;  %v920_v36 = vor.u32 %v918_v12, %v917_v21 }
  0xf0   : > { %v986_v32 = vsel %vm5096_vm9, 0, %v985_v29  ;;  %v559_v34 = vpop.f32.mrf.mxu0 }
  0xf1   : > { %987 = vst [vmem:[#allocation2 + $0x38] sm:$0x1] %v986_v32  ;;  %v740_v37 = vrot.slane %v738_v30, 7  ;;  %v560_v38 = vadd.f32 %v5053_v13, %v559_v34  ;;  %v891_v30 = vor.u32 %v889_v6, %v888_v18  ;;  %v935_v32 = vld [vmem:[#allocation2 + $0x6c] sm:$0xf]  ;;  %v892_v34 = vrot.slane %v888_v18, 4 }
  0xf3   : > { %v743_v48 = vor.u32 %v741_v33, %v740_v37  ;;  %v745_v49 = vrot.slane %v740_v37, 4  ;;  %v584_v50 = vmax.f32 %v560_v38, 0.0  ;;  %v926_v33 = vshll.u32 %v913_v3, 16  ;;  %v866_v3 = vld [vmem:[#allocation2 + $0x50] sm:$0x1] }
  0xf4   : > { %v921_v37 = vrot.slane %v917_v21, 4  ;;  %v896_v38 = vrot.slane %v894_v19, 7  ;;  %v906_v41 = vsel %vm5063_vm3, %v891_v30, %v905_v20 }
  0xf5   : > { %v957_v58 = vld [vmem:[#allocation2 + $0x3c] sm:$0x1]  ;;  %v744_v59 = vsel %vm5072_vm7, %v736_v43, %v743_v48  ;;  %v860_v60 = vsel %vm5079_vm8, %v745_v49, %v859_v45  ;;  %v5177_v61 = vpack.c.bf16 %v584_v50, %v584_v50  ;;  %v925_v43 = vrot.slane %v923_v25, 7  ;;  %v909_v48 = vld [vmem:[#allocation2 + $0x8] sm:$0x1] }
  0xf6   : > { %v958_v63 = vsel %vm5079_vm8, 0, %v957_v58  ;;  %858 = vst [vmem:[#allocation2 + $0x40] sm:$0xf] %v744_v59  ;;  %v936_v45 = vsel %vm5063_vm3, %v920_v36, %v935_v32  ;;  %v899_v46 = vor.u32 %v897_v24, %v896_v38  ;;  %v901_v47 = vrot.slane %v896_v38, 4  ;;  %v869_v32 = vld [vmem:[#allocation2 + $0x54] sm:$0xf] }
  0xf7   : > { %959 = vst [vmem:[#allocation2 + $0x3c] sm:$0x1] %v958_v63  ;;  %v747_v4 = vshrl.u32 %v5177_v61, 16  ;;  %v750_v7 = vshll.u32 %v5177_v61, 16  ;;  %v928_v51 = vor.u32 %v926_v33, %v925_v43  ;;  %v930_v59 = vrot.slane %v925_v43, 4 }
  0xf8   : > { %861 = vst [vmem:[#allocation2 + $0x44] sm:$0x1] %v860_v60  ;;  %v561_v8 = vpop.f32.mrf.mxu0  ;;  %v900_v57 = vsel %vm5072_vm7, %v892_v34, %v899_v46  ;;  %v910_v58 = vsel %vm5079_vm8, %v901_v47, %v909_v48  ;;  %v939_v60 = vld [vmem:[#allocation2 + $0x74] sm:$0x1] }
  0xf9   : > { %v749_v14 = vrot.slane %v747_v4, 7  ;;  %v562_v16 = vadd.f32 %v5053_v13, %v561_v8  ;;  %907 = vst [vmem:[#allocation2] sm:$0xf] %v906_v41  ;;  %v929_v2 = vsel %vm5072_vm7, %v921_v37, %v928_v51  ;;  %v940_v4 = vsel %vm5079_vm8, %v930_v59, %v939_v60 }
  0xfa   : > { %937 = vst [vmem:[#allocation2 + $0x6c] sm:$0xf] %v936_v45 }
  0xfb   : > { %v752_v26 = vor.u32 %v750_v7, %v749_v14  ;;  %v585_v29 = vmax.f32 %v562_v16, 0.0  ;;  %908 = vst [vmem:[#allocation2 + $0x4] sm:$0xf] %v900_v57  ;;  %v753_v5 = vrot.slane %v749_v14, 4 }
  0xfc   : > { %911 = vst [vmem:[#allocation2 + $0x8] sm:$0x1] %v910_v58 }
  0xfd   : > { %v863_v39 = vsel %vm5063_vm3, %v752_v26, %v862_v15  ;;  %v5186_v40 = vpack.c.bf16 %v585_v29, %v585_v29  ;;  %938 = vst [vmem:[#allocation2 + $0x70] sm:$0xf] %v929_v2 }
  0xfe   : > { %864 = vst [vmem:[#allocation2 + $0x48] sm:$0xf] %v863_v39 }
  0xff   : > { %v988_v49 = vld [vmem:[#allocation2 + $0x44] sm:$0x1]  ;;  %v755_v50 = vshrl.u32 %v5186_v40, 16  ;;  %v758_v63 = vshll.u32 %v5186_v40, 16  ;;  %941 = vst [vmem:[#allocation2 + $0x74] sm:$0x1] %v940_v4 }
 0x100   : > { %v989_v52 = vsel %vm5096_vm9, 0, %v988_v49  ;;  %v564_v53 = vpop.f32.mrf.mxu0  ;;  %v942_v14 = vld [vmem:[#allocation2] sm:$0x1] }
 0x101   : > { %990 = vst [vmem:[#allocation2 + $0x44] sm:$0x1] %v989_v52  ;;  %v757_v62 = vrot.slane %v755_v50, 7  ;;  %v565_v1 = vadd.f32 %v5053_v13, %v564_v53  ;;  %v943_v20 = vsel %vm5079_vm8, 0, %v942_v14  ;;  %v969_v21 = vld [vmem:[#allocation2 + $0x6c] sm:$0x1] }
 0x102   : > { %944 = vst [vmem:[#allocation2] sm:$0x1] %v943_v20  ;;  %v970_v29 = vsel %vm5079_vm8, 0, %v969_v21  ;;  %v873_v52 = vld [vmem:[#allocation2 + $0x5c] sm:$0x1] }
 0x103   : > { %v760_v6 = vor.u32 %v758_v63, %v757_v62  ;;  %v762_v7 = vrot.slane %v757_v62, 4  ;;  %v586_v8 = vmax.f32 %v565_v1, 0.0  ;;  %971 = vst [vmem:[#allocation2 + $0x6c] sm:$0x1] %v970_v29  ;;  %v973_v33 = vld [vmem:[#allocation2 + $0x8] sm:$0x1] }
 0x104   : > { %v974_v37 = vsel %vm5096_vm9, 0, %v973_v33 }
 0x105   : > { %v960_v11 = vld [vmem:[#allocation2 + $0x48] sm:$0x1]  ;;  %v761_v12 = vsel %vm5072_vm7, %v753_v5, %v760_v6  ;;  %v867_v15 = vsel %vm5079_vm8, %v762_v7, %v866_v3  ;;  %v5209_v16 = vpack.c.bf16 %v586_v8, %v586_v8  ;;  %975 = vst [vmem:[#allocation2 + $0x8] sm:$0x1] %v974_v37  ;;  %v876_v8 = vld [vmem:[#allocation2 + $0x60] sm:$0xf] }
 0x106   : > { %v961_v18 = vsel %vm5079_vm8, 0, %v960_v11  ;;  %865 = vst [vmem:[#allocation2 + $0x4c] sm:$0xf] %v761_v12  ;;  %v1000_v38 = vld [vmem:[#allocation2 + $0x74] sm:$0x1] }
 0x107   : > { %962 = vst [vmem:[#allocation2 + $0x48] sm:$0x1] %v961_v18  ;;  %v764_v19 = vshrl.u32 %v5209_v16, 16  ;;  %v767_v26 = vshll.u32 %v5209_v16, 16  ;;  %v1001_v43 = vsel %vm5096_vm9, 0, %v1000_v38 }
 0x108   : > { %868 = vst [vmem:[#allocation2 + $0x50] sm:$0x1] %v867_v15  ;;  %v566_v24 = vpop.f32.mrf.mxu0 }
 0x109   : > { %v766_v25 = vrot.slane %v764_v19, 7  ;;  %v567_v30 = vadd.f32 %v5053_v13, %v566_v24  ;;  %1002 = vst [vmem:[#allocation2 + $0x74] sm:$0x1] %v1001_v43  ;;  %v880_v24 = vld [vmem:[#allocation2 + $0x68] sm:$0x1] }
 0x10b   : > { %v769_v34 = vor.u32 %v767_v26, %v766_v25  ;;  %v587_v36 = vmax.f32 %v567_v30, 0.0  ;;  %v770_v53 = vrot.slane %v766_v25, 4 }
 0x10d   : > { %v870_v39 = vsel %vm5063_vm3, %v769_v34, %v869_v32  ;;  %v5224_v41 = vpack.c.bf16 %v587_v36, %v587_v36 }
 0x10e   : > { %871 = vst [vmem:[#allocation2 + $0x54] sm:$0xf] %v870_v39 }
 0x10f   : > { %v991_v45 = vld [vmem:[#allocation2 + $0x50] sm:$0x1]  ;;  %v772_v46 = vshrl.u32 %v5224_v41, 16  ;;  %v775_v50 = vshll.u32 %v5224_v41, 16 }
 0x110   : > { %v992_v47 = vsel %vm5096_vm9, 0, %v991_v45  ;;  %v569_v48 = vpop.f32.mrf.mxu0 }
 0x111   : > { %993 = vst [vmem:[#allocation2 + $0x50] sm:$0x1] %v992_v47  ;;  %v774_v49 = vrot.slane %v772_v46, 7  ;;  %v570_v51 = vadd.f32 %v5053_v13, %v569_v48 }
 0x113   : > { %v777_v57 = vor.u32 %v775_v50, %v774_v49  ;;  %v779_v58 = vrot.slane %v774_v49, 4  ;;  %v588_v59 = vmax.f32 %v570_v51, 0.0 }
 0x115   : > { %v963_v60 = vld [vmem:[#allocation2 + $0x54] sm:$0x1]  ;;  %v778_v62 = vsel %vm5072_vm7, %v770_v53, %v777_v57  ;;  %v874_v63 = vsel %vm5079_vm8, %v779_v58, %v873_v52  ;;  %v5237_v1 = vpack.c.bf16 %v588_v59, %v588_v59 }
 0x116   : > { %v964_v2 = vsel %vm5079_vm8, 0, %v963_v60  ;;  %872 = vst [vmem:[#allocation2 + $0x58] sm:$0xf] %v778_v62 }
 0x117   : > { %965 = vst [vmem:[#allocation2 + $0x54] sm:$0x1] %v964_v2  ;;  %v781_v3 = vshrl.u32 %v5237_v1, 16  ;;  %v784_v6 = vshll.u32 %v5237_v1, 16 }
 0x118   : > { %875 = vst [vmem:[#allocation2 + $0x5c] sm:$0x1] %v874_v63  ;;  %v571_v4 = vpop.f32.mrf.mxu0 }
 0x119   : > { %v783_v5 = vrot.slane %v781_v3, 7  ;;  %v572_v7 = vadd.f32 %v5053_v13, %v571_v4 }
 0x11b   : > { %v786_v11 = vor.u32 %v784_v6, %v783_v5  ;;  %v589_v12 = vmax.f32 %v572_v7, 0.0  ;;  %v787_v25 = vrot.slane %v783_v5, 4 }
 0x11d   : > { %v877_v15 = vsel %vm5063_vm3, %v786_v11, %v876_v8  ;;  %v5246_v18 = vpack.c.bf16 %v589_v12, %v589_v12 }
 0x11e   : > { %878 = vst [vmem:[#allocation2 + $0x60] sm:$0xf] %v877_v15 }
 0x11f   : > { %v994_v14 = vld [vmem:[#allocation2 + $0x5c] sm:$0x1]  ;;  %v789_v19 = vshrl.u32 %v5246_v18, 16  ;;  %v792_v13 = vshll.u32 %v5246_v18, 16 }
 0x120   : > { %v995_v20 = vsel %vm5096_vm9, 0, %v994_v14 }
 0x121   : > { %996 = vst [vmem:[#allocation2 + $0x5c] sm:$0x1] %v995_v20  ;;  %v791_v21 = vrot.slane %v789_v19, 7 }
 0x123   : > { %v794_v26 = vor.u32 %v792_v13, %v791_v21  ;;  %v796_v29 = vrot.slane %v791_v21, 4 }
 0x125   : > { %v966_v23 = vld [vmem:[#allocation2 + $0x60] sm:$0x1]  ;;  %v795_v30 = vsel %vm5072_vm7, %v787_v25, %v794_v26  ;;  %v881_v32 = vsel %vm5079_vm8, %v796_v29, %v880_v24 }
 0x126   : > { %v967_v33 = vsel %vm5079_vm8, 0, %v966_v23  ;;  %879 = vst [vmem:[#allocation2 + $0x64] sm:$0xf] %v795_v30 }
 0x127   : > { %968 = vst [vmem:[#allocation2 + $0x60] sm:$0x1] %v967_v33 }
 0x128   : > { %882 = vst [vmem:[#allocation2 + $0x68] sm:$0x1] %v881_v32 }
 0x12d   : > { %1006 = sbr.rel (%p3889_p4) target bundleno = 310 (0x136), region = 52 }
 0x12f   : > { %v997_v34 = vld [vmem:[#allocation2 + $0x68] sm:$0x1] }
 0x130   : > { %v998_v36 = vsel %vm5096_vm9, 0, %v997_v34 }
 0x131   : > { %999 = vst [vmem:[#allocation2 + $0x68] sm:$0x1] %v998_v36 }
 0x132   : > { %v4889_v31 = vmov 0  }
 0x133   : > { %1007 = vst [vmem:[#allocation2] sm:$0xf] %v4889_v31 }
 0x134   : > { %1008 = vst [vmem:[#allocation2 + $0x4] sm:$0xf] %v4889_v31 }
 0x135   : > { %1009 = vst [vmem:[#allocation2 + $0x8] sm:$0x1] %v4889_v31 }
 0x136 PF: > { %p3890_p5 = scmp.ne.s32.totalorder %s4871_s27, 1 }
 0x138   : > { %1013 = sbr.rel (%p3890_p5) target bundleno = 321 (0x141), region = 56 }
 0x13d   : > { %v4890_v35 = vmov 0  }
 0x13e   : > { %1014 = vst [vmem:[#allocation2 + $0x6c] sm:$0xf] %v4890_v35 }
 0x13f   : > { %1015 = vst [vmem:[#allocation2 + $0x70] sm:$0xf] %v4890_v35 }
 0x140   : > { %1016 = vst [vmem:[#allocation2 + $0x74] sm:$0x1] %v4890_v35 }
 0x141 PF: > { %v4627_v54 = vld [vmem:[%s5963_s4 + $0x38] sm:$0xff]  ;;  %v4626_v38 = vld [vmem:[%s5963_s4 + $0x30] sm:$0xff]  ;;  %1471 = vst [vmem:[#allocation3 + $0x10] sm:$0xf] %v5056_v17  ;;  %v4625_v43 = vld [vmem:[%s5963_s4 + $0x28] sm:$0xff]  ;;  %vm1348_vm13 = vcmask 1042432  }
 0x142   : > { %v5271_v37 = vld [vmem:[%s5963_s4 + $0x78] sm:$0xff]  ;;  %4701 = vmatpush.bf16.msra.mxu3 %v4627_v54  ;;  %v5280_v39 = vld [vmem:[%s5963_s4 + $0x70] sm:$0xff]  ;;  %3065 = vmatpush.bf16.msrb.mxu1 %v4627_v54  ;;  %1472 = vst [vmem:[#allocation3 + $0x34] sm:$0xf] %v5069_v28  ;;  %vm1073_vm10 = vsmask.f32 3328 }
 0x143   : > { %4709 = vmatpush.bf16.msrb.mxu2 %v5271_v37  ;;  %1473 = vst [vmem:[#allocation3 + $0x58] sm:$0xf] %v5087_v44  ;;  %v5291_v45 = vld [vmem:[%s5963_s4 + $0x68] sm:$0xff]  ;;  %v1021_v46 = vld [vmem:[#allocation2 + $0x18] sm:$0xf]  ;;  %v4624_v44 = vld [vmem:[%s5963_s4 + $0x20] sm:$0xff] }
 0x144   : > { %v1022_v47 = vld [vmem:[#allocation2 + $0x1c] sm:$0xf]  ;;  %1037 = vst [vmem:[#allocation3 + $0x90] sm:$0xf] %v1021_v46  ;;  %v1055_v17 = vld [vmem:[#allocation2 + $0x18] sm:$0xf] }
 0x145   : > { %v1056_v28 = vld [vmem:[#allocation2 + $0x1c] sm:$0xf]  ;;  %1038 = vst [vmem:[#allocation3 + $0xb4] sm:$0xf] %v1022_v47  ;;  %v1057_v48 = vld [vmem:[#allocation2 + $0x20] sm:$0x1] }
 0x146   : > { %4702 = vmatpush.bf16.msra.mxu3 %v4626_v38  ;;  %v1125_v49 = vshrl.u32 %v1055_v17, 16  ;;  %v1128_v50 = vshll.u32 %v1055_v17, 16  ;;  %3066 = vmatpush.bf16.msrb.mxu1 %v4626_v38  ;;  %vm1074_vm11 = vsmask.f32 7440  ;;  %v1134_v51 = vshll.u32 %v1056_v28, 16  ;;  %v5301_v62 = vld [vmem:[%s5963_s4 + $0x60] sm:$0xff] }
 0x147   : > { %4710 = vmatpush.bf16.msrb.mxu2 %v5280_v39  ;;  %v1138_v52 = vshrl.u32 %v1056_v28, 16  ;;  %v1144_v53 = vshll.u32 %v1057_v48, 16  ;;  %v1023_v59 = vld [vmem:[#allocation2 + $0x24] sm:$0xf]  ;;  %v1024_v60 = vld [vmem:[#allocation2 + $0x28] sm:$0xf]  ;;  %vm5305_vm12 = vmor %vm1073_vm10, %vm1074_vm11 }
 0x148   : > { %v1127_v57 = vrot.slane %v1125_v49, 4  ;;  %v1130_v58 = vrot.slane %v1128_v50, 5  ;;  %v1136_v63 = vrot.slane %v1134_v51, 5  ;;  %1039 = vst [vmem:[#allocation3 + $0xd8] sm:$0xf] %v1023_v59  ;;  %v4623_v13 = vld [vmem:[%s5963_s4 + $0x18] sm:$0xff] }
 0x149   : > { %v1140_v2 = vrot.slane %v1138_v52, 4  ;;  %v1146_v3 = vrot.slane %v1144_v53, 5  ;;  %1040 = vst [vmem:[#allocation3 + $0xfc] sm:$0xf] %v1024_v60  ;;  %v1058_v5 = vld [vmem:[#allocation2 + $0x24] sm:$0xf] }
 0x14a   : > { %4703 = vmatpush.bf16.msra.mxu3 %v4625_v43  ;;  %v1131_v4 = vor.u32 %v1130_v58, %v1127_v57  ;;  %v1059_v6 = vld [vmem:[#allocation2 + $0x28] sm:$0xf]  ;;  %3067 = vmatpush.bf16.msrb.mxu1 %v4625_v43  ;;  %v1060_v11 = vld [vmem:[#allocation2 + $0x2c] sm:$0x1]  ;;  %v1149_v12 = vshrl.u32 %v1058_v5, 16  ;;  %v1152_v15 = vshll.u32 %v1058_v5, 16 }
 0x14b   : > { %4711 = vmatpush.bf16.msrb.mxu2 %v5291_v45  ;;  %v1141_v8 = vor.u32 %v1140_v2, %v1136_v63  ;;  %v1158_v14 = vshll.u32 %v1059_v6, 16  ;;  %v1162_v20 = vshrl.u32 %v1059_v6, 16  ;;  %v1168_v21 = vshll.u32 %v1060_v11, 16  ;;  %v5316_v24 = vld [vmem:[%s5963_s4 + $0x58] sm:$0xff]  ;;  %v1061_v33 = vld [vmem:[#allocation2 + $0x30] sm:$0xf] }
 0x14c   : > { %v1132_v19 = vrot.slane %v1131_v4, 4  ;;  %v1151_v26 = vrot.slane %v1149_v12, 4  ;;  %v1154_v29 = vrot.slane %v1152_v15, 5  ;;  %v1173_v31 = vshrl.u32 %v1061_v33, 16  ;;  %v1062_v43 = vld [vmem:[#allocation2 + $0x34] sm:$0xf] }
 0x14d   : > { %v1142_v25 = vrot.slane %v1141_v8, 4  ;;  %v1160_v23 = vrot.slane %v1158_v14, 5  ;;  %v1164_v32 = vrot.slane %v1162_v20, 4  ;;  %v1176_v35 = vshll.u32 %v1061_v33, 16  ;;  %v4622_v46 = vld [vmem:[%s5963_s4 + $0x10] sm:$0xff]  ;;  %v4621_v60 = vld [vmem:[%s5963_s4 + $0x8] sm:$0xff] }
 0x14e   : > { %4704 = vmatpush.bf16.msra.mxu3 %v4624_v44  ;;  %v1137_v30 = vsel %vm5305_vm12, %v1132_v19, %v1136_v63  ;;  %3068 = vmatpush.bf16.msrb.mxu1 %v4624_v44  ;;  %v1155_v36 = vor.u32 %v1154_v29, %v1151_v26  ;;  %v1170_v38 = vrot.slane %v1168_v21, 5  ;;  %v5329_v47 = vld [vmem:[%s5963_s4 + $0x50] sm:$0xff]  ;;  %v1175_v50 = vrot.slane %v1173_v31, 4  ;;  %v1063_v51 = vld [vmem:[#allocation2 + $0x38] sm:$0x1]  ;;  %v5342_v63 = vld [vmem:[%s5963_s4 + $0x48] sm:$0xff] }
 0x14f   : > { %4712 = vmatpush.bf16.msrb.mxu2 %v5301_v62  ;;  %v1147_v34 = vsel %vm5305_vm12, %v1142_v25, %v1146_v3  ;;  %1288 = vst [vmem:[#allocation3 + $0x94] sm:$0xf] %v1137_v30  ;;  %v1165_v54 = vor.u32 %v1164_v32, %v1160_v23  ;;  %v1025_v28 = vld [vmem:[#allocation2 + $0x30] sm:$0xf]  ;;  %v1026_v49 = vld [vmem:[#allocation2 + $0x34] sm:$0xf] }
 0x150   : > { %1289 = vst [vmem:[#allocation3 + $0xb8] sm:$0xf] %v1147_v34  ;;  %v1156_v17 = vrot.slane %v1155_v36, 4  ;;  %v1178_v52 = vrot.slane %v1176_v35, 5  ;;  %v1182_v53 = vshll.u32 %v1062_v43, 16  ;;  %v1186_v58 = vshrl.u32 %v1062_v43, 16 }
 0x151   : > { %v1166_v48 = vrot.slane %v1165_v54, 4  ;;  %1041 = vst [vmem:[#allocation3 + $0x120] sm:$0xf] %v1025_v28  ;;  %v1192_v59 = vshll.u32 %v1063_v51, 16  ;;  %v4620_v5 = vld [vmem:[%s5963_s4] sm:$0xff]  ;;  %v4659_v21 = vld [vmem:[%s5963_s4 + $0x138] sm:$0xff] }
 0x152   : > { %4705 = vmatpush.bf16.msra.mxu3 %v4623_v13  ;;  %3069 = vmatpush.bf16.msrb.mxu1 %v4623_v13  ;;  %v1161_v44 = vsel %vm5305_vm12, %v1156_v17, %v1160_v23  ;;  %1042 = vst [vmem:[#allocation3 + $0x144] sm:$0xf] %v1026_v49  ;;  %v1179_v2 = vor.u32 %v1178_v52, %v1175_v50  ;;  %v1184_v3 = vrot.slane %v1182_v53, 5  ;;  %v1188_v4 = vrot.slane %v1186_v58, 4  ;;  %v3989_v6 = vld [vmem:[#allocation3 + $0x90] sm:$0xf] }
 0x153   : > { %4713 = vmatpush.bf16.msrb.mxu2 %v5316_v24  ;;  %v1171_v57 = vsel %vm5305_vm12, %v1166_v48, %v1170_v38  ;;  %1290 = vst [vmem:[#allocation3 + $0xdc] sm:$0xf] %v1161_v44  ;;  %v5352_v11 = vld [vmem:[%s5963_s4 + $0x40] sm:$0xff]  ;;  %v4570_v12 = vld [vmem:[#allocation3 + $0xb0] sm:$0xf0]  ;;  %v1194_v14 = vrot.slane %v1192_v59, 5 }
 0x154   : > { %1291 = vst [vmem:[#allocation3 + $0x100] sm:$0xf] %v1171_v57  ;;  %v1180_v8 = vrot.slane %v1179_v2, 4  ;;  %v1189_v15 = vor.u32 %v1188_v4, %v1184_v3  ;;  %v1064_v29 = vld [vmem:[#allocation2 + $0x3c] sm:$0xf]  ;;  %v4658_v33 = vld [vmem:[%s5963_s4 + $0x130] sm:$0xff] }
 0x155   : > { %1474 = vst [vmem:[#allocation3 + $0x7c] sm:$0xf] %v5102_v56  ;;  %v1197_v23 = vshrl.u32 %v1064_v29, 16  ;;  %v1200_v30 = vshll.u32 %v1064_v29, 16  ;;  %v1017_v54 = vld [vmem:[#allocation2] sm:$0xf] }
 0x156   : > { %4706 = vmatpush.bf16.msra.mxu3 %v4622_v46  ;;  %3070 = vmatpush.bf16.msrb.mxu1 %v4622_v46  ;;  %1475 = vst [vmem:[#allocation3 + $0xa0] sm:$0xf] %v5113_v9  ;;  %v4566_v56 = vld [vmem:[#allocation3 + $0x94] sm:$0xf]  ;;  %v1185_v20 = vsel %vm5305_vm12, %v1180_v8, %v1184_v3  ;;  %v4643_v9 = vld [vmem:[%s5963_s4 + $0xb8] sm:$0xff]  ;;  %v1190_v13 = vrot.slane %v1189_v15, 4 }
 0x157   : > { %4714 = vmatpush.bf16.msrb.mxu2 %v5329_v47  ;;  %1476 = vst [vmem:[#allocation3 + $0xc4] sm:$0xf] %v5122_v22  ;;  %v3991_v19 = vld [vmem:[#allocation3 + $0xb4] sm:$0xf0]  ;;  %v3990_v22 = vor.u32 %v4570_v12, %v3989_v6  ;;  %v1199_v36 = vrot.slane %v1197_v23, 4  ;;  %v1202_v31 = vrot.slane %v1200_v30, 5 }
 0x158   : > { %1477 = vst [vmem:[#allocation3 + $0xe8] sm:$0xf] %v5133_v42  ;;  %v3994_v25 = vor.u32 %v4566_v56, %v3991_v19  ;;  %v1195_v26 = vsel %vm5305_vm12, %v1190_v13, %v1194_v14  ;;  %v1065_v42 = vld [vmem:[#allocation2 + $0x40] sm:$0xf]  ;;  %v4641_v43 = vld [vmem:[%s5963_s4 + $0xa8] sm:$0xff]  ;;  %vm1349_vm14 = vcmask 1046532  }
 0x159   : > { %1292 = vst [vmem:[#allocation3 + $0x124] sm:$0xf] %v1185_v20  ;;  %v1206_v32 = vshll.u32 %v1065_v42, 16  ;;  %v1210_v34 = vshrl.u32 %v1065_v42, 16  ;;  %v4657_v46 = vld [vmem:[%s5963_s4 + $0x128] sm:$0xff]  ;;  %v4656_v53 = vld [vmem:[%s5963_s4 + $0x120] sm:$0xff]  ;;  %vm5475_vm15 = vmor %vm1348_vm13, %vm1349_vm14 }
 0x15a   : > { %4707 = vmatpush.bf16.msra.mxu3 %v4621_v60  ;;  %3071 = vmatpush.bf16.msrb.mxu1 %v4621_v60  ;;  %1478 = vst [vmem:[#allocation3 + $0x10c] sm:$0xf] %v5142_v55  ;;  %v4642_v55 = vld [vmem:[%s5963_s4 + $0xb0] sm:$0xff]  ;;  %v1018_v17 = vld [vmem:[#allocation2 + $0x4] sm:$0xf]  ;;  %vm3643_vm0 = vcmask 130048  }
 0x15b   : > { %4715 = vmatpush.bf16.msrb.mxu2 %v5342_v63  ;;  %1293 = vst [vmem:[#allocation3 + $0x148] sm:$0xf] %v1195_v26  ;;  %v1208_v35 = vrot.slane %v1206_v32, 5  ;;  %v1212_v38 = vrot.slane %v1210_v34, 4  ;;  %v1028_v28 = vld [vmem:[#allocation2 + $0x40] sm:$0xf] }
 0x15c   : > { %1479 = vst [vmem:[#allocation3 + $0x130] sm:$0xf] %v5153_v10  ;;  %v1203_v10 = vor.u32 %v1202_v31, %v1199_v36  ;;  %v1066_v49 = vld [vmem:[#allocation2 + $0x44] sm:$0x1]  ;;  %v4025_v58 = vld [vmem:[#allocation3 + $0xd8] sm:$0xf] }
 0x15d   : > { %1480 = vst [vmem:[#allocation3 + $0x154] sm:$0xf] %v5162_v27  ;;  %v1027_v27 = vld [vmem:[#allocation2 + $0x3c] sm:$0xf]  ;;  %v1213_v48 = vor.u32 %v1212_v38, %v1208_v35  ;;  %v1216_v51 = vshll.u32 %v1066_v49, 16  ;;  %s4700_s30 = sshll.u32 %s4871_s27, 4 }
 0x15e   : > { %4708 = vmatpush.bf16.msra.mxu3 %v4620_v5  ;;  %3072 = vmatpush.bf16.msrb.mxu1 %v4620_v5  ;;  %1033 = vst [vmem:[#allocation3] sm:$0xf] %v1017_v54  ;;  %v1204_v50 = vrot.slane %v1203_v10, 4  ;;  %v4579_v59 = vld [vmem:[#allocation3 + $0xf8] sm:$0xf0]  ;;  %s4526_s11 = sshll.u32 %s4875_s28, 5 }
 0x15f   : > { %4716 = vmatpush.bf16.msrb.mxu2 %v5352_v11  ;;  %1034 = vst [vmem:[#allocation3 + $0x24] sm:$0xf] %v1018_v17  ;;  %v1214_v44 = vrot.slane %v1213_v48, 4  ;;  %v1218_v57 = vrot.slane %v1216_v51, 5  ;;  %v4575_v60 = vld [vmem:[#allocation3 + $0xdc] sm:$0xf]  ;;  %s3673_s19 = sadd.s32 %s4700_s30, %s4526_s11 }
 0x160   : > { %1043 = vst [vmem:[#allocation3 + $0x168] sm:$0xf] %v1027_v27  ;;  %v1209_v52 = vsel %vm5305_vm12, %v1204_v50, %v1208_v35  ;;  %v4027_v2 = vld [vmem:[#allocation3 + $0xfc] sm:$0xf0]  ;;  %v1067_v6 = vld [vmem:[#allocation2 + $0x48] sm:$0xf] }
 0x161   : > { %3083 = vmatmul.bf16.vlgmr.msra.gmra.mxu3 %v3990_v22  ;;  %1044 = vst [vmem:[#allocation3 + $0x18c] sm:$0xf] %v1028_v28  ;;  %v4030_v5 = vor.u32 %v4575_v60, %v4027_v2  ;;  %v1068_v8 = vld [vmem:[#allocation2 + $0x4c] sm:$0xf]  ;;  %v1224_v12 = vshll.u32 %v1067_v6, 16  ;;  %v4651_v60 = vld [vmem:[%s5963_s4 + $0xf8] sm:$0xff] }
 0x162   : > { %3261 = vmatpush.bf16.msrb.mxu3 %v4659_v21  ;;  %3132 = vmatmul.bf16.vlgmr.msrb.gmra.mxu2 %v3994_v25  ;;  %1481 = vst [vmem:[#allocation3 + $0x178] sm:$0xf] %v5177_v61  ;;  %v1219_v61 = vsel %vm5305_vm12, %v1214_v44, %v1218_v57  ;;  %v1230_v15 = vshll.u32 %v1068_v8, 16  ;;  %v1029_v22 = vld [vmem:[#allocation2 + $0x48] sm:$0xf]  ;;  %s4527_s20 = sshll.u32 %s3673_s19, 3 }
 0x163   : > { %3163 = vmatpush.bf16.msra.mxu2 %v4643_v9  ;;  %3114 = vmatpush.bf16.msra.mxu1 %v5271_v37  ;;  %v4640_v37 = vld [vmem:[%s5963_s4 + $0xa0] sm:$0xff]  ;;  %1294 = vst [vmem:[#allocation3 + $0x16c] sm:$0xf] %v1209_v52  ;;  %v1226_v56 = vrot.slane %v1224_v12, 5  ;;  %v4638_v9 = vld [vmem:[%s5963_s4 + $0x90] sm:$0xff]  ;;  %s3675_s16 = scalar_lea.hbm %s5966_s7, %s4527_s20  ;;  %s3676_s17 = sshll.u32 %s5261_s3, 4  ;;  %s3677_s17 = int_to_ptr.vmem [resolvable:$true] %s3676_s17 }
 0x164   : > { %1482 = vst [vmem:[#allocation3 + $0x19c] sm:$0xf] %v5186_v40  ;;  %v4026_v40 = vor.u32 %v4579_v59, %v4025_v58  ;;  %v1232_v19 = vrot.slane %v1230_v15, 5  ;;  %v1030_v25 = vld [vmem:[#allocation2 + $0x4c] sm:$0xf]  ;;  %3212 = vmatpush.bf16.msrb.mxu0 %v4651_v60  ;;  %s3678_s12 = sshll.u32 %s3675_s16, 4  ;;  %s3679_s12 = int_to_ptr.hbm [resolvable:$true] %s3678_s12 }
 0x165   : > { %1483 = vst [vmem:[#allocation3 + $0x1c0] sm:$0xf] %v5209_v16  ;;  %v1221_v16 = vshrl.u32 %v1067_v6, 16  ;;  %v1069_v26 = vld [vmem:[#allocation2 + $0x50] sm:$0x1]  ;;  %v4637_v6 = vld [vmem:[%s5963_s4 + $0x88] sm:$0xff] }
 0x166   : > { %3262 = vmatpush.bf16.msrb.mxu3 %v4658_v33  ;;  %v4552_v3 = vld [vmem:[#allocation3 + $0x20] sm:$0xf0]  ;;  %1295 = vst [vmem:[#allocation3 + $0x190] sm:$0xf] %v1219_v61  ;;  %v1240_v23 = vshll.u32 %v1069_v26, 16  ;;  %s5995_s27 = sand.u32 1, %s4863_s25  }
 0x167   : > { %3164 = vmatpush.bf16.msra.mxu2 %v4642_v55  ;;  %3115 = vmatpush.bf16.msra.mxu1 %v5280_v39  ;;  %v3917_v39 = vld [vmem:[#allocation3] sm:$0xf]  ;;  %1484 = vst [vmem:[#allocation3 + $0x1e4] sm:$0xf] %v5224_v41  ;;  %v1223_v14 = vrot.slane %v1221_v16, 4  ;;  %v4653_v16 = vld [vmem:[%s5963_s4 + $0x108] sm:$0xff] }
 0x168   : > { %v3918_v4 = vor.u32 %v4552_v3, %v3917_v39  ;;  %1485 = vst [vmem:[#allocation3 + $0x208] sm:$0xf] %v5237_v1  ;;  %v4639_v41 = vld [vmem:[%s5963_s4 + $0x98] sm:$0xff]  ;;  %v4063_v34 = vld [vmem:[#allocation3 + $0x144] sm:$0xf0]  ;;  %v4654_v3 = vld [vmem:[%s5963_s4 + $0x110] sm:$0xff] }
 0x169   : > { %1486 = vst [vmem:[#allocation3 + $0x22c] sm:$0xf] %v5246_v18  ;;  %v4655_v1 = vld [vmem:[%s5963_s4 + $0x118] sm:$0xff]  ;;  %v1019_v18 = vld [vmem:[#allocation2 + $0xc] sm:$0xf]  ;;  %v1227_v21 = vor.u32 %v1226_v56, %v1223_v14  ;;  %s3661_s28 = scalar_lea.sflag [#allocation5], %s5995_s27 }
 0x16a   : > { %3263 = vmatpush.bf16.msrb.mxu3 %v4657_v46  ;;  %3073 = vmatmul.bf16.vlgmr.msrb.gmra.mxu1 %v3918_v4  ;;  %1035 = vst [vmem:[#allocation3 + $0x48] sm:$0xf] %v1019_v18  ;;  %v4061_v32 = vld [vmem:[#allocation3 + $0x120] sm:$0xf]  ;;  %v4588_v55 = vld [vmem:[#allocation3 + $0x140] sm:$0xf0] }
 0x16b   : > { %3165 = vmatpush.bf16.msra.mxu2 %v4641_v43  ;;  %3116 = vmatpush.bf16.msra.mxu1 %v5291_v45  ;;  %v1234_v45 = vshrl.u32 %v1068_v8, 16  ;;  %v1228_v29 = vrot.slane %v1227_v21, 4  ;;  %1045 = vst [vmem:[#allocation3 + $0x1b0] sm:$0xf] %v1029_v22  ;;  %v4584_v33 = vld [vmem:[#allocation3 + $0x124] sm:$0xf]  ;;  %v4062_v48 = vor.u32 %v4588_v55, %v4061_v32 }
 0x16c   : > { %1046 = vst [vmem:[#allocation3 + $0x1d4] sm:$0xf] %v1030_v25  ;;  %v1049_v31 = vld [vmem:[#allocation2] sm:$0xf]  ;;  %v1050_v35 = vld [vmem:[#allocation2 + $0x4] sm:$0xf]  ;;  %v4066_v49 = vor.u32 %v4584_v33, %v4063_v34 }
 0x16d   : > { %v1236_v20 = vrot.slane %v1234_v45, 4  ;;  %v1233_v30 = vsel %vm5305_vm12, %v1228_v29, %v1232_v19  ;;  %v1077_v38 = vshrl.u32 %v1049_v31, 16  ;;  %v1080_v43 = vshll.u32 %v1049_v31, 16  ;;  %v1051_v50 = vld [vmem:[#allocation2 + $0x8] sm:$0x1]  ;;  %v4667_v45 = vld [vmem:[%s5963_s4 + $0x178] sm:$0xff] }
 0x16e   : > { %3264 = vmatpush.bf16.msrb.mxu3 %v4656_v53  ;;  %1296 = vst [vmem:[#allocation3 + $0x1b4] sm:$0xf] %v1233_v30  ;;  %v1090_v17 = vshrl.u32 %v1050_v35, 16  ;;  %v1070_v53 = vld [vmem:[#allocation2 + $0x54] sm:$0xf]  ;;  %s4807_s21 = sshra.s32 %s3679_s12, 4  ;;  %s4808_s21 = int_to_ptr.hbm [resolvable:$true] %s4807_s21 }
 0x16f   : > { %3166 = vmatpush.bf16.msra.mxu2 %v4640_v37  ;;  %3117 = vmatpush.bf16.msra.mxu1 %v5301_v62  ;;  %v1020_v62 = vld [vmem:[#allocation2 + $0x10] sm:$0xf]  ;;  %v1237_v13 = vor.u32 %v1236_v20, %v1232_v19  ;;  %v1079_v27 = vrot.slane %v1077_v38, 4  ;;  %v1082_v28 = vrot.slane %v1080_v43, 5  ;;  %v1096_v37 = vshll.u32 %v1051_v50, 16  ;;  %s4809_s22 = scalar_lea.hbm %s4808_s21, 128  ;;  %p4814_p10 = scmp.lt.s32.totalorder %s4808_s21, %s5966_s7 }
 0x170   : > { %1036 = vst [vmem:[#allocation3 + $0x6c] sm:$0xf] %v1020_v62  ;;  %v1092_v51 = vrot.slane %v1090_v17, 4  ;;  %v1071_v57 = vld [vmem:[#allocation2 + $0x58] sm:$0xf]  ;;  %v1245_v58 = vshrl.u32 %v1070_v53, 16  ;;  %p4810_p6 = scmp.ne.s32.totalorder %s4808_s21, %s4809_s22 }
 0x171   : > { %3088 = vmatmul.bf16.gmra.mxu3 %v4026_v40  ;;  %v1238_v42 = vrot.slane %v1237_v13, 4  ;;  %v3953_v54 = vld [vmem:[#allocation3 + $0x48] sm:$0xf]  ;;  %v1083_v52 = vor.u32 %v1082_v28, %v1079_v27  ;;  %v1248_v59 = vshll.u32 %v1070_v53, 16  ;;  %v1098_v61 = vrot.slane %v1096_v37, 5  ;;  %v4649_v62 = vld [vmem:[%s5963_s4 + $0xe8] sm:$0xff] }
 0x172   : > { %3137 = vmatmul.bf16.gmra.mxu2 %v4030_v5  ;;  %3265 = vmatpush.bf16.msrb.mxu3 %v4655_v1  ;;  %v1254_v2 = vshll.u32 %v1071_v57, 16  ;;  %v1247_v40 = vrot.slane %v1245_v58, 4  ;;  %v4650_v5 = vld [vmem:[%s5963_s4 + $0xf0] sm:$0xff]  ;;  %v1032_v19 = vld [vmem:[#allocation2 + $0x58] sm:$0xf]  ;;  %v4636_v53 = vld [vmem:[%s5963_s4 + $0x80] sm:$0xff]  ;;  %p4811_p7 = pnand %p4810_p6, %p4984_p3 }
 0x173   : > { %3118 = vmatpush.bf16.msra.mxu1 %v5316_v24  ;;  %3167 = vmatpush.bf16.msra.mxu2 %v4639_v41  ;;  %v1242_v24 = vrot.slane %v1240_v23, 5  ;;  %v1084_v39 = vrot.slane %v1083_v52, 4  ;;  %v1250_v12 = vrot.slane %v1248_v59, 5  ;;  %v1031_v14 = vld [vmem:[#allocation2 + $0x54] sm:$0xf]  ;;  %v4648_v23 = vld [vmem:[%s5963_s4 + $0xe0] sm:$0xff] }
 0x174   : > { %v1256_v56 = vrot.slane %v1254_v2, 5  ;;  %v1072_v20 = vld [vmem:[#allocation2 + $0x5c] sm:$0x1]  ;;  %1047 = vst [vmem:[#allocation3 + $0x1f8] sm:$0xf] %v1031_v14  ;;  %3213 = vmatpush.bf16.msrb.mxu0 %v4650_v5  ;;  %v4665_v58 = vld [vmem:[%s5963_s4 + $0x168] sm:$0xff]  ;;  %p4812_p9 = pneg %p4811_p7 }
 0x175   : > { %v1243_v36 = vsel %vm5305_vm12, %v1238_v42, %v1242_v24  ;;  %v1251_v41 = vor.u32 %v1250_v12, %v1247_v40  ;;  %v1264_v18 = vshll.u32 %v1072_v20, 16  ;;  %1048 = vst [vmem:[#allocation3 + $0x21c] sm:$0xf] %v1032_v19  ;;  %v4097_v22 = vld [vmem:[#allocation3 + $0x168] sm:$0xf]  ;;  %s4813_s13 = scalar_lea.hbm %s5966_s7, 512 }
 0x176   : > { %1297 = vst [vmem:[#allocation3 + $0x1d8] sm:$0xf] %v1243_v36  ;;  %3266 = vmatpush.bf16.msrb.mxu3 %v4654_v3  ;;  %v4597_v25 = vld [vmem:[#allocation3 + $0x188] sm:$0xf0]  ;;  %v4099_v29 = vld [vmem:[#allocation3 + $0x18c] sm:$0xf0]  ;;  %p4815_p11 = scmp.lt.s32.totalorder %s4813_s13, %s4809_s22 }
 0x177   : > { %3119 = vmatpush.bf16.msra.mxu1 %v5329_v47  ;;  %3168 = vmatpush.bf16.msra.mxu2 %v4638_v9  ;;  %v4561_v46 = vld [vmem:[#allocation3 + $0x68] sm:$0xf0]  ;;  %v1086_v47 = vshll.u32 %v1050_v35, 16  ;;  %v1252_v9 = vrot.slane %v1251_v41, 4  ;;  %v1266_v13 = vrot.slane %v1264_v18, 5 }
 0x178   : > { %v3954_v10 = vor.u32 %v4561_v46, %v3953_v54  ;;  %v4593_v26 = vld [vmem:[#allocation3 + $0x16c] sm:$0xf]  ;;  %v1052_v24 = vld [vmem:[#allocation2 + $0xc] sm:$0xf]  ;;  %3214 = vmatpush.bf16.msrb.mxu0 %v4649_v62  ;;  %v1053_v55 = vld [vmem:[#allocation2 + $0x10] sm:$0xf]  ;;  %p4816_p12 = por %p4815_p11, %p4814_p10 }
 0x179   : > { %v1088_v44 = vrot.slane %v1086_v47, 5  ;;  %v1257_v42 = vsel %vm5305_vm12, %v1252_v9, %v1256_v56  ;;  %v1101_v33 = vshrl.u32 %v1052_v24, 16  ;;  %v1104_v34 = vshll.u32 %v1052_v24, 16  ;;  %v4652_v59 = vld [vmem:[%s5963_s4 + $0x100] sm:$0xff]  ;;  %v1302_v40 = vld [vmem:[#allocation2 + $0x8] sm:$0x1] }
 0x17a   : > { %3078 = vmatmul.bf16.gmra.mxu1 %v3954_v10  ;;  %3267 = vmatpush.bf16.msrb.mxu3 %v4653_v16  ;;  %1298 = vst [vmem:[#allocation3 + $0x1fc] sm:$0xf] %v1257_v42  ;;  %v1110_v35 = vshll.u32 %v1053_v55, 16  ;;  %v1114_v54 = vshrl.u32 %v1053_v55, 16  ;;  %v4098_v47 = vor.u32 %v4597_v25, %v4097_v22  ;;  %v4102_v17 = vor.u32 %v4593_v26, %v4099_v29  ;;  %v1054_v10 = vld [vmem:[#allocation2 + $0x14] sm:$0x1]  ;;  %p4817_p13 = pnand %p4816_p12, %p4812_p9 }
 0x17b   : > { %3120 = vmatpush.bf16.msra.mxu1 %v5342_v63  ;;  %v1093_v63 = vor.u32 %v1092_v51, %v1088_v44  ;;  %v1089_v8 = vsel %vm5305_vm12, %v1084_v39, %v1088_v44  ;;  %3169 = vmatpush.bf16.msra.mxu2 %v4637_v6  ;;  %v1103_v43 = vrot.slane %v1101_v33, 4  ;;  %v1106_v46 = vrot.slane %v1104_v34, 5  ;;  %v4647_v44 = vld [vmem:[%s5963_s4 + $0xd8] sm:$0xff]  ;;  %v4666_v51 = vld [vmem:[%s5963_s4 + $0x170] sm:$0xff]  ;;  %v1301_v2 = vld [vmem:[#allocation2 + $0x4] sm:$0xf] }
 0x17c   : > { %1284 = vst [vmem:[#allocation3 + $0x4] sm:$0xf] %v1089_v8  ;;  %v1112_v27 = vrot.slane %v1110_v35, 5  ;;  %v1116_v28 = vrot.slane %v1114_v54, 4  ;;  %3215 = vmatpush.bf16.msrb.mxu0 %v4648_v23  ;;  %v1353_v5 = vrot.slane %v1301_v2, 5  ;;  %v4664_v6 = vld [vmem:[%s5963_s4 + $0x160] sm:$0xff] }
 0x17d   : > { %v1094_v4 = vrot.slane %v1093_v63, 4  ;;  %v1356_v8 = vrot.slane %v1302_v40, 5  ;;  %v1439_v16 = vld [vmem:[#allocation2 + $0xc] sm:$0xf]  ;;  %v1440_v12 = vld [vmem:[#allocation2 + $0x10] sm:$0xf] }
 0x17e   : > { %v1117_v50 = vor.u32 %v1116_v28, %v1112_v27  ;;  %3268 = vmatpush.bf16.msrb.mxu3 %v4652_v59  ;;  %1455 = vst [vmem:[#allocation3 + $0xc] sm:$0xf] %v1439_v16  ;;  %v4133_v14 = vld [vmem:[#allocation3 + $0x1b0] sm:$0xf]  ;;  %v4602_v19 = vld [vmem:[#allocation3 + $0x1b4] sm:$0xf] }
 0x17f   : > { %3121 = vmatpush.bf16.msra.mxu1 %v5352_v11  ;;  %v1258_v11 = vshrl.u32 %v1071_v57, 16  ;;  %v1099_v15 = vsel %vm5305_vm12, %v1094_v4, %v1098_v61  ;;  %v4646_v57 = vld [vmem:[%s5963_s4 + $0xd0] sm:$0xff]  ;;  %3170 = vmatpush.bf16.msra.mxu2 %v4636_v53  ;;  %v1300_v61 = vld [vmem:[#allocation2] sm:$0xe]  ;;  %v4645_v4 = vld [vmem:[%s5963_s4 + $0xc8] sm:$0xff] }
 0x180   : > { %1285 = vst [vmem:[#allocation3 + $0x28] sm:$0xf] %v1099_v15  ;;  %v1118_v63 = vrot.slane %v1117_v50, 4  ;;  %3216 = vmatpush.bf16.msrb.mxu0 %v4647_v44  ;;  %v4135_v20 = vld [vmem:[#allocation3 + $0x1d4] sm:$0xf0]  ;;  %v4644_v18 = vld [vmem:[%s5963_s4 + $0xc0] sm:$0xff] }
 0x181   : > { %3093 = vmatmul.bf16.gmra.mxu3 %v4062_v48  ;;  %v1260_v1 = vrot.slane %v1258_v11, 4  ;;  %v1107_v48 = vor.u32 %v1106_v46, %v1103_v43  ;;  %v3891_v11 = vrot.slane %v1300_v61, 9  ;;  %1456 = vst [vmem:[#allocation3 + $0x30] sm:$0xf] %v1440_v12  ;;  %v4663_v9 = vld [vmem:[%s5963_s4 + $0x158] sm:$0xff]  ;;  %v4138_v22 = vor.u32 %v4602_v19, %v4135_v20  ;;  %v4661_v46 = vld [vmem:[%s5963_s4 + $0x148] sm:$0xff] }
 0x182   : > { %3142 = vmatmul.bf16.gmra.mxu2 %v4066_v49  ;;  %v1120_v49 = vshll.u32 %v1054_v10, 16  ;;  %v1488_v25 = vld [vmem:[#allocation2 + $0x10] sm:$0xf]  ;;  %v1487_v29 = vld [vmem:[#allocation2 + $0xc] sm:$0xe]  ;;  %v4675_v34 = vld [vmem:[%s5963_s4 + $0x1b8] sm:$0xff] }
 0x183   : > { %3310 = vmatpush.bf16.msrb.mxu1 %v4667_v45  ;;  %v1261_v21 = vor.u32 %v1260_v1, %v1256_v56  ;;  %v4548_v32 = vld [vmem:[#allocation3 + $0x4] sm:$0xf]  ;;  %v1108_v52 = vrot.slane %v1107_v48, 4  ;;  %v1354_v15 = vsel %vm5475_vm15, %v3891_v11, %v1353_v5  ;;  %v1355_v45 = vrot.slane %v1353_v5, 4  ;;  %v4606_v56 = vld [vmem:[#allocation3 + $0x1d0] sm:$0xf0]  ;;  %3359 = vmatpush.bf16.msrb.mxu2 %v4675_v34 }
 0x184   : > { %v1122_v37 = vrot.slane %v1120_v49, 5  ;;  %3217 = vmatpush.bf16.msrb.mxu0 %v4646_v57  ;;  %1423 = vst [vmem:[#allocation3 + $0x8] sm:$0xf] %v1354_v15  ;;  %v1489_v42 = vld [vmem:[#allocation2 + $0x14] sm:$0x1]  ;;  %v3899_v24 = vrot.slane %v1487_v29, 9 }
 0x185   : > { %v1262_v30 = vrot.slane %v1261_v21, 4  ;;  %v1113_v60 = vsel %vm5305_vm12, %v1108_v52, %v1112_v27  ;;  %v1357_v41 = vsel %vm5475_vm15, %v1355_v45, %v1356_v8  ;;  %v4549_v26 = vld [vmem:[#allocation3 + $0xc] sm:$0xf]  ;;  %v1540_v55 = vrot.slane %v1489_v42, 5  ;;  %v1304_v43 = vld [vmem:[#allocation2 + $0x10] sm:$0xf] }
 0x186   : > { %v1123_v39 = vsel %vm5305_vm12, %v1118_v63, %v1122_v37  ;;  %1286 = vst [vmem:[#allocation3 + $0x4c] sm:$0xf] %v1113_v60  ;;  %v1360_v27 = vrot.slane %v1304_v43, 5  ;;  %v1441_v50 = vld [vmem:[#allocation2 + $0x18] sm:$0xf]  ;;  %v4660_v52 = vld [vmem:[%s5963_s4 + $0x140] sm:$0xff] }
 0x187   : > { %v3919_v36 = vld [vmem:[#allocation3 + $0x24] sm:$0xf0]  ;;  %v1267_v31 = vsel %vm5305_vm12, %v1262_v30, %v1266_v13  ;;  %3311 = vmatpush.bf16.msrb.mxu1 %v4666_v51  ;;  %1287 = vst [vmem:[#allocation3 + $0x70] sm:$0xf] %v1123_v39  ;;  %v4134_v13 = vor.u32 %v4606_v56, %v4133_v14  ;;  %v4662_v30 = vld [vmem:[%s5963_s4 + $0x150] sm:$0xff] }
 0x188   : > { %v3922_v38 = vor.u32 %v4548_v32, %v3919_v36  ;;  %1299 = vst [vmem:[#allocation3 + $0x220] sm:$0xf] %v1267_v31  ;;  %3218 = vmatpush.bf16.msrb.mxu0 %v4645_v4  ;;  %v3927_v23 = vld [vmem:[#allocation3 + $0x2c] sm:$0xf0]  ;;  %v1537_v32 = vrot.slane %v1488_v25, 5  ;;  %v4691_v36 = vld [vmem:[%s5963_s4 + $0x238] sm:$0xff] }
 0x189   : > { %1424 = vst [vmem:[#allocation3 + $0x2c] sm:$0xf] %v1357_v41  ;;  %v3930_v33 = vor.u32 %v4549_v26, %v3927_v23  ;;  %v4683_v31 = vld [vmem:[%s5963_s4 + $0x1f8] sm:$0xff]  ;;  %3457 = vmatpush.bf16.msra.mxu3 %v4691_v36  ;;  %v1362_v49 = vrot.slane %v1360_v27, 4  ;;  %v4169_v51 = vld [vmem:[#allocation3 + $0x1f8] sm:$0xf] }
 0x18a   : > { %3122 = vmatmul.bf16.vlgmr.msra.gmra.mxu1 %v3922_v38  ;;  %v1538_v35 = vsel %vm5475_vm15, %v3899_v24, %v1537_v32  ;;  %v1539_v54 = vrot.slane %v1537_v32, 4  ;;  %v1303_v38 = vld [vmem:[#allocation2 + $0xc] sm:$0xe]  ;;  %v1442_v44 = vld [vmem:[#allocation2 + $0x1c] sm:$0xf]  ;;  %v4674_v12 = vld [vmem:[%s5963_s4 + $0x1b0] sm:$0xff] }
 0x18b   : > { %3312 = vmatpush.bf16.msrb.mxu1 %v4665_v58  ;;  %1607 = vst [vmem:[#allocation3 + $0x14] sm:$0xf] %v1538_v35  ;;  %v3892_v10 = vrot.slane %v1303_v38, 9  ;;  %v4615_v53 = vld [vmem:[#allocation3 + $0x218] sm:$0xf0]  ;;  %3360 = vmatpush.bf16.msrb.mxu2 %v4674_v12 }
 0x18c   : > { %3219 = vmatpush.bf16.msrb.mxu0 %v4644_v18  ;;  %1457 = vst [vmem:[#allocation3 + $0x54] sm:$0xf] %v1441_v50  ;;  %v4611_v63 = vld [vmem:[#allocation3 + $0x1fc] sm:$0xf]  ;;  %v4170_v60 = vor.u32 %v4615_v53, %v4169_v51  ;;  %v1491_v2 = vld [vmem:[#allocation2 + $0x1c] sm:$0xf] }
 0x18d   : > { %v4557_v1 = vld [vmem:[#allocation3 + $0x4c] sm:$0xf]  ;;  %v1361_v48 = vsel %vm5475_vm15, %v3892_v10, %v1360_v27  ;;  %1458 = vst [vmem:[#allocation3 + $0x78] sm:$0xf] %v1442_v44  ;;  %v1490_v40 = vld [vmem:[#allocation2 + $0x18] sm:$0xe] }
 0x18e   : > { %v3955_v62 = vld [vmem:[#allocation3 + $0x6c] sm:$0xf0]  ;;  %1425 = vst [vmem:[#allocation3 + $0x50] sm:$0xf] %v1361_v48  ;;  %v1492_v11 = vld [vmem:[#allocation2 + $0x20] sm:$0x1] }
 0x18f   : > { %3313 = vmatpush.bf16.msrb.mxu1 %v4664_v6  ;;  %v3958_v21 = vor.u32 %v4557_v1, %v3955_v62  ;;  %3220 = vmatmul.bf16.vlgmr.msrb.gmra.mxu0 %v3930_v33  ;;  %v4171_v57 = vld [vmem:[#allocation3 + $0x21c] sm:$0xf0]  ;;  %v3900_v5 = vrot.slane %v1490_v40, 9  ;;  %v1544_v6 = vrot.slane %v1491_v2, 5  ;;  %v1547_v8 = vrot.slane %v1492_v11, 5  ;;  %v4690_v15 = vld [vmem:[%s5963_s4 + $0x230] sm:$0xff] }
 0x190   : > { %3408 = vmatpush.bf16.msra.mxu0 %v4683_v31  ;;  %v4174_v39 = vor.u32 %v4611_v63, %v4171_v57  ;;  %v4682_v14 = vld [vmem:[%s5963_s4 + $0x1f0] sm:$0xff]  ;;  %v1306_v20 = vld [vmem:[#allocation2 + $0x18] sm:$0xe]  ;;  %v1307_v41 = vld [vmem:[#allocation2 + $0x1c] sm:$0xf]  ;;  %3458 = vmatpush.bf16.msra.mxu3 %v4690_v15 }
 0x191   : > { %3098 = vmatmul.bf16.gmra.mxu3 %v4098_v47  ;;  %v1541_v47 = vsel %vm5475_vm15, %v1539_v54, %v1540_v55  ;;  %v1545_v56 = vsel %vm5475_vm15, %v3900_v5, %v1544_v6  ;;  %v1546_v19 = vrot.slane %v1544_v6, 4  ;;  %v1308_v1 = vld [vmem:[#allocation2 + $0x20] sm:$0x1]  ;;  %v3893_v18 = vrot.slane %v1306_v20, 9  ;;  %v1443_v25 = vld [vmem:[#allocation2 + $0x24] sm:$0xf] }
 0x192   : > { %3147 = vmatmul.bf16.gmra.mxu2 %v4102_v17  ;;  %v1305_v17 = vld [vmem:[#allocation2 + $0x14] sm:$0x1]  ;;  %1608 = vst [vmem:[#allocation3 + $0x38] sm:$0xf] %v1541_v47  ;;  %v4550_v58 = vld [vmem:[#allocation3 + $0x14] sm:$0xf] }
 0x193   : > { %3314 = vmatpush.bf16.msrb.mxu1 %v4663_v9  ;;  %v1363_v28 = vrot.slane %v1305_v17, 5  ;;  %v4558_v4 = vld [vmem:[#allocation3 + $0x54] sm:$0xf]  ;;  %1609 = vst [vmem:[#allocation3 + $0x5c] sm:$0xf] %v1545_v56  ;;  %v1367_v62 = vrot.slane %v1307_v41, 5  ;;  %v1548_v9 = vsel %vm5475_vm15, %v1546_v19, %v1547_v8 }
 0x194   : > { %v3963_v16 = vld [vmem:[#allocation3 + $0x74] sm:$0xf0]  ;;  %3409 = vmatpush.bf16.msra.mxu0 %v4682_v14  ;;  %1610 = vst [vmem:[#allocation3 + $0x80] sm:$0xf] %v1548_v9  ;;  %v1444_v26 = vld [vmem:[#allocation2 + $0x28] sm:$0xf] }
 0x195   : > { %v1364_v37 = vsel %vm5475_vm15, %v1362_v49, %v1363_v28  ;;  %v3966_v45 = vor.u32 %v4558_v4, %v3963_v16  ;;  %1459 = vst [vmem:[#allocation3 + $0x9c] sm:$0xf] %v1443_v25  ;;  %v3933_v42 = vld [vmem:[#allocation3 + $0x10] sm:$0xf]  ;;  %v4554_v23 = vld [vmem:[#allocation3 + $0x30] sm:$0xf0] }
 0x196   : > { %1426 = vst [vmem:[#allocation3 + $0x74] sm:$0xf] %v1364_v37  ;;  %v4553_v24 = vld [vmem:[#allocation3 + $0x28] sm:$0xf0]  ;;  %v3934_v34 = vor.u32 %v4554_v23, %v3933_v42  ;;  %v1494_v31 = vld [vmem:[#allocation2 + $0x28] sm:$0xf] }
 0x197   : > { %3315 = vmatpush.bf16.msrb.mxu1 %v4662_v30  ;;  %1460 = vst [vmem:[#allocation3 + $0xc0] sm:$0xf] %v1444_v26  ;;  %v3925_v30 = vld [vmem:[#allocation3 + $0x8] sm:$0xf]  ;;  %v1493_v54 = vld [vmem:[#allocation2 + $0x24] sm:$0xe] }
 0x198   : > { %v3926_v33 = vor.u32 %v4553_v24, %v3925_v30  ;;  %v1495_v38 = vld [vmem:[#allocation2 + $0x2c] sm:$0x1]  ;;  %v1551_v47 = vrot.slane %v1494_v31, 5  ;;  %v1310_v28 = vld [vmem:[#allocation2 + $0x28] sm:$0xf] }
 0x199   : > { %v3935_v59 = vld [vmem:[#allocation3 + $0x34] sm:$0xf0]  ;;  %v1554_v17 = vrot.slane %v1495_v38, 5  ;;  %v4673_v27 = vld [vmem:[%s5963_s4 + $0x1a8] sm:$0xff]  ;;  %v1374_v50 = vrot.slane %v1310_v28, 5 }
 0x19a   : > { %3127 = vmatmul.bf16.gmra.mxu1 %v3958_v21  ;;  %v3938_v61 = vor.u32 %v4550_v58, %v3935_v59  ;;  %v1370_v21 = vrot.slane %v1308_v1, 5  ;;  %v4559_v32 = vld [vmem:[#allocation3 + $0x5c] sm:$0xf]  ;;  %v1553_v49 = vrot.slane %v1551_v47, 4  ;;  %3361 = vmatpush.bf16.msrb.mxu2 %v4673_v27  ;;  %v1309_v44 = vld [vmem:[#allocation2 + $0x24] sm:$0xe] }
 0x19b   : > { %3316 = vmatpush.bf16.msrb.mxu1 %v4661_v46  ;;  %v3971_v55 = vld [vmem:[#allocation3 + $0x7c] sm:$0xf0]  ;;  %v3901_v46 = vrot.slane %v1493_v54, 9  ;;  %v1311_v51 = vld [vmem:[#allocation2 + $0x2c] sm:$0x1]  ;;  %v3894_v37 = vrot.slane %v1309_v44, 9 }
 0x19c   : > { %v3974_v36 = vor.u32 %v4559_v32, %v3971_v55  ;;  %v4567_v35 = vld [vmem:[#allocation3 + $0x9c] sm:$0xf]  ;;  %v1376_v53 = vrot.slane %v1374_v50, 4  ;;  %v1377_v63 = vrot.slane %v1311_v51, 5  ;;  %v1445_v59 = vld [vmem:[#allocation2 + $0x30] sm:$0xf] }
 0x19d   : > { %v1552_v48 = vsel %vm5475_vm15, %v3901_v46, %v1551_v47  ;;  %v1375_v57 = vsel %vm5475_vm15, %v3894_v37, %v1374_v50  ;;  %v3961_v2 = vld [vmem:[#allocation3 + $0x50] sm:$0xf]  ;;  %v3969_v4 = vld [vmem:[#allocation3 + $0x58] sm:$0xf]  ;;  %v4563_v40 = vld [vmem:[#allocation3 + $0x78] sm:$0xf0] }
 0x19e   : > { %v3999_v43 = vld [vmem:[#allocation3 + $0xbc] sm:$0xf0]  ;;  %1611 = vst [vmem:[#allocation3 + $0xa4] sm:$0xf] %v1552_v48  ;;  %v1378_v58 = vsel %vm5475_vm15, %v1376_v53, %v1377_v63  ;;  %v4562_v11 = vld [vmem:[#allocation3 + $0x70] sm:$0xf0]  ;;  %v3970_v16 = vor.u32 %v4563_v40, %v3969_v4 }
 0x19f   : > { %3317 = vmatpush.bf16.msrb.mxu1 %v4660_v52  ;;  %3225 = vmatmul.bf16.gmra.mxu0 %v3966_v45  ;;  %v4002_v10 = vor.u32 %v4567_v35, %v3999_v43  ;;  %v1555_v52 = vsel %vm5475_vm15, %v1553_v49, %v1554_v17  ;;  %1429 = vst [vmem:[#allocation3 + $0xe0] sm:$0xf] %v1375_v57  ;;  %v1497_v15 = vld [vmem:[#allocation2 + $0x34] sm:$0xf]  ;;  %v1496_v45 = vld [vmem:[#allocation2 + $0x30] sm:$0xe] }
 0x1a0   : > { %1612 = vst [vmem:[#allocation3 + $0xc8] sm:$0xf] %v1555_v52  ;;  %v3962_v8 = vor.u32 %v4562_v11, %v3961_v2  ;;  %v1498_v14 = vld [vmem:[#allocation2 + $0x38] sm:$0x1]  ;;  %v3902_v19 = vrot.slane %v1496_v45, 9  ;;  %v1558_v20 = vrot.slane %v1497_v15, 5 }
 0x1a1   : > { %3103 = vmatmul.bf16.gmra.mxu3 %v4134_v13  ;;  %v1368_v13 = vsel %vm5475_vm15, %v3893_v18, %v1367_v62  ;;  %1430 = vst [vmem:[#allocation3 + $0x104] sm:$0xf] %v1378_v58  ;;  %v1561_v41 = vrot.slane %v1498_v14, 5  ;;  %v4672_v18 = vld [vmem:[%s5963_s4 + $0x1a0] sm:$0xff]  ;;  %v1312_v25 = vld [vmem:[#allocation2 + $0x30] sm:$0xe] }
 0x1a2   : > { %3152 = vmatmul.bf16.gmra.mxu2 %v4138_v22  ;;  %v1369_v22 = vrot.slane %v1367_v62, 4  ;;  %1427 = vst [vmem:[#allocation3 + $0x98] sm:$0xf] %v1368_v13  ;;  %v1313_v62 = vld [vmem:[#allocation2 + $0x34] sm:$0xf]  ;;  %v1560_v13 = vrot.slane %v1558_v20, 4 }
 0x1a3   : > { %1461 = vst [vmem:[#allocation3 + $0xe4] sm:$0xf] %v1445_v59  ;;  %3362 = vmatpush.bf16.msrb.mxu2 %v4672_v18  ;;  %v1314_v26 = vld [vmem:[#allocation2 + $0x38] sm:$0x1]  ;;  %v3895_v42 = vrot.slane %v1312_v25, 9  ;;  %v5573_v52 = vperm.slane %v5008_v0, 0 }
 0x1a4   : > { %v1371_v29 = vsel %vm5475_vm15, %v1369_v22, %v1370_v21  ;;  %v1559_v21 = vsel %vm5475_vm15, %v3902_v19, %v1558_v20  ;;  %v1381_v22 = vrot.slane %v1313_v62, 5  ;;  %v1384_v30 = vrot.slane %v1314_v26, 5  ;;  %v1447_v55 = vld [vmem:[#allocation2 + $0x3c] sm:$0xf]  ;;  %v4005_v35 = vld [vmem:[#allocation3 + $0xa0] sm:$0xf] }
 0x1a5   : > { %1428 = vst [vmem:[#allocation3 + $0xbc] sm:$0xf] %v1371_v29  ;;  %v4568_v5 = vld [vmem:[#allocation3 + $0xa4] sm:$0xf]  ;;  %v1562_v29 = vsel %vm5475_vm15, %v1560_v13, %v1561_v41  ;;  %v1500_v27 = vld [vmem:[#allocation2 + $0x40] sm:$0xf] }
 0x1a6   : > { %1613 = vst [vmem:[#allocation3 + $0xec] sm:$0xf] %v1559_v21  ;;  %v1383_v23 = vrot.slane %v1381_v22, 4  ;;  %v1382_v24 = vsel %vm5475_vm15, %v3895_v42, %v1381_v22  ;;  %v4572_v54 = vld [vmem:[#allocation3 + $0xc0] sm:$0xf0]  ;;  %v1565_v44 = vrot.slane %v1500_v27, 5 }
 0x1a7   : > { %v4007_v6 = vld [vmem:[#allocation3 + $0xc4] sm:$0xf0]  ;;  %1614 = vst [vmem:[#allocation3 + $0x110] sm:$0xf] %v1562_v29  ;;  %v4006_v17 = vor.u32 %v4572_v54, %v4005_v35  ;;  %v1499_v28 = vld [vmem:[#allocation2 + $0x3c] sm:$0xe] }
 0x1a8   : > { %v4010_v12 = vor.u32 %v4568_v5, %v4007_v6  ;;  %v1385_v32 = vsel %vm5475_vm15, %v1383_v23, %v1384_v30  ;;  %1431 = vst [vmem:[#allocation3 + $0x128] sm:$0xf] %v1382_v24  ;;  %v1501_v48 = vld [vmem:[#allocation2 + $0x44] sm:$0x1]  ;;  %v3903_v50 = vrot.slane %v1499_v28, 9  ;;  %v4671_v53 = vld [vmem:[%s5963_s4 + $0x198] sm:$0xff] }
 0x1a9   : > { %v3997_v31 = vld [vmem:[#allocation3 + $0x98] sm:$0xf]  ;;  %1432 = vst [vmem:[#allocation3 + $0x14c] sm:$0xf] %v1385_v32  ;;  %v1568_v51 = vrot.slane %v1501_v48, 5  ;;  %v1567_v59 = vrot.slane %v1565_v44, 4  ;;  %3363 = vmatpush.bf16.msrb.mxu2 %v4671_v53 }
 0x1aa   : > { %3318 = vmatmul.bf16.vlgmr.msrb.gmra.mxu1 %v3938_v61  ;;  %v1446_v61 = vld [vmem:[#allocation2 + $0x34] sm:$0xf]  ;;  %v4576_v56 = vld [vmem:[#allocation3 + $0xe4] sm:$0xf]  ;;  %1463 = vst [vmem:[#allocation3 + $0x12c] sm:$0xf] %v1447_v55  ;;  %v1566_v58 = vsel %vm5475_vm15, %v3903_v50, %v1565_v44 }
 0x1ab   : > { %1462 = vst [vmem:[#allocation3 + $0x108] sm:$0xf] %v1446_v61  ;;  %v1316_v63 = vld [vmem:[#allocation2 + $0x40] sm:$0xf]  ;;  %v1317_v61 = vld [vmem:[#allocation2 + $0x44] sm:$0x1]  ;;  %v1569_v0 = vsel %vm5475_vm15, %v1567_v59, %v1568_v51 }
 0x1ac   : > { %v4571_v38 = vld [vmem:[#allocation3 + $0xb8] sm:$0xf0]  ;;  %1615 = vst [vmem:[#allocation3 + $0x134] sm:$0xf] %v1566_v58  ;;  %v1391_v5 = vrot.slane %v1317_v61, 5  ;;  %v4687_v45 = vld [vmem:[%s5963_s4 + $0x218] sm:$0xff] }
 0x1ad   : > { %v4577_v43 = vld [vmem:[#allocation3 + $0xec] sm:$0xf]  ;;  %v3998_v47 = vor.u32 %v4571_v38, %v3997_v31  ;;  %1616 = vst [vmem:[#allocation3 + $0x158] sm:$0xf] %v1569_v0  ;;  %v4679_v14 = vld [vmem:[%s5963_s4 + $0x1d8] sm:$0xff] }
 0x1ae   : > { %v4043_v46 = vld [vmem:[#allocation3 + $0x10c] sm:$0xf0]  ;;  %v4033_v19 = vld [vmem:[#allocation3 + $0xe0] sm:$0xf]  ;;  %v4041_v20 = vld [vmem:[#allocation3 + $0xe8] sm:$0xf] }
 0x1af   : > { %3230 = vmatmul.bf16.gmra.mxu0 %v4002_v10  ;;  %v4046_v10 = vor.u32 %v4577_v43, %v4043_v46  ;;  %v4581_v41 = vld [vmem:[#allocation3 + $0x108] sm:$0xf0]  ;;  %v1503_v29 = vld [vmem:[#allocation2 + $0x4c] sm:$0xf]  ;;  %v1502_v23 = vld [vmem:[#allocation2 + $0x48] sm:$0xe] }
 0x1b0   : > { %v4042_v25 = vor.u32 %v4581_v41, %v4041_v20  ;;  %v1504_v30 = vld [vmem:[#allocation2 + $0x50] sm:$0x1]  ;;  %v3904_v32 = vrot.slane %v1502_v23, 9  ;;  %v1572_v55 = vrot.slane %v1503_v29, 5  ;;  %v1319_v31 = vld [vmem:[#allocation2 + $0x4c] sm:$0xf] }
 0x1b1   : > { %3108 = vmatmul.bf16.gmra.mxu3 %v4170_v60  ;;  %v4689_v60 = vld [vmem:[%s5963_s4 + $0x228] sm:$0xff]  ;;  %v4585_v49 = vld [vmem:[#allocation3 + $0x12c] sm:$0xf]  ;;  %v1395_v43 = vrot.slane %v1319_v31, 5  ;;  %v1452_v58 = vld [vmem:[#allocation2 + $0x58] sm:$0xf] }
 0x1b2   : > { %3157 = vmatmul.bf16.gmra.mxu2 %v4174_v39  ;;  %v4681_v39 = vld [vmem:[%s5963_s4 + $0x1e8] sm:$0xff]  ;;  %3459 = vmatpush.bf16.msra.mxu3 %v4689_v60  ;;  %v4035_v1 = vld [vmem:[#allocation3 + $0x104] sm:$0xf0]  ;;  %v1388_v60 = vrot.slane %v1316_v63, 5  ;;  %v1573_v54 = vsel %vm5475_vm15, %v3904_v32, %v1572_v55  ;;  %v1574_v38 = vrot.slane %v1572_v55, 4  ;;  %v4686_v63 = vld [vmem:[%s5963_s4 + $0x210] sm:$0xff] }
 0x1b3   : > { %3410 = vmatpush.bf16.msra.mxu0 %v4681_v39  ;;  %v4038_v9 = vor.u32 %v4576_v56, %v4035_v1  ;;  %v1315_v39 = vld [vmem:[#allocation2 + $0x3c] sm:$0xe]  ;;  %v1450_v56 = vld [vmem:[#allocation2 + $0x4c] sm:$0xf]  ;;  %1617 = vst [vmem:[#allocation3 + $0x17c] sm:$0xf] %v1573_v54 }
 0x1b4   : > { %v3896_v40 = vrot.slane %v1315_v39, 9  ;;  %v1390_v11 = vrot.slane %v1388_v60, 4  ;;  %v4580_v1 = vld [vmem:[#allocation3 + $0x100] sm:$0xf0]  ;;  %v4586_v18 = vld [vmem:[#allocation3 + $0x134] sm:$0xf] }
 0x1b5   : > { %1466 = vst [vmem:[#allocation3 + $0x198] sm:$0xf] %v1450_v56  ;;  %v4079_v21 = vld [vmem:[#allocation3 + $0x154] sm:$0xf0]  ;;  %v4034_v22 = vor.u32 %v4580_v1, %v4033_v19  ;;  %v1318_v46 = vld [vmem:[#allocation2 + $0x48] sm:$0xe] }
 0x1b6   : > { %v4082_v26 = vor.u32 %v4586_v18, %v4079_v21  ;;  %v3897_v28 = vrot.slane %v1318_v46, 9  ;;  %v1397_v48 = vrot.slane %v1395_v43, 4  ;;  %v4069_v59 = vld [vmem:[#allocation3 + $0x128] sm:$0xf]  ;;  %v4590_v39 = vld [vmem:[#allocation3 + $0x150] sm:$0xf0] }
 0x1b7   : > { %v4589_v61 = vld [vmem:[#allocation3 + $0x148] sm:$0xf0]  ;;  %1468 = vst [vmem:[#allocation3 + $0x1e0] sm:$0xf] %v1452_v58  ;;  %v4669_v18 = vld [vmem:[%s5963_s4 + $0x188] sm:$0xff] }
 0x1b8   : > { %v1396_v44 = vsel %vm5475_vm15, %v3897_v28, %v1395_v43  ;;  %v4677_v54 = vld [vmem:[%s5963_s4 + $0x1c8] sm:$0xff]  ;;  %v1454_v43 = vld [vmem:[#allocation2 + $0x64] sm:$0xf] }
 0x1b9   : > { %1435 = vst [vmem:[#allocation3 + $0x1b8] sm:$0xf] %v1396_v44 }
 0x1ba   : > { %3323 = vmatmul.bf16.gmra.mxu1 %v3974_v36  ;;  %v1448_v36 = vld [vmem:[#allocation2 + $0x40] sm:$0xf]  ;;  %1470 = vst [vmem:[#allocation3 + $0x228] sm:$0xf] %v1454_v43 }
 0x1bb   : > { %1464 = vst [vmem:[#allocation3 + $0x150] sm:$0xf] %v1448_v36  ;;  %v4670_v36 = vld [vmem:[%s5963_s4 + $0x190] sm:$0xff] }
 0x1bc   : > { %3364 = vmatpush.bf16.msrb.mxu2 %v4670_v36  ;;  %v1453_v36 = vld [vmem:[#allocation2 + $0x60] sm:$0xf] }
 0x1bd   : > { %1469 = vst [vmem:[#allocation3 + $0x204] sm:$0xf] %v1453_v36 }
 0x1be   : > { %v4143_v1 = vld [vmem:[#allocation3 + $0x1dc] sm:$0xf0] }
 0x1bf   : > { %3235 = vmatmul.bf16.gmra.mxu0 %v4038_v9 }
 0x1c0   : > { %3365 = vmatpush.bf16.msrb.mxu2 %v4669_v18 }
 0x1c1   : > { %3269 = vmatmul.bf16.vlgmr.msrb.gmra.mxu3 %v3934_v34  ;;  %v4680_v34 = vld [vmem:[%s5963_s4 + $0x1e0] sm:$0xff] }
 0x1c2   : > { %3171 = vmatmul.bf16.vlgmr.msra.gmra.mxu2 %v3926_v33  ;;  %v4688_v33 = vld [vmem:[%s5963_s4 + $0x220] sm:$0xff]  ;;  %3411 = vmatpush.bf16.msra.mxu0 %v4680_v34  ;;  %v4071_v37 = vld [vmem:[#allocation3 + $0x14c] sm:$0xf0]  ;;  %v4107_v34 = vld [vmem:[#allocation3 + $0x194] sm:$0xf0] }
 0x1c3   : > { %3460 = vmatpush.bf16.msra.mxu3 %v4688_v33  ;;  %v4074_v57 = vor.u32 %v4585_v49, %v4071_v37  ;;  %v1575_v33 = vrot.slane %v1504_v30, 5  ;;  %v1451_v37 = vld [vmem:[#allocation2 + $0x54] sm:$0xf] }
 0x1c4   : > { %1467 = vst [vmem:[#allocation3 + $0x1bc] sm:$0xf] %v1451_v37 }
 0x1c5   : > { %v1576_v27 = vsel %vm5475_vm15, %v1574_v38, %v1575_v33 }
 0x1c6   : > { %3412 = vmatpush.bf16.msra.mxu0 %v4679_v14  ;;  %1618 = vst [vmem:[#allocation3 + $0x1a0] sm:$0xf] %v1576_v27  ;;  %v1507_v14 = vld [vmem:[#allocation2 + $0x5c] sm:$0x1] }
 0x1c7   : > { %3461 = vmatpush.bf16.msra.mxu3 %v4687_v45  ;;  %v1505_v45 = vld [vmem:[#allocation2 + $0x54] sm:$0xe]  ;;  %v1582_v41 = vrot.slane %v1507_v14, 5 }
 0x1c8   : > { %v3905_v19 = vrot.slane %v1505_v45, 9 }
 0x1ca   : > { %3328 = vmatmul.bf16.gmra.mxu1 %v4010_v12  ;;  %v1449_v12 = vld [vmem:[#allocation2 + $0x48] sm:$0xf] }
 0x1cb   : > { %1465 = vst [vmem:[#allocation3 + $0x174] sm:$0xf] %v1449_v12  ;;  %3462 = vmatpush.bf16.msra.mxu3 %v4686_v63  ;;  %v4603_v56 = vld [vmem:[#allocation3 + $0x1bc] sm:$0xf]  ;;  %v1509_v63 = vld [vmem:[#allocation2 + $0x64] sm:$0xf] }
 0x1cf   : > { %3240 = vmatmul.bf16.gmra.mxu0 %v4074_v57  ;;  %v4678_v57 = vld [vmem:[%s5963_s4 + $0x1d0] sm:$0xff] }
 0x1d0   : > { %3413 = vmatpush.bf16.msra.mxu0 %v4678_v57  ;;  %v1656_v57 = vld [vmem:[#allocation2 + $0x18] sm:$0xf] }
 0x1d1   : > { %3274 = vmatmul.bf16.gmra.mxu3 %v3970_v16  ;;  %v1392_v16 = vsel %vm5475_vm15, %v1390_v11, %v1391_v5  ;;  %v4070_v5 = vor.u32 %v4589_v61, %v4069_v59  ;;  %v1508_v59 = vld [vmem:[#allocation2 + $0x60] sm:$0xe]  ;;  %v4612_v61 = vld [vmem:[#allocation3 + $0x204] sm:$0xf] }
 0x1d2   : > { %3176 = vmatmul.bf16.gmra.mxu2 %v3962_v8  ;;  %v1389_v8 = vsel %vm5475_vm15, %v3896_v40, %v1388_v60  ;;  %1434 = vst [vmem:[#allocation3 + $0x194] sm:$0xf] %v1392_v16  ;;  %v4594_v24 = vld [vmem:[#allocation3 + $0x174] sm:$0xf]  ;;  %v4077_v60 = vld [vmem:[#allocation3 + $0x130] sm:$0xf] }
 0x1d3   : > { %1433 = vst [vmem:[#allocation3 + $0x170] sm:$0xf] %v1389_v8  ;;  %v4110_v35 = vor.u32 %v4594_v24, %v4107_v34  ;;  %v4115_v40 = vld [vmem:[#allocation3 + $0x19c] sm:$0xf0] }
 0x1d4   : > { %v1506_v16 = vld [vmem:[#allocation2 + $0x58] sm:$0xf]  ;;  %3414 = vmatpush.bf16.msra.mxu0 %v4677_v54  ;;  %v4676_v54 = vld [vmem:[%s5963_s4 + $0x1c0] sm:$0xff] }
 0x1d5   : > { %v1579_v20 = vrot.slane %v1506_v16, 5 }
 0x1d7   : > { %v1580_v21 = vsel %vm5475_vm15, %v3905_v19, %v1579_v20  ;;  %v1905_v19 = vld [vmem:[#allocation2 + $0x1c] sm:$0xf] }
 0x1d8   : > { %1619 = vst [vmem:[#allocation3 + $0x1c4] sm:$0xf] %v1580_v21  ;;  %3415 = vmatpush.bf16.msra.mxu0 %v4676_v54 }
 0x1da   : > { %3333 = vmatmul.bf16.gmra.mxu1 %v4046_v10  ;;  %v4105_v46 = vld [vmem:[#allocation3 + $0x170] sm:$0xf] }
 0x1df   : > { %3245 = vmatmul.bf16.gmra.mxu0 %v4110_v35  ;;  %v4685_v35 = vld [vmem:[%s5963_s4 + $0x208] sm:$0xff]  ;;  %v4604_v27 = vld [vmem:[#allocation3 + $0x1c4] sm:$0xf] }
 0x1e0   : > { %3463 = vmatpush.bf16.msra.mxu3 %v4685_v35  ;;  %v4684_v35 = vld [vmem:[%s5963_s4 + $0x200] sm:$0xff] }
 0x1e1   : > { %3279 = vmatmul.bf16.gmra.mxu3 %v4006_v17 }
 0x1e2   : > { %3181 = vmatmul.bf16.gmra.mxu2 %v3998_v47  ;;  %v1320_v47 = vld [vmem:[#allocation2 + $0x50] sm:$0x1] }
 0x1e3   : > { %v1398_v49 = vrot.slane %v1320_v47, 5  ;;  %v4113_v47 = vld [vmem:[#allocation3 + $0x178] sm:$0xf] }
 0x1e4   : > { %v3084_v2 = vpop.f32.mrf.mxu3  ;;  %3464 = vmatpush.bf16.msra.mxu3 %v4684_v35 }
 0x1e5   : > { %v3133_v4 = vpop.f32.mrf.mxu2  ;;  %v3085_v6 = vadd.f32 %v3084_v2, %v5573_v52  ;;  %v1399_v51 = vsel %vm5475_vm15, %v1397_v48, %v1398_v49  ;;  %v4595_v2 = vld [vmem:[#allocation3 + $0x17c] sm:$0xf] }
 0x1e6   : > { %1436 = vst [vmem:[#allocation3 + $0x1dc] sm:$0xf] %v1399_v51  ;;  %v4118_v8 = vor.u32 %v4595_v2, %v4115_v40  ;;  %v3906_v2 = vrot.slane %v1508_v59, 9 }
 0x1e7   : > { %v5587_v15 = vadd.f32 %v3133_v4, %v3085_v6  ;;  %v4078_v6 = vor.u32 %v4590_v39, %v4077_v60  ;;  %v1510_v60 = vld [vmem:[#allocation2 + $0x68] sm:$0x1]  ;;  %v1657_v39 = vld [vmem:[#allocation2 + $0x1c] sm:$0xf]  ;;  %v5644_v40 = vpop.f32.mrf.mxu1 }
 0x1ea   : > { %3338 = vmatmul.bf16.gmra.mxu1 %v4082_v26  ;;  %v1323_v26 = vld [vmem:[#allocation2 + $0x5c] sm:$0x1] }
 0x1eb   : > { %v1405_v33 = vrot.slane %v1323_v26, 5  ;;  %v1954_v26 = vrot.slane %v1905_v19, 5 }
 0x1ec   : > { %v3086_v62 = vpop.f32.mrf.mxu3 }
 0x1ed   : > { %v3135_v9 = vpop.f32.mrf.mxu2  ;;  %v3087_v13 = vadd.f32 %v3086_v62, %v5573_v52  ;;  %v1322_v62 = vld [vmem:[#allocation2 + $0x58] sm:$0xf] }
 0x1ef   : > { %v5596_v42 = vadd.f32 %v3135_v9, %v3087_v13  ;;  %v4146_v9 = vor.u32 %v4603_v56, %v4143_v1  ;;  %v1581_v13 = vrot.slane %v1579_v20, 4  ;;  %v1684_v56 = vshll.u32 %v1656_v57, 16 }
 0x1f0   : > { %v1694_v1 = vshrl.u32 %v1657_v39, 16 }
 0x1f1   : > { %3284 = vmatmul.bf16.gmra.mxu3 %v4042_v25  ;;  %v1321_v25 = vld [vmem:[#allocation2 + $0x54] sm:$0xe]  ;;  %3250 = vmatmul.bf16.gmra.mxu0 %v4146_v9  ;;  %v1583_v30 = vsel %vm5475_vm15, %v1581_v13, %v1582_v41  ;;  %v1690_v41 = vshll.u32 %v1657_v39, 16  ;;  %v1686_v13 = vrot.slane %v1684_v56, 5 }
 0x1f2   : > { %3186 = vmatmul.bf16.gmra.mxu2 %v4034_v22  ;;  %v1402_v22 = vrot.slane %v1322_v62, 5  ;;  %v3898_v24 = vrot.slane %v1321_v25, 9  ;;  %1620 = vst [vmem:[#allocation3 + $0x1e8] sm:$0xf] %v1583_v30  ;;  %v1906_v25 = vld [vmem:[#allocation2 + $0x20] sm:$0x1] }
 0x1f3   : > { %v1696_v30 = vrot.slane %v1694_v1, 4 }
 0x1f4   : > { %v3089_v17 = vpop.f32.mrf.mxu3  ;;  %v1404_v32 = vrot.slane %v1402_v22, 4  ;;  %v1403_v34 = vsel %vm5475_vm15, %v3898_v24, %v1402_v22  ;;  %v1904_v22 = vld [vmem:[#allocation2 + $0x18] sm:$0xe] }
 0x1f5   : > { %v3138_v10 = vpop.f32.mrf.mxu2  ;;  %v3090_v50 = vadd.f32 %v3089_v17, %v5573_v52  ;;  %1437 = vst [vmem:[#allocation3 + $0x200] sm:$0xf] %v1403_v34  ;;  %v4599_v17 = vld [vmem:[#allocation3 + $0x198] sm:$0xf0]  ;;  %v1624_v24 = vld [vmem:[#allocation2 + $0x18] sm:$0xf] }
 0x1f6   : > { %v1406_v38 = vsel %vm5475_vm15, %v1404_v32, %v1405_v33  ;;  %v4114_v51 = vor.u32 %v4599_v17, %v4113_v47  ;;  %v1625_v32 = vld [vmem:[#allocation2 + $0x1c] sm:$0xf]  ;;  %v3907_v33 = vrot.slane %v1904_v22, 9  ;;  %v1956_v34 = vrot.slane %v1954_v26, 4  ;;  %1640 = vst [vmem:[#allocation3 + $0x18] sm:$0xf] %v1624_v24 }
 0x1f7   : > { %v5610_v53 = vadd.f32 %v3138_v10, %v3090_v50  ;;  %1438 = vst [vmem:[#allocation3 + $0x224] sm:$0xf] %v1406_v38  ;;  %v4598_v10 = vld [vmem:[#allocation3 + $0x190] sm:$0xf0]  ;;  %v4141_v47 = vld [vmem:[#allocation3 + $0x1b8] sm:$0xf] }
 0x1f8   : > { %v4106_v44 = vor.u32 %v4598_v10, %v4105_v46  ;;  %v1957_v46 = vrot.slane %v1906_v25, 5  ;;  %v4149_v17 = vld [vmem:[#allocation3 + $0x1c0] sm:$0xf]  ;;  %1641 = vst [vmem:[#allocation3 + $0x3c] sm:$0xf] %v1625_v32 }
 0x1f9   : > { %v4151_v49 = vld [vmem:[#allocation3 + $0x1e4] sm:$0xf0]  ;;  %v1907_v25 = vld [vmem:[#allocation2 + $0x24] sm:$0xe] }
 0x1fa   : > { %3343 = vmatmul.bf16.gmra.mxu1 %v4118_v8  ;;  %v4154_v37 = vor.u32 %v4604_v27, %v4151_v49  ;;  %v1681_v8 = vshrl.u32 %v1656_v57, 16  ;;  %v1955_v27 = vsel %vm5475_vm15, %v3907_v33, %v1954_v26  ;;  %v1958_v49 = vsel %vm5475_vm15, %v1956_v34, %v1957_v46  ;;  %v1909_v26 = vld [vmem:[#allocation2 + $0x2c] sm:$0x1] }
 0x1fb   : > { %2024 = vst [vmem:[#allocation3 + $0x20] sm:$0xf] %v1955_v27  ;;  %v3908_v35 = vrot.slane %v1907_v25, 9  ;;  %v1911_v25 = vld [vmem:[#allocation2 + $0x34] sm:$0xf] }
 0x1fc   : > { %v3091_v4 = vpop.f32.mrf.mxu3  ;;  %v1683_v20 = vrot.slane %v1681_v8, 4  ;;  %2025 = vst [vmem:[#allocation3 + $0x44] sm:$0xf] %v1958_v49  ;;  %v4177_v49 = vld [vmem:[#allocation3 + $0x200] sm:$0xf] }
 0x1fd   : > { %v3140_v0 = vpop.f32.mrf.mxu2  ;;  %v3092_v11 = vadd.f32 %v3091_v4, %v5573_v52  ;;  %v1586_v4 = vrot.slane %v1509_v63, 5 }
 0x1ff   : > { %v5619_v12 = vadd.f32 %v3140_v0, %v3092_v11  ;;  %v1589_v0 = vrot.slane %v1510_v60, 5  ;;  %v4179_v11 = vld [vmem:[#allocation3 + $0x224] sm:$0xf0]  ;;  %v1587_v45 = vsel %vm5475_vm15, %v3906_v2, %v1586_v4  ;;  %v1588_v14 = vrot.slane %v1586_v4, 4 }
 0x200   : > { %v4182_v16 = vor.u32 %v4612_v61, %v4179_v11  ;;  %1621 = vst [vmem:[#allocation3 + $0x20c] sm:$0xf] %v1587_v45  ;;  %v1660_v11 = vld [vmem:[#allocation2 + $0x28] sm:$0xf] }
 0x201   : > { %3289 = vmatmul.bf16.gmra.mxu3 %v4078_v6  ;;  %v1658_v6 = vld [vmem:[#allocation2 + $0x20] sm:$0x1]  ;;  %v1590_v21 = vsel %vm5475_vm15, %v1588_v14, %v1589_v0  ;;  %v1659_v0 = vld [vmem:[#allocation2 + $0x24] sm:$0xf]  ;;  %v1714_v8 = vshll.u32 %v1660_v11, 16 }
 0x202   : > { %3191 = vmatmul.bf16.gmra.mxu2 %v4070_v5  ;;  %v4668_v5 = vld [vmem:[%s5963_s4 + $0x180] sm:$0xff]  ;;  %v1700_v18 = vshll.u32 %v1658_v6, 16  ;;  %3255 = vmatmul.bf16.gmra.mxu0 %v4182_v16  ;;  %1622 = vst [vmem:[#allocation3 + $0x230] sm:$0xf] %v1590_v21  ;;  %v1708_v6 = vshll.u32 %v1659_v0, 16  ;;  %v1718_v16 = vshrl.u32 %v1660_v11, 16 }
 0x203   : > { %3366 = vmatpush.bf16.msrb.mxu2 %v4668_v5  ;;  %v1705_v5 = vshrl.u32 %v1659_v0, 16  ;;  %v1908_v21 = vld [vmem:[#allocation2 + $0x28] sm:$0xf] }
 0x204   : > { %v3094_v29 = vpop.f32.mrf.mxu3  ;;  %v1702_v43 = vrot.slane %v1700_v18, 5  ;;  %v1710_v19 = vrot.slane %v1708_v6, 5  ;;  %v1720_v1 = vrot.slane %v1718_v16, 4  ;;  %v1961_v54 = vrot.slane %v1908_v21, 5 }
 0x205   : > { %v3143_v23 = vpop.f32.mrf.mxu2  ;;  %v3095_v55 = vadd.f32 %v3094_v29, %v5573_v52  ;;  %v1707_v56 = vrot.slane %v1705_v5, 4 }
 0x206   : > { %v1963_v27 = vrot.slane %v1961_v54, 4 }
 0x207   : > { %v5631_v31 = vadd.f32 %v3143_v23, %v3095_v55  ;;  %v1692_v23 = vrot.slane %v1690_v41, 5  ;;  %v1687_v55 = vor.u32 %v1686_v13, %v1683_v20  ;;  %v1716_v20 = vrot.slane %v1714_v8, 5  ;;  %v1661_v41 = vld [vmem:[#allocation2 + $0x2c] sm:$0x1] }
 0x209   : > { %v1697_v38 = vor.u32 %v1696_v30, %v1692_v23  ;;  %v1688_v10 = vrot.slane %v1687_v55, 4  ;;  %v4187_v60 = vld [vmem:[#allocation3 + $0x22c] sm:$0xf0]  ;;  %v1721_v22 = vor.u32 %v1720_v1, %v1716_v20 }
 0x20a   : > { %3348 = vmatmul.bf16.gmra.mxu1 %v4154_v37  ;;  %v5668_v37 = vpop.f32.mrf.mxu1 }
 0x20b   : > { %v1722_v34 = vrot.slane %v1721_v22, 4 }
 0x20c   : > { %v3096_v28 = vpop.f32.mrf.mxu3  ;;  %v5675_v14 = vpop.f32.mrf.mxu0 }
 0x20d   : > { %v3145_v48 = vpop.f32.mrf.mxu2  ;;  %v3097_v50 = vadd.f32 %v3096_v28, %v5573_v52  ;;  %v4608_v28 = vld [vmem:[#allocation3 + $0x1e0] sm:$0xf0] }
 0x20e   : > { %v4150_v2 = vor.u32 %v4608_v28, %v4149_v17 }
 0x20f   : > { %v5642_v58 = vadd.f32 %v3145_v48, %v3097_v50  ;;  %v1698_v48 = vrot.slane %v1697_v38, 4  ;;  %v4607_v50 = vld [vmem:[#allocation3 + $0x1d8] sm:$0xf0]  ;;  %v1626_v38 = vld [vmem:[#allocation2 + $0x24] sm:$0xf] }
 0x210   : > { %v4142_v61 = vor.u32 %v4607_v50, %v4141_v47  ;;  %v1964_v47 = vrot.slane %v1909_v26, 5  ;;  %1642 = vst [vmem:[#allocation3 + $0x60] sm:$0xf] %v1626_v38  ;;  %v4185_v50 = vld [vmem:[#allocation3 + $0x208] sm:$0xf]  ;;  %v1968_v38 = vrot.slane %v1911_v25, 5 }
 0x211   : > { %3294 = vmatmul.bf16.gmra.mxu3 %v4114_v51  ;;  %v1693_v51 = vsel %vm5305_vm12, %v1688_v10, %v1692_v23  ;;  %v1703_v63 = vsel %vm5305_vm12, %v1698_v48, %v1702_v43  ;;  %v1627_v43 = vld [vmem:[#allocation2 + $0x28] sm:$0xf]  ;;  %v1962_v48 = vsel %vm5475_vm15, %v3908_v35, %v1961_v54 }
 0x212   : > { %3196 = vmatmul.bf16.gmra.mxu2 %v4106_v44  ;;  %v4613_v44 = vld [vmem:[#allocation3 + $0x20c] sm:$0xf]  ;;  %1888 = vst [vmem:[#allocation3 + $0x1c] sm:$0xf] %v1693_v51  ;;  %v5677_v55 = vpop.f32.mrf.mxu1  ;;  %v4616_v51 = vld [vmem:[#allocation3 + $0x220] sm:$0xf0] }
 0x213   : > { %1889 = vst [vmem:[#allocation3 + $0x40] sm:$0xf] %v1703_v63  ;;  %v4190_v4 = vor.u32 %v4613_v44, %v4187_v60  ;;  %v1965_v44 = vsel %vm5475_vm15, %v1963_v27, %v1964_v47  ;;  %v4617_v63 = vld [vmem:[#allocation3 + $0x228] sm:$0xf0]  ;;  %v1629_v47 = vld [vmem:[#allocation2 + $0x34] sm:$0xf] }
 0x214   : > { %v3099_v62 = vpop.f32.mrf.mxu3  ;;  %v5686_v28 = vpop.f32.mrf.mxu0  ;;  %1643 = vst [vmem:[#allocation3 + $0x84] sm:$0xf] %v1627_v43 }
 0x215   : > { %v3148_v9 = vpop.f32.mrf.mxu2  ;;  %v3100_v29 = vadd.f32 %v3099_v62, %v5573_v52  ;;  %v1711_v62 = vor.u32 %v1710_v19, %v1707_v56  ;;  %2026 = vst [vmem:[#allocation3 + $0x68] sm:$0xf] %v1962_v48 }
 0x216   : > { %2027 = vst [vmem:[#allocation3 + $0x8c] sm:$0xf] %v1965_v44 }
 0x217   : > { %v5654_v36 = vadd.f32 %v3148_v9, %v3100_v29  ;;  %v1724_v9 = vshll.u32 %v1661_v41, 16  ;;  %v1712_v24 = vrot.slane %v1711_v62, 4  ;;  %v1664_v62 = vld [vmem:[#allocation2 + $0x38] sm:$0x1]  ;;  %1645 = vst [vmem:[#allocation3 + $0xcc] sm:$0xf] %v1629_v47 }
 0x218   : > { %v1748_v22 = vshll.u32 %v1664_v62, 16 }
 0x219   : > { %v4551_v18 = vld [vmem:[#allocation3 + $0x1c] sm:$0xf]  ;;  %v1726_v32 = vrot.slane %v1724_v9, 5  ;;  %v1717_v46 = vsel %vm5305_vm12, %v1712_v24, %v1716_v20 }
 0x21a   : > { %3353 = vmatmul.bf16.gmra.mxu1 %v4190_v4  ;;  %v3943_v13 = vld [vmem:[#allocation3 + $0x3c] sm:$0xf0]  ;;  %1890 = vst [vmem:[#allocation3 + $0x64] sm:$0xf] %v1717_v46  ;;  %v1663_v4 = vld [vmem:[#allocation2 + $0x34] sm:$0xf]  ;;  %v5693_v8 = vpop.f32.mrf.mxu1 }
 0x21b   : > { %v3946_v30 = vor.u32 %v4551_v18, %v3943_v13  ;;  %v1727_v10 = vsel %vm5305_vm12, %v1722_v34, %v1726_v32  ;;  %v1738_v5 = vshll.u32 %v1663_v4, 16  ;;  %v1742_v6 = vshrl.u32 %v1663_v4, 16  ;;  %v1628_v46 = vld [vmem:[#allocation2 + $0x30] sm:$0xf] }
 0x21c   : > { %v3101_v57 = vpop.f32.mrf.mxu3  ;;  %1891 = vst [vmem:[#allocation3 + $0x88] sm:$0xf] %v1727_v10  ;;  %v5697_v1 = vpop.f32.mrf.mxu0 }
 0x21d   : > { %v3150_v59 = vpop.f32.mrf.mxu2  ;;  %v3102_v39 = vadd.f32 %v3101_v57, %v5573_v52  ;;  %3416 = vmatmul.bf16.vlgmr.msra.gmra.mxu0 %v3946_v30  ;;  %v1740_v41 = vrot.slane %v1738_v5, 5  ;;  %v1744_v9 = vrot.slane %v1742_v6, 4  ;;  %1644 = vst [vmem:[#allocation3 + $0xa8] sm:$0xf] %v1628_v46  ;;  %v3077_v46 = vadd.f32 %v5668_v37, %v5573_v52 }
 0x21f   : > { %v5673_v45 = vadd.f32 %v3150_v59, %v3102_v39  ;;  %v4178_v39 = vor.u32 %v4616_v51, %v4177_v49  ;;  %v1745_v26 = vor.u32 %v1744_v9, %v1740_v41  ;;  %v1970_v49 = vrot.slane %v1968_v38, 4 }
 0x221   : > { %3299 = vmatmul.bf16.gmra.mxu3 %v4150_v2  ;;  %v1662_v2 = vld [vmem:[#allocation2 + $0x30] sm:$0xf]  ;;  %v4560_v56 = vld [vmem:[#allocation3 + $0x64] sm:$0xf]  ;;  %v1746_v54 = vrot.slane %v1745_v26, 4 }
 0x222   : > { %3201 = vmatmul.bf16.gmra.mxu2 %v4142_v61  ;;  %v4186_v61 = vor.u32 %v4617_v63, %v4185_v50  ;;  %v1729_v0 = vshrl.u32 %v1662_v2, 16  ;;  %v1732_v11 = vshll.u32 %v1662_v2, 16  ;;  %v3941_v50 = vld [vmem:[#allocation3 + $0x18] sm:$0xf]  ;;  %v3123_v51 = vpop.f32.mrf.mxu1  ;;  %v4555_v63 = vld [vmem:[#allocation3 + $0x38] sm:$0xf0] }
 0x223   : > { %v3979_v18 = vld [vmem:[#allocation3 + $0x84] sm:$0xf0]  ;;  %v3942_v5 = vor.u32 %v4555_v63, %v3941_v50 }
 0x224   : > { %v3104_v29 = vpop.f32.mrf.mxu3  ;;  %v1731_v19 = vrot.slane %v1729_v0, 4  ;;  %v1734_v20 = vrot.slane %v1732_v11, 5  ;;  %v3982_v21 = vor.u32 %v4560_v56, %v3979_v18  ;;  %v3075_v0 = vadd.f32 %v5644_v40, %v5573_v52  ;;  %v1665_v56 = vld [vmem:[#allocation2 + $0x3c] sm:$0xf] }
 0x225   : > { %v3153_v23 = vpop.f32.mrf.mxu2  ;;  %v3105_v33 = vadd.f32 %v3104_v29, %v5573_v52  ;;  %v1910_v29 = vld [vmem:[#allocation2 + $0x30] sm:$0xe] }
 0x226   : > { %v1735_v13 = vor.u32 %v1734_v20, %v1731_v19  ;;  %v3909_v34 = vrot.slane %v1910_v29, 9  ;;  %v1666_v19 = vld [vmem:[#allocation2 + $0x40] sm:$0xf]  ;;  %v1753_v20 = vshrl.u32 %v1665_v56, 16  ;;  %v3124_v26 = vadd.f32 %v3123_v51, %v3075_v0  ;;  %v3977_v0 = vld [vmem:[#allocation3 + $0x60] sm:$0xf] }
 0x227   : > { %v5682_v17 = vadd.f32 %v3153_v23, %v3105_v33  ;;  %v1912_v23 = vld [vmem:[#allocation2 + $0x38] sm:$0x1]  ;;  %v1750_v33 = vrot.slane %v1748_v22, 5  ;;  %v1762_v18 = vshll.u32 %v1666_v19, 16  ;;  %v1766_v62 = vshrl.u32 %v1666_v19, 16 }
 0x228   : > { %v1736_v32 = vrot.slane %v1735_v13, 4  ;;  %v1971_v43 = vrot.slane %v1912_v23, 5  ;;  %v1969_v44 = vsel %vm5475_vm15, %v3909_v34, %v1968_v38  ;;  %v1755_v13 = vrot.slane %v1753_v20, 4  ;;  %v1667_v23 = vld [vmem:[#allocation2 + $0x44] sm:$0x1] }
 0x229   : > { %v1751_v48 = vsel %vm5305_vm12, %v1746_v54, %v1750_v33  ;;  %2028 = vst [vmem:[#allocation3 + $0xb0] sm:$0xf] %v1969_v44  ;;  %v1764_v25 = vrot.slane %v1762_v18, 5  ;;  %v1772_v33 = vshll.u32 %v1667_v23, 16  ;;  %v1914_v34 = vld [vmem:[#allocation2 + $0x40] sm:$0xf] }
 0x22a   : > { %v1741_v10 = vsel %vm5305_vm12, %v1736_v32, %v1740_v41  ;;  %1893 = vst [vmem:[#allocation3 + $0xd0] sm:$0xf] %v1751_v48  ;;  %v1756_v41 = vshll.u32 %v1665_v56, 16  ;;  %v1913_v38 = vld [vmem:[#allocation2 + $0x3c] sm:$0xe]  ;;  %v1975_v63 = vrot.slane %v1914_v34, 5 }
 0x22b   : > { %1892 = vst [vmem:[#allocation3 + $0xac] sm:$0xf] %v1741_v10  ;;  %v3910_v50 = vrot.slane %v1913_v38, 9  ;;  %v4564_v56 = vld [vmem:[#allocation3 + $0x80] sm:$0xf0] }
 0x22c   : > { %v3106_v57 = vpop.f32.mrf.mxu3  ;;  %v1758_v22 = vrot.slane %v1756_v41, 5  ;;  %v3985_v41 = vld [vmem:[#allocation3 + $0x68] sm:$0xf]  ;;  %v4565_v18 = vld [vmem:[#allocation3 + $0x88] sm:$0xf0] }
 0x22d   : > { %v3155_v59 = vpop.f32.mrf.mxu2  ;;  %v3107_v60 = vadd.f32 %v3106_v57, %v5573_v52  ;;  %3421 = vmatmul.bf16.gmra.mxu0 %v3982_v21  ;;  %v5708_v57 = vpop.f32.mrf.mxu0  ;;  %v1669_v23 = vld [vmem:[#allocation2 + $0x4c] sm:$0xf] }
 0x22e   : > { %v1759_v32 = vor.u32 %v1758_v22, %v1755_v13  ;;  %v3080_v13 = vadd.f32 %v5677_v55, %v5573_v52  ;;  %v1790_v34 = vshrl.u32 %v1669_v23, 16 }
 0x22f   : > { %v5695_v16 = vadd.f32 %v3155_v59, %v3107_v60  ;;  %v4699_v59 = vld [vmem:[%s5964_s5 + $0x38] sm:$0xff]  ;;  %v1972_v60 = vsel %vm5475_vm15, %v1970_v49, %v1971_v43  ;;  %v1915_v43 = vld [vmem:[#allocation2 + $0x44] sm:$0x1]  ;;  %v1774_v49 = vrot.slane %v1772_v33, 5  ;;  %v1786_v33 = vshll.u32 %v1669_v23, 16 }
 0x230   : > { %3594 = vmatpush.bf16.msra.mxu1 %v4699_v59  ;;  %2029 = vst [vmem:[#allocation3 + $0xd4] sm:$0xf] %v1972_v60  ;;  %v1760_v48 = vrot.slane %v1759_v32, 4  ;;  %v1978_v59 = vrot.slane %v1915_v43, 5  ;;  %v1630_v60 = vld [vmem:[#allocation2 + $0x3c] sm:$0xf] }
 0x231   : > { %3304 = vmatmul.bf16.gmra.mxu3 %v4186_v61  ;;  %v4556_v61 = vld [vmem:[#allocation3 + $0x40] sm:$0xf0]  ;;  %v4015_v29 = vld [vmem:[#allocation3 + $0xcc] sm:$0xf0]  ;;  %1646 = vst [vmem:[#allocation3 + $0xf0] sm:$0xf] %v1630_v60 }
 0x232   : > { %3206 = vmatmul.bf16.gmra.mxu2 %v4178_v39  ;;  %v3949_v39 = vld [vmem:[#allocation3 + $0x20] sm:$0xf]  ;;  %v4569_v21 = vld [vmem:[#allocation3 + $0xac] sm:$0xf] }
 0x233   : > { %v3950_v6 = vor.u32 %v4556_v61, %v3949_v39  ;;  %v1631_v39 = vld [vmem:[#allocation2 + $0x40] sm:$0xf]  ;;  %v1765_v61 = vsel %vm5305_vm12, %v1760_v48, %v1764_v25  ;;  %v4573_v23 = vld [vmem:[#allocation3 + $0xc8] sm:$0xf0] }
 0x234   : > { %v3109_v30 = vpop.f32.mrf.mxu3  ;;  %1647 = vst [vmem:[#allocation3 + $0x114] sm:$0xf] %v1631_v39  ;;  %v1918_v39 = vld [vmem:[#allocation2 + $0x50] sm:$0x1] }
 0x235   : > { %v3158_v24 = vpop.f32.mrf.mxu2  ;;  %v3110_v35 = vadd.f32 %v3109_v30, %v5573_v52  ;;  %v5720_v40 = vpop.f32.mrf.mxu0  ;;  %v1768_v30 = vrot.slane %v1766_v62, 4  ;;  %1894 = vst [vmem:[#allocation3 + $0xf4] sm:$0xf] %v1765_v61  ;;  %v3082_v61 = vadd.f32 %v5693_v8, %v5573_v52 }
 0x237   : > { %v5702_v27 = vadd.f32 %v3158_v24, %v3110_v35  ;;  %v4018_v24 = vor.u32 %v4569_v21, %v4015_v29  ;;  %v3125_v35 = vpop.f32.mrf.mxu1  ;;  %v1769_v54 = vor.u32 %v1768_v30, %v1764_v25  ;;  %v3978_v25 = vor.u32 %v4564_v56, %v3977_v0  ;;  %v1668_v29 = vld [vmem:[#allocation2 + $0x48] sm:$0xf] }
 0x238   : > { %v1780_v32 = vshll.u32 %v1668_v29, 16 }
 0x239   : > { %v1770_v51 = vrot.slane %v1769_v54, 4 }
 0x23a   : > { %v1782_v43 = vrot.slane %v1780_v32, 5  ;;  %v4021_v32 = vld [vmem:[#allocation3 + $0xb0] sm:$0xf] }
 0x23b   : > { %v1775_v37 = vsel %vm5305_vm12, %v1770_v51, %v1774_v49  ;;  %v1670_v49 = vld [vmem:[#allocation2 + $0x50] sm:$0x1] }
 0x23c   : > { %v3111_v2 = vpop.f32.mrf.mxu3  ;;  %1895 = vst [vmem:[#allocation3 + $0x118] sm:$0xf] %v1775_v37  ;;  %v4578_v54 = vld [vmem:[#allocation3 + $0xf4] sm:$0xf] }
 0x23d   : > { %v3160_v4 = vpop.f32.mrf.mxu2  ;;  %v3112_v11 = vadd.f32 %v3111_v2, %v5573_v52  ;;  %3426 = vmatmul.bf16.gmra.mxu0 %v4018_v24  ;;  %v5733_v19 = vpop.f32.mrf.mxu0  ;;  %v1777_v24 = vshrl.u32 %v1668_v29, 16 }
 0x23f   : > { %v5718_v9 = vadd.f32 %v3160_v4, %v3112_v11  ;;  %v1977_v4 = vrot.slane %v1975_v63, 4  ;;  %v1976_v11 = vsel %vm5475_vm15, %v3910_v50, %v1975_v63  ;;  %v3128_v30 = vpop.f32.mrf.mxu1  ;;  %v1779_v38 = vrot.slane %v1777_v24, 4 }
 0x240   : > { %2030 = vst [vmem:[#allocation3 + $0xf8] sm:$0xf] %v1976_v11  ;;  %v1792_v50 = vrot.slane %v1790_v34, 4  ;;  %v1796_v63 = vshll.u32 %v1670_v49, 16 }
 0x241   : > { %3465 = vmatmul.bf16.vlgmr.msra.gmra.mxu3 %v3950_v6  ;;  %v1979_v20 = vsel %vm5475_vm15, %v1977_v4, %v1978_v59  ;;  %v1783_v51 = vor.u32 %v1782_v43, %v1779_v38  ;;  %v1917_v59 = vld [vmem:[#allocation2 + $0x4c] sm:$0xf] }
 0x242   : > { %3367 = vmatmul.bf16.vlgmr.msrb.gmra.mxu2 %v3942_v5  ;;  %v3126_v5 = vadd.f32 %v3125_v35, %v3077_v46  ;;  %2031 = vst [vmem:[#allocation3 + $0x11c] sm:$0xf] %v1979_v20  ;;  %v1788_v46 = vrot.slane %v1786_v33, 5  ;;  %v1798_v0 = vrot.slane %v1796_v63, 5  ;;  %v1985_v20 = vrot.slane %v1918_v39, 5 }
 0x243   : > { %v4051_v48 = vld [vmem:[#allocation3 + $0x114] sm:$0xf0]  ;;  %v1784_v4 = vrot.slane %v1783_v51, 4  ;;  %v4574_v33 = vld [vmem:[#allocation3 + $0xd0] sm:$0xf0] }
 0x244   : > { %v3270_v10 = vpop.f32.mrf.mxu3  ;;  %v1793_v60 = vor.u32 %v1792_v50, %v1788_v46  ;;  %v4022_v43 = vor.u32 %v4574_v33, %v4021_v32 }
 0x245   : > { %v3172_v47 = vpop.f32.mrf.mxu2  ;;  %v5745_v55 = vpop.f32.mrf.mxu0 }
 0x246   : > { %v3173_v44 = vadd.f32 %v3172_v47, %v3124_v26  ;;  %v3986_v26 = vor.u32 %v4565_v18, %v3985_v41  ;;  %v3129_v47 = vadd.f32 %v3128_v30, %v3080_v13  ;;  %v1794_v56 = vrot.slane %v1793_v60, 4  ;;  %v1632_v41 = vld [vmem:[#allocation2 + $0x48] sm:$0xf]  ;;  %v1633_v18 = vld [vmem:[#allocation2 + $0x4c] sm:$0xf] }
 0x247   : > { %1648 = vst [vmem:[#allocation3 + $0x138] sm:$0xf] %v1632_v41  ;;  %v3130_v13 = vpop.f32.mrf.mxu1 }
 0x248   : > { %v3222_v2 = vadd.f32 %v5675_v14, %v3173_v44  ;;  %v4698_v14 = vld [vmem:[%s5964_s5 + $0x30] sm:$0xff]  ;;  %v4054_v44 = vor.u32 %v4578_v54, %v4051_v48  ;;  %v1799_v52 = vsel %vm5305_vm12, %v1794_v56, %v1798_v0  ;;  %1649 = vst [vmem:[#allocation3 + $0x15c] sm:$0xf] %v1633_v18  ;;  %v1920_v56 = vld [vmem:[#allocation2 + $0x58] sm:$0xf] }
 0x249   : > { %3595 = vmatpush.bf16.msra.mxu1 %v4698_v14  ;;  %v1982_v14 = vrot.slane %v1917_v59, 5  ;;  %1897 = vst [vmem:[#allocation3 + $0x160] sm:$0xf] %v1799_v52 }
 0x24a   : > { %v5731_v6 = vadd.f32 %v3270_v10, %v3222_v2 }
 0x24b   : > { %v1984_v8 = vrot.slane %v1982_v14, 4 }
 0x24c   : > { %v3272_v21 = vpop.f32.mrf.mxu3 }
 0x24d   : > { %v3174_v62 = vpop.f32.mrf.mxu2  ;;  %3431 = vmatmul.bf16.gmra.mxu0 %v4054_v44  ;;  %v5758_v30 = vpop.f32.mrf.mxu0  ;;  %v1986_v24 = vsel %vm5475_vm15, %v1984_v8, %v1985_v20  ;;  %v1919_v20 = vld [vmem:[#allocation2 + $0x54] sm:$0xe] }
 0x24e   : > { %v3175_v22 = vadd.f32 %v3174_v62, %v3126_v5  ;;  %v1789_v62 = vsel %vm5305_vm12, %v1784_v4, %v1788_v46  ;;  %2033 = vst [vmem:[#allocation3 + $0x164] sm:$0xf] %v1986_v24  ;;  %v1671_v46 = vld [vmem:[#allocation2 + $0x54] sm:$0xf]  ;;  %v3912_v52 = vrot.slane %v1919_v20, 9 }
 0x24f   : > { %1896 = vst [vmem:[#allocation3 + $0x13c] sm:$0xf] %v1789_v62  ;;  %v1801_v48 = vshrl.u32 %v1671_v46, 16  ;;  %v1804_v49 = vshll.u32 %v1671_v46, 16  ;;  %v4057_v46 = vld [vmem:[#allocation3 + $0xf8] sm:$0xf] }
 0x250   : > { %v3224_v35 = vadd.f32 %v5686_v28, %v3175_v22  ;;  %v1916_v28 = vld [vmem:[#allocation2 + $0x48] sm:$0xe]  ;;  %v4013_v22 = vld [vmem:[#allocation3 + $0xa8] sm:$0xf] }
 0x251   : > { %3470 = vmatmul.bf16.gmra.mxu3 %v3986_v26  ;;  %v3911_v11 = vrot.slane %v1916_v28, 9  ;;  %v3131_v26 = vadd.f32 %v3130_v13, %v3082_v61  ;;  %v4014_v38 = vor.u32 %v4573_v23, %v4013_v22  ;;  %v1803_v59 = vrot.slane %v1801_v48, 4  ;;  %v1635_v23 = vld [vmem:[#allocation2 + $0x58] sm:$0xf] }
 0x252   : > { %v5743_v10 = vadd.f32 %v3272_v21, %v3224_v35  ;;  %3372 = vmatmul.bf16.gmra.mxu2 %v3978_v25  ;;  %v1806_v60 = vrot.slane %v1804_v49, 5  ;;  %v1989_v22 = vrot.slane %v1920_v56, 5  ;;  %1651 = vst [vmem:[#allocation3 + $0x1a4] sm:$0xf] %v1635_v23 }
 0x253   : > { %v1983_v25 = vsel %vm5475_vm15, %v3911_v11, %v1982_v14 }
 0x254   : > { %v3275_v37 = vpop.f32.mrf.mxu3  ;;  %2032 = vst [vmem:[#allocation3 + $0x140] sm:$0xf] %v1983_v25  ;;  %v1807_v11 = vor.u32 %v1806_v60, %v1803_v59  ;;  %v1991_v33 = vrot.slane %v1989_v22, 4  ;;  %v1675_v59 = vld [vmem:[#allocation2 + $0x64] sm:$0xf] }
 0x255   : > { %v3177_v2 = vpop.f32.mrf.mxu2  ;;  %v5768_v61 = vpop.f32.mrf.mxu0 }
 0x256   : > { %v3178_v5 = vadd.f32 %v3177_v2, %v3129_v47  ;;  %v1672_v47 = vld [vmem:[#allocation2 + $0x58] sm:$0xf]  ;;  %v4587_v63 = vld [vmem:[#allocation3 + $0x13c] sm:$0xf]  ;;  %v1808_v62 = vrot.slane %v1807_v11, 4 }
 0x257   : > { %v1810_v50 = vshll.u32 %v1672_v47, 16  ;;  %v1814_v44 = vshrl.u32 %v1672_v47, 16  ;;  %v4087_v2 = vld [vmem:[#allocation3 + $0x15c] sm:$0xf0]  ;;  %v4583_v47 = vld [vmem:[#allocation3 + $0x118] sm:$0xf0] }
 0x258   : > { %v3227_v21 = vadd.f32 %v5697_v1, %v3178_v5  ;;  %v4697_v1 = vld [vmem:[%s5964_s5 + $0x28] sm:$0xff]  ;;  %v4090_v0 = vor.u32 %v4587_v63, %v4087_v2  ;;  %v1674_v63 = vld [vmem:[#allocation2 + $0x60] sm:$0xf]  ;;  %v1834_v2 = vshll.u32 %v1675_v59, 16 }
 0x259   : > { %3596 = vmatpush.bf16.msra.mxu1 %v4697_v1  ;;  %v1812_v28 = vrot.slane %v1810_v50, 5  ;;  %v1816_v4 = vrot.slane %v1814_v44, 4  ;;  %v1825_v60 = vshrl.u32 %v1674_v63, 16 }
 0x25a   : > { %v5756_v29 = vadd.f32 %v3275_v37, %v3227_v21  ;;  %v1673_v37 = vld [vmem:[#allocation2 + $0x5c] sm:$0x1]  ;;  %v1836_v56 = vrot.slane %v1834_v2, 5 }
 0x25b   : > { %v1820_v5 = vshll.u32 %v1673_v37, 16  ;;  %v1817_v14 = vor.u32 %v1816_v4, %v1812_v28  ;;  %v1813_v1 = vsel %vm5305_vm12, %v1808_v62, %v1812_v28  ;;  %v1828_v28 = vshll.u32 %v1674_v63, 16  ;;  %v4093_v63 = vld [vmem:[#allocation3 + $0x140] sm:$0xf] }
 0x25c   : > { %v3277_v35 = vpop.f32.mrf.mxu3  ;;  %1898 = vst [vmem:[#allocation3 + $0x184] sm:$0xf] %v1813_v1  ;;  %v1838_v37 = vshrl.u32 %v1675_v59, 16  ;;  %v1827_v11 = vrot.slane %v1825_v60, 4  ;;  %v4592_v59 = vld [vmem:[#allocation3 + $0x160] sm:$0xf0] }
 0x25d   : > { %v3179_v34 = vpop.f32.mrf.mxu2  ;;  %v1822_v21 = vrot.slane %v1820_v5, 5  ;;  %v1818_v13 = vrot.slane %v1817_v14, 4  ;;  %3436 = vmatmul.bf16.gmra.mxu0 %v4090_v0  ;;  %v1830_v5 = vrot.slane %v1828_v28, 5 }
 0x25e   : > { %v3180_v54 = vadd.f32 %v3179_v34, %v3131_v26  ;;  %v1634_v26 = vld [vmem:[#allocation2 + $0x54] sm:$0xf]  ;;  %v4049_v34 = vld [vmem:[#allocation3 + $0xf0] sm:$0xf] }
 0x25f   : > { %1650 = vst [vmem:[#allocation3 + $0x180] sm:$0xf] %v1634_v26  ;;  %v1823_v32 = vsel %vm5305_vm12, %v1818_v13, %v1822_v21  ;;  %v1831_v62 = vor.u32 %v1830_v5, %v1827_v11  ;;  %v1922_v13 = vld [vmem:[#allocation2 + $0x60] sm:$0xe]  ;;  %v1678_v11 = vld [vmem:[#allocation2 + $0x70] sm:$0xf] }
 0x260   : > { %v3229_v51 = vadd.f32 %v5708_v57, %v3180_v54  ;;  %v1921_v57 = vld [vmem:[#allocation2 + $0x5c] sm:$0x1]  ;;  %v4582_v54 = vld [vmem:[#allocation3 + $0x110] sm:$0xf0]  ;;  %1899 = vst [vmem:[#allocation3 + $0x1a8] sm:$0xf] %v1823_v32 }
 0x261   : > { %3475 = vmatmul.bf16.gmra.mxu3 %v4022_v43  ;;  %v1992_v25 = vrot.slane %v1921_v57, 5  ;;  %v4696_v43 = vld [vmem:[%s5964_s5 + $0x20] sm:$0xff]  ;;  %v4050_v44 = vor.u32 %v4582_v54, %v4049_v34  ;;  %v1676_v57 = vld [vmem:[#allocation2 + $0x68] sm:$0x1]  ;;  %v1832_v26 = vrot.slane %v1831_v62, 4  ;;  %v3913_v1 = vrot.slane %v1922_v13, 9 }
 0x262   : > { %v5766_v39 = vadd.f32 %v3277_v35, %v3229_v51  ;;  %3377 = vmatmul.bf16.gmra.mxu2 %v4014_v38  ;;  %v5780_v38 = vpop.f32.mrf.mxu0  ;;  %3597 = vmatpush.bf16.msra.mxu1 %v4696_v43  ;;  %v4058_v51 = vor.u32 %v4583_v47, %v4057_v46  ;;  %v1844_v21 = vshll.u32 %v1676_v57, 16  ;;  %v1637_v54 = vld [vmem:[#allocation2 + $0x64] sm:$0xf]  ;;  %v1862_v57 = vshrl.u32 %v1678_v11, 16 }
 0x263   : > { %v4596_v0 = vld [vmem:[#allocation3 + $0x184] sm:$0xf]  ;;  %v1837_v43 = vsel %vm5305_vm12, %v1832_v26, %v1836_v56  ;;  %1653 = vst [vmem:[#allocation3 + $0x1ec] sm:$0xf] %v1637_v54 }
 0x264   : > { %v3280_v18 = vpop.f32.mrf.mxu3  ;;  %v1846_v23 = vrot.slane %v1844_v21, 5  ;;  %1900 = vst [vmem:[#allocation3 + $0x1cc] sm:$0xf] %v1837_v43 }
 0x265   : > { %v3182_v41 = vpop.f32.mrf.mxu2 }
 0x266   : > { %v3183_v8 = vadd.f32 %v3182_v41, %v5587_v15  ;;  %v1990_v15 = vsel %vm5475_vm15, %v3912_v52, %v1989_v22  ;;  %v1840_v41 = vrot.slane %v1838_v37, 4  ;;  %v1923_v52 = vld [vmem:[#allocation2 + $0x64] sm:$0xf] }
 0x267   : > { %2034 = vst [vmem:[#allocation3 + $0x188] sm:$0xf] %v1990_v15  ;;  %v1636_v15 = vld [vmem:[#allocation2 + $0x60] sm:$0xf] }
 0x268   : > { %v3232_v24 = vadd.f32 %v5720_v40, %v3183_v8  ;;  %v1993_v40 = vsel %vm5475_vm15, %v1991_v33, %v1992_v25  ;;  %v1841_v8 = vor.u32 %v1840_v41, %v1836_v56  ;;  %v1996_v33 = vrot.slane %v1923_v52, 5  ;;  %1652 = vst [vmem:[#allocation3 + $0x1c8] sm:$0xf] %v1636_v15 }
 0x269   : > { %2035 = vst [vmem:[#allocation3 + $0x1ac] sm:$0xf] %v1993_v40 }
 0x26a   : > { %v5778_v35 = vadd.f32 %v3280_v18, %v3232_v24  ;;  %v5791_v20 = vpop.f32.mrf.mxu0  ;;  %v1842_v32 = vrot.slane %v1841_v8, 4  ;;  %v1998_v47 = vrot.slane %v1996_v33, 4 }
 0x26c   : > { %v3282_v49 = vpop.f32.mrf.mxu3  ;;  %v1847_v46 = vsel %vm5305_vm12, %v1842_v32, %v1846_v23  ;;  %v1925_v32 = vld [vmem:[#allocation2 + $0x6c] sm:$0xe] }
 0x26d   : > { %v3184_v48 = vpop.f32.mrf.mxu2  ;;  %1901 = vst [vmem:[#allocation3 + $0x1f0] sm:$0xf] %v1847_v46  ;;  %v3914_v43 = vrot.slane %v1925_v32, 9 }
 0x26e   : > { %v3185_v50 = vadd.f32 %v3184_v48, %v5596_v42  ;;  %v4123_v42 = vld [vmem:[#allocation3 + $0x1a4] sm:$0xf0]  ;;  %v4085_v48 = vld [vmem:[#allocation3 + $0x138] sm:$0xf] }
 0x26f   : > { %v4126_v18 = vor.u32 %v4596_v0, %v4123_v42  ;;  %v1677_v0 = vld [vmem:[#allocation2 + $0x6c] sm:$0xf]  ;;  %v1858_v42 = vshll.u32 %v1678_v11, 16 }
 0x270   : > { %v3234_v4 = vadd.f32 %v5733_v19, %v3185_v50  ;;  %v1924_v19 = vld [vmem:[#allocation2 + $0x68] sm:$0x1]  ;;  %v4591_v50 = vld [vmem:[#allocation3 + $0x158] sm:$0xf0]  ;;  %v1849_v5 = vshrl.u32 %v1677_v0, 16  ;;  %v1852_v56 = vshll.u32 %v1677_v0, 16 }
 0x271   : > { %3480 = vmatmul.bf16.gmra.mxu3 %v4058_v51  ;;  %v1999_v34 = vrot.slane %v1924_v19, 5  ;;  %3441 = vmatmul.bf16.gmra.mxu0 %v4126_v18  ;;  %v4695_v51 = vld [vmem:[%s5964_s5 + $0x18] sm:$0xff]  ;;  %v4086_v37 = vor.u32 %v4591_v50, %v4085_v48  ;;  %v4605_v18 = vld [vmem:[#allocation3 + $0x1cc] sm:$0xf]  ;;  %v1860_v52 = vrot.slane %v1858_v42, 5 }
 0x272   : > { %v5789_v14 = vadd.f32 %v3282_v49, %v3234_v4  ;;  %3382 = vmatmul.bf16.gmra.mxu2 %v4050_v44  ;;  %v5803_v44 = vpop.f32.mrf.mxu0  ;;  %3598 = vmatpush.bf16.msra.mxu1 %v4695_v51  ;;  %v4094_v4 = vor.u32 %v4592_v59, %v4093_v63  ;;  %v1851_v62 = vrot.slane %v1849_v5, 4  ;;  %v1854_v21 = vrot.slane %v1852_v56, 5  ;;  %v1679_v19 = vld [vmem:[#allocation2 + $0x74] sm:$0x1]  ;;  %v1639_v50 = vld [vmem:[#allocation2 + $0x70] sm:$0xf] }
 0x273   : > { %v1868_v23 = vshll.u32 %v1679_v19, 16  ;;  %1655 = vst [vmem:[#allocation3 + $0x234] sm:$0xf] %v1639_v50  ;;  %v4601_v0 = vld [vmem:[#allocation3 + $0x1a8] sm:$0xf0] }
 0x274   : > { %v3285_v25 = vpop.f32.mrf.mxu3  ;;  %v1855_v26 = vor.u32 %v1854_v21, %v1851_v62 }
 0x275   : > { %v3187_v22 = vpop.f32.mrf.mxu2  ;;  %v1870_v54 = vrot.slane %v1868_v23, 5  ;;  %v4609_v23 = vld [vmem:[#allocation3 + $0x1e8] sm:$0xf0] }
 0x276   : > { %v3188_v24 = vadd.f32 %v3187_v22, %v5610_v53  ;;  %v1997_v53 = vsel %vm5475_vm15, %v3913_v1, %v1996_v33  ;;  %v1864_v22 = vrot.slane %v1862_v57, 4  ;;  %v1926_v1 = vld [vmem:[#allocation2 + $0x70] sm:$0xf]  ;;  %v1856_v15 = vrot.slane %v1855_v26, 4  ;;  %v4157_v26 = vld [vmem:[#allocation3 + $0x1c8] sm:$0xf] }
 0x277   : > { %2036 = vst [vmem:[#allocation3 + $0x1d0] sm:$0xf] %v1997_v53  ;;  %v1638_v53 = vld [vmem:[#allocation2 + $0x6c] sm:$0xf] }
 0x278   : > { %v3237_v40 = vadd.f32 %v5745_v55, %v3188_v24  ;;  %v2000_v55 = vsel %vm5475_vm15, %v1998_v47, %v1999_v34  ;;  %v1865_v24 = vor.u32 %v1864_v22, %v1860_v52  ;;  %v2003_v47 = vrot.slane %v1926_v1, 5  ;;  %1654 = vst [vmem:[#allocation3 + $0x210] sm:$0xf] %v1638_v53 }
 0x279   : > { %2037 = vst [vmem:[#allocation3 + $0x1f4] sm:$0xf] %v2000_v55  ;;  %v1861_v51 = vsel %vm5305_vm12, %v1856_v15, %v1860_v52 }
 0x27a   : > { %v5801_v49 = vadd.f32 %v3285_v25, %v3237_v40  ;;  %v5814_v13 = vpop.f32.mrf.mxu0  ;;  %v1866_v46 = vrot.slane %v1865_v24, 4  ;;  %v2005_v59 = vrot.slane %v2003_v47, 4  ;;  %1902 = vst [vmem:[#allocation3 + $0x214] sm:$0xf] %v1861_v51  ;;  %v4618_v51 = vld [vmem:[#allocation3 + $0x230] sm:$0xf0] }
 0x27c   : > { %v3287_v28 = vpop.f32.mrf.mxu3  ;;  %v1871_v63 = vsel %vm5305_vm12, %v1866_v46, %v1870_v54  ;;  %v3319_v54 = vpop.f32.mrf.mxu1 }
 0x27d   : > { %v3189_v60 = vpop.f32.mrf.mxu2  ;;  %1903 = vst [vmem:[#allocation3 + $0x238] sm:$0xf] %v1871_v63 }
 0x27e   : > { %v3190_v2 = vadd.f32 %v3189_v60, %v5619_v12  ;;  %v4159_v12 = vld [vmem:[#allocation3 + $0x1ec] sm:$0xf0]  ;;  %v4121_v60 = vld [vmem:[#allocation3 + $0x180] sm:$0xf] }
 0x27f   : > { %v4162_v25 = vor.u32 %v4605_v18, %v4159_v12  ;;  %v4165_v1 = vld [vmem:[#allocation3 + $0x1d0] sm:$0xf] }
 0x280   : > { %v3239_v41 = vadd.f32 %v5758_v30, %v3190_v2  ;;  %v1927_v30 = vld [vmem:[#allocation2 + $0x74] sm:$0x1]  ;;  %v4600_v2 = vld [vmem:[#allocation3 + $0x1a0] sm:$0xf0]  ;;  %v4610_v24 = vld [vmem:[#allocation3 + $0x1f0] sm:$0xf0] }
 0x281   : > { %3485 = vmatmul.bf16.gmra.mxu3 %v4094_v4  ;;  %v2006_v48 = vrot.slane %v1927_v30, 5  ;;  %3446 = vmatmul.bf16.gmra.mxu0 %v4162_v25  ;;  %v4694_v4 = vld [vmem:[%s5964_s5 + $0x10] sm:$0xff]  ;;  %v4122_v42 = vor.u32 %v4600_v2, %v4121_v60  ;;  %v4614_v18 = vld [vmem:[#allocation3 + $0x214] sm:$0xf] }
 0x282   : > { %v5812_v8 = vadd.f32 %v3287_v28, %v3239_v41  ;;  %3387 = vmatmul.bf16.gmra.mxu2 %v4086_v37  ;;  %v5826_v37 = vpop.f32.mrf.mxu0  ;;  %3599 = vmatpush.bf16.msra.mxu1 %v4694_v4 }
 0x283   : > { %v2007_v7 = vsel %vm5475_vm15, %v2005_v59, %v2006_v48 }
 0x284   : > { %v3290_v34 = vpop.f32.mrf.mxu3  ;;  %2039 = vst [vmem:[#allocation3 + $0x23c] sm:$0xf] %v2007_v7  ;;  %v4195_v3 = vld [vmem:[#allocation3 + $0x234] sm:$0xf0]  ;;  %v3321_v59 = vpop.f32.mrf.mxu1 }
 0x285   : > { %v3192_v33 = vpop.f32.mrf.mxu2  ;;  %v4198_v21 = vor.u32 %v4614_v18, %v4195_v3 }
 0x286   : > { %v3193_v40 = vadd.f32 %v3192_v33, %v5631_v31  ;;  %v2004_v31 = vsel %vm5475_vm15, %v3914_v43, %v2003_v47 }
 0x287   : > { %2038 = vst [vmem:[#allocation3 + $0x218] sm:$0xf] %v2004_v31 }
 0x288   : > { %v3242_v55 = vadd.f32 %v5768_v61, %v3193_v40  ;;  %v4129_v61 = vld [vmem:[#allocation3 + $0x188] sm:$0xf] }
 0x289   : > { %v4130_v57 = vor.u32 %v4601_v0, %v4129_v61 }
 0x28a   : > { %v5824_v28 = vadd.f32 %v3290_v34, %v3242_v55  ;;  %v3256_v52 = vpop.f32.mrf.mxu0  ;;  %v4158_v34 = vor.u32 %v4609_v23, %v4157_v26 }
 0x28b   : > { %v4619_v63 = vld [vmem:[#allocation3 + $0x238] sm:$0xf0] }
 0x28c   : > { %v3292_v5 = vpop.f32.mrf.mxu3 }
 0x28d   : > { %v3194_v11 = vpop.f32.mrf.mxu2 }
 0x28e   : > { %v3195_v56 = vadd.f32 %v3194_v11, %v5642_v58  ;;  %v4201_v55 = vld [vmem:[#allocation3 + $0x218] sm:$0xf] }
 0x290   : > { %v3244_v41 = vadd.f32 %v5780_v38, %v3195_v56  ;;  %v4693_v38 = vld [vmem:[%s5964_s5 + $0x8] sm:$0xff] }
 0x291   : > { %3490 = vmatmul.bf16.gmra.mxu3 %v4130_v57  ;;  %3451 = vmatmul.bf16.gmra.mxu0 %v4198_v21 }
 0x292   : > { %v5835_v62 = vadd.f32 %v3292_v5, %v3244_v41  ;;  %3392 = vmatmul.bf16.gmra.mxu2 %v4122_v42  ;;  %3600 = vmatpush.bf16.msra.mxu1 %v4693_v38  ;;  %v3258_v15 = vpop.f32.mrf.mxu0  ;;  %v3324_v5 = vpop.f32.mrf.mxu1 }
 0x294   : > { %v3295_v19 = vpop.f32.mrf.mxu3 }
 0x295   : > { %v3197_v12 = vpop.f32.mrf.mxu2 }
 0x296   : > { %v3198_v22 = vadd.f32 %v3197_v12, %v5654_v36  ;;  %v4166_v36 = vor.u32 %v4610_v24, %v4165_v1 }
 0x298   : > { %v3247_v25 = vadd.f32 %v5791_v20, %v3198_v22 }
 0x29a   : > { %v5839_v58 = vadd.f32 %v3295_v19, %v3247_v25  ;;  %v3417_v53 = vpop.f32.mrf.mxu0  ;;  %v3326_v21 = vpop.f32.mrf.mxu1  ;;  %v3320_v25 = vadd.f32 %v3319_v54, %v5731_v6  ;;  %v3325_v6 = vadd.f32 %v3324_v5, %v5756_v29 }
 0x29c   : > { %v3297_v30 = vpop.f32.mrf.mxu3 }
 0x29d   : > { %v3199_v32 = vpop.f32.mrf.mxu2 }
 0x29e   : > { %v3200_v33 = vadd.f32 %v3199_v32, %v5673_v45  ;;  %v4193_v45 = vld [vmem:[#allocation3 + $0x210] sm:$0xf] }
 0x29f   : > { %v4194_v4 = vor.u32 %v4618_v51, %v4193_v45 }
 0x2a0   : > { %v3249_v20 = vadd.f32 %v5803_v44, %v3200_v33  ;;  %v4692_v44 = vld [vmem:[%s5964_s5] sm:$0xff] }
 0x2a1   : > { %3495 = vmatmul.bf16.gmra.mxu3 %v4166_v36  ;;  %3601 = vmatpush.bf16.msra.mxu1 %v4692_v44 }
 0x2a2   : > { %v5846_v43 = vadd.f32 %v3297_v30, %v3249_v20  ;;  %3397 = vmatmul.bf16.gmra.mxu2 %v4158_v34  ;;  %v3419_v61 = vpop.f32.mrf.mxu0  ;;  %v3329_v23 = vpop.f32.mrf.mxu1 }
 0x2a3   : > { %v3330_v29 = vadd.f32 %v3329_v23, %v5778_v35 }
 0x2a4   : > { %v3300_v46 = vpop.f32.mrf.mxu3 }
 0x2a5   : > { %v3202_v40 = vpop.f32.mrf.mxu2 }
 0x2a6   : > { %v3203_v47 = vadd.f32 %v3202_v40, %v5682_v17  ;;  %v4202_v17 = vor.u32 %v4619_v63, %v4201_v55 }
 0x2a8   : > { %v3252_v48 = vadd.f32 %v5814_v13, %v3203_v47 }
 0x2aa   : > { %v5850_v50 = vadd.f32 %v3300_v46, %v3252_v48  ;;  %v3422_v41 = vpop.f32.mrf.mxu0  ;;  %v3331_v36 = vpop.f32.mrf.mxu1 }
 0x2ac   : > { %v3302_v31 = vpop.f32.mrf.mxu3 }
 0x2ad   : > { %v3204_v60 = vpop.f32.mrf.mxu2 }
 0x2ae   : > { %v3205_v2 = vadd.f32 %v3204_v60, %v5695_v16 }
 0x2b0   : > { %v3254_v13 = vadd.f32 %v5826_v37, %v3205_v2 }
 0x2b1   : > { %3500 = vmatmul.bf16.gmra.mxu3 %v4202_v17 }
 0x2b2   : > { %v5857_v7 = vadd.f32 %v3302_v31, %v3254_v13  ;;  %3402 = vmatmul.bf16.gmra.mxu2 %v4194_v4  ;;  %v3424_v26 = vpop.f32.mrf.mxu0  ;;  %v3334_v55 = vpop.f32.mrf.mxu1 }
 0x2b3   : > { %v3335_v35 = vadd.f32 %v3334_v55, %v5801_v49 }
 0x2b4   : > { %v3305_v11 = vpop.f32.mrf.mxu3 }
 0x2b5   : > { %v3207_v0 = vpop.f32.mrf.mxu2 }
 0x2b6   : > { %v3208_v56 = vadd.f32 %v3207_v0, %v5702_v27  ;;  %v3322_v27 = vadd.f32 %v3321_v59, %v5743_v10  ;;  %v3327_v10 = vadd.f32 %v3326_v21, %v5766_v39  ;;  %v3332_v39 = vadd.f32 %v3331_v36, %v5789_v14 }
 0x2b8   : > { %v3257_v42 = vadd.f32 %v3256_v52, %v3208_v56 }
 0x2ba   : > { %v5860_v57 = vadd.f32 %v3305_v11, %v3257_v42  ;;  %v3336_v0 = vpop.f32.mrf.mxu1 }
 0x2bb   : > { %v3337_v14 = vadd.f32 %v3336_v0, %v5812_v8 }
 0x2bc   : > { %v3307_v18 = vpop.f32.mrf.mxu3 }
 0x2bd   : > { %v3209_v16 = vpop.f32.mrf.mxu2 }
 0x2be   : > { %v3210_v3 = vadd.f32 %v3209_v16, %v5718_v9  ;;  %v3427_v9 = vpop.f32.mrf.mxu0 }
 0x2c0   : > { %v3259_v37 = vadd.f32 %v3258_v15, %v3210_v3 }
 0x2c2   : > { %v5863_v12 = vadd.f32 %v3307_v18, %v3259_v37  ;;  %v3339_v21 = vpop.f32.mrf.mxu1 }
 0x2c3   : > { %v3340_v49 = vadd.f32 %v3339_v21, %v5824_v28 }
 0x2c4   : > { %v3466_v22 = vpop.f32.mrf.mxu3 }
 0x2c5   : > { %v3368_v19 = vpop.f32.mrf.mxu2 }
 0x2c6   : > { %v3369_v38 = vadd.f32 %v3368_v19, %v3320_v25  ;;  %v3429_v48 = vpop.f32.mrf.mxu0 }
 0x2c8   : > { %v3418_v52 = vadd.f32 %v3417_v53, %v3369_v38 }
 0x2ca   : > { %v3467_v30 = vadd.f32 %v3466_v22, %v3418_v52  ;;  %v3341_v52 = vpop.f32.mrf.mxu1 }
 0x2cb   : > { %v3342_v8 = vadd.f32 %v3341_v52, %v5835_v62 }
 0x2cc   : > { %v3468_v24 = vpop.f32.mrf.mxu3  ;;  %v3506_v15 = vmax.f32 %v3467_v30, 0.0 }
 0x2cd   : > { %v3370_v1 = vpop.f32.mrf.mxu2 }
 0x2ce   : > { %v3371_v32 = vadd.f32 %v3370_v1, %v3322_v27  ;;  %v3432_v4 = vpop.f32.mrf.mxu0 }
 0x2d0   : > { %v3420_v33 = vadd.f32 %v3419_v61, %v3371_v32 }
 0x2d2   : > { %v3469_v34 = vadd.f32 %v3468_v24, %v3420_v33 }
 0x2d4   : > { %v3507_v20 = vmax.f32 %v3469_v34, 0.0  ;;  %v3471_v46 = vpop.f32.mrf.mxu3 }
 0x2d5   : > { %v3373_v40 = vpop.f32.mrf.mxu2 }
 0x2d6   : > { %v3522_v54 = vpack.c.bf16 %v3507_v20, %v3506_v15  ;;  %v3374_v47 = vadd.f32 %v3373_v40, %v3325_v6  ;;  %v3434_v16 = vpop.f32.mrf.mxu0  ;;  %v3344_v6 = vpop.f32.mrf.mxu1 }
 0x2d7   : > { %v3345_v28 = vadd.f32 %v3344_v6, %v5839_v58 }
 0x2d8   : > { %3602 = vmatmul.bf16.vlgmr.msra.gmra.mxu1 %v3522_v54  ;;  %v3423_v53 = vadd.f32 %v3422_v41, %v3374_v47 }
 0x2da   : > { %v3472_v59 = vadd.f32 %v3471_v46, %v3423_v53 }
 0x2dc   : > { %v3473_v51 = vpop.f32.mrf.mxu3  ;;  %v3508_v31 = vmax.f32 %v3472_v59, 0.0 }
 0x2dd   : > { %v3375_v45 = vpop.f32.mrf.mxu2 }
 0x2de   : > { %v3376_v63 = vadd.f32 %v3375_v45, %v3327_v10  ;;  %v3437_v27 = vpop.f32.mrf.mxu0  ;;  %v3346_v55 = vpop.f32.mrf.mxu1 }
 0x2e0   : > { %v3425_v44 = vadd.f32 %v3424_v26, %v3376_v63 }
 0x2e2   : > { %v3474_v60 = vadd.f32 %v3473_v51, %v3425_v44 }
 0x2e4   : > { %v3509_v2 = vmax.f32 %v3474_v60, 0.0  ;;  %v3476_v13 = vpop.f32.mrf.mxu3 }
 0x2e5   : > { %v3378_v17 = vpop.f32.mrf.mxu2 }
 0x2e6   : > { %v3523_v61 = vpack.c.bf16 %v3509_v2, %v3508_v31  ;;  %v3379_v11 = vadd.f32 %v3378_v17, %v3330_v29  ;;  %v3439_v36 = vpop.f32.mrf.mxu0  ;;  %v3349_v62 = vpop.f32.mrf.mxu1 }
 0x2e8   : > { %3607 = vmatmul.bf16.gmra.mxu1 %v3523_v61  ;;  %v3428_v5 = vadd.f32 %v3427_v9, %v3379_v11  ;;  %v3347_v61 = vadd.f32 %v3346_v55, %v5846_v43 }
 0x2ea   : > { %v3477_v18 = vadd.f32 %v3476_v13, %v3428_v5 }
 0x2ec   : > { %v3478_v42 = vpop.f32.mrf.mxu3  ;;  %v3510_v19 = vmax.f32 %v3477_v18, 0.0 }
 0x2ed   : > { %v3380_v56 = vpop.f32.mrf.mxu2 }
 0x2ee   : > { %v3381_v41 = vadd.f32 %v3380_v56, %v3332_v39  ;;  %v3442_v10 = vpop.f32.mrf.mxu0  ;;  %v3351_v18 = vpop.f32.mrf.mxu1 }
 0x2ef   : > { %v3352_v43 = vadd.f32 %v3351_v18, %v5857_v7 }
 0x2f0   : > { %v3430_v3 = vadd.f32 %v3429_v48, %v3381_v41 }
 0x2f2   : > { %v3479_v37 = vadd.f32 %v3478_v42, %v3430_v3 }
 0x2f4   : > { %v3511_v22 = vmax.f32 %v3479_v37, 0.0  ;;  %v3481_v26 = vpop.f32.mrf.mxu3 }
 0x2f5   : > { %v3383_v25 = vpop.f32.mrf.mxu2 }
 0x2f6   : > { %v3524_v38 = vpack.c.bf16 %v3511_v22, %v3510_v19  ;;  %v3384_v23 = vadd.f32 %v3383_v25, %v3335_v35  ;;  %v3444_v13 = vpop.f32.mrf.mxu0  ;;  %v3350_v19 = vadd.f32 %v3349_v62, %v5850_v50 }
 0x2f8   : > { %3612 = vmatmul.bf16.gmra.mxu1 %v3524_v38  ;;  %v3433_v1 = vadd.f32 %v3432_v4, %v3384_v23 }
 0x2fa   : > { %v3482_v33 = vadd.f32 %v3481_v26, %v3433_v1 }
 0x2fc   : > { %v3483_v32 = vpop.f32.mrf.mxu3  ;;  %v3512_v15 = vmax.f32 %v3482_v33, 0.0 }
 0x2fd   : > { %v3385_v24 = vpop.f32.mrf.mxu2 }
 0x2fe   : > { %v3386_v30 = vadd.f32 %v3385_v24, %v3337_v14  ;;  %v3447_v41 = vpop.f32.mrf.mxu0  ;;  %v3354_v14 = vpop.f32.mrf.mxu1 }
 0x2ff   : > { %v3355_v50 = vadd.f32 %v3354_v14, %v5860_v57 }
 0x300   : > { %v3435_v9 = vadd.f32 %v3434_v16, %v3386_v30 }
 0x302   : > { %v3484_v34 = vadd.f32 %v3483_v32, %v3435_v9 }
 0x304   : > { %v3513_v20 = vmax.f32 %v3484_v34, 0.0  ;;  %v3486_v46 = vpop.f32.mrf.mxu3 }
 0x305   : > { %v3388_v40 = vpop.f32.mrf.mxu2 }
 0x306   : > { %v3525_v54 = vpack.c.bf16 %v3513_v20, %v3512_v15  ;;  %v3389_v47 = vadd.f32 %v3388_v40, %v3340_v49  ;;  %v3449_v26 = vpop.f32.mrf.mxu0  ;;  %v3356_v20 = vpop.f32.mrf.mxu1 }
 0x307   : > { %v3357_v7 = vadd.f32 %v3356_v20, %v5863_v12 }
 0x308   : > { %3617 = vmatmul.bf16.gmra.mxu1 %v3525_v54  ;;  %v3438_v48 = vadd.f32 %v3437_v27, %v3389_v47 }
 0x30a   : > { %v3487_v63 = vadd.f32 %v3486_v46, %v3438_v48 }
 0x30c   : > { %v3488_v45 = vpop.f32.mrf.mxu3  ;;  %v3514_v60 = vmax.f32 %v3487_v63, 0.0 }
 0x30d   : > { %v3390_v53 = vpop.f32.mrf.mxu2 }
 0x30e   : > { %v3391_v51 = vadd.f32 %v3390_v53, %v3342_v8  ;;  %v3452_v33 = vpop.f32.mrf.mxu0 }
 0x310   : > { %v3440_v59 = vadd.f32 %v3439_v36, %v3391_v51 }
 0x312   : > { %v3489_v44 = vadd.f32 %v3488_v45, %v3440_v59 }
 0x314   : > { %v3515_v31 = vmax.f32 %v3489_v44, 0.0  ;;  %v3491_v4 = vpop.f32.mrf.mxu3 }
 0x315   : > { %v3393_v2 = vpop.f32.mrf.mxu2 }
 0x316   : > { %v3526_v17 = vpack.c.bf16 %v3515_v31, %v3514_v60  ;;  %v3394_v29 = vadd.f32 %v3393_v2, %v3345_v28  ;;  %v3454_v6 = vpop.f32.mrf.mxu0 }
 0x318   : > { %3622 = vmatmul.bf16.gmra.mxu1 %v3526_v17  ;;  %v3443_v0 = vadd.f32 %v3442_v10, %v3394_v29 }
 0x31a   : > { %v3492_v56 = vadd.f32 %v3491_v4, %v3443_v0 }
 0x31c   : > { %v3493_v39 = vpop.f32.mrf.mxu3  ;;  %v3516_v3 = vmax.f32 %v3492_v56, 0.0 }
 0x31d   : > { %v3395_v11 = vpop.f32.mrf.mxu2 }
 0x31e   : > { %v3396_v5 = vadd.f32 %v3395_v11, %v3347_v61 }
 0x320   : > { %v3445_v42 = vadd.f32 %v3444_v13, %v3396_v5 }
 0x322   : > { %v3494_v16 = vadd.f32 %v3493_v39, %v3445_v42 }
 0x324   : > { %v3517_v21 = vmax.f32 %v3494_v16, 0.0  ;;  %v3496_v58 = vpop.f32.mrf.mxu3 }
 0x325   : > { %v3398_v37 = vpop.f32.mrf.mxu2 }
 0x326   : > { %v3527_v22 = vpack.c.bf16 %v3517_v21, %v3516_v3  ;;  %v3399_v25 = vadd.f32 %v3398_v37, %v3350_v19 }
 0x328   : > { %3627 = vmatmul.bf16.gmra.mxu1 %v3527_v22  ;;  %v3448_v35 = vadd.f32 %v3447_v41, %v3399_v25 }
 0x32a   : > { %v3497_v52 = vadd.f32 %v3496_v58, %v3448_v35 }
 0x32c   : > { %v3498_v23 = vpop.f32.mrf.mxu3  ;;  %v3518_v32 = vmax.f32 %v3497_v52, 0.0 }
 0x32d   : > { %v3400_v38 = vpop.f32.mrf.mxu2 }
 0x32e   : > { %v3401_v27 = vadd.f32 %v3400_v38, %v3352_v43 }
 0x330   : > { %v3450_v1 = vadd.f32 %v3449_v26, %v3401_v27 }
 0x332   : > { %v3499_v24 = vadd.f32 %v3498_v23, %v3450_v1 }
 0x334   : > { %v3519_v30 = vmax.f32 %v3499_v24, 0.0  ;;  %v3501_v36 = vpop.f32.mrf.mxu3 }
 0x335   : > { %v3403_v9 = vpop.f32.mrf.mxu2 }
 0x336   : > { %v3528_v34 = vpack.c.bf16 %v3519_v30, %v3518_v32  ;;  %v3404_v15 = vadd.f32 %v3403_v9, %v3355_v50 }
 0x338   : > { %3632 = vmatmul.bf16.gmra.mxu1 %v3528_v34  ;;  %v3453_v40 = vadd.f32 %v3452_v33, %v3404_v15 }
 0x33a   : > { %v3502_v54 = vadd.f32 %v3501_v36, %v3453_v40 }
 0x33c   : > { %v3503_v8 = vpop.f32.mrf.mxu3  ;;  %v3520_v48 = vmax.f32 %v3502_v54, 0.0 }
 0x33d   : > { %v3405_v46 = vpop.f32.mrf.mxu2 }
 0x33e   : > { %v3406_v49 = vadd.f32 %v3405_v46, %v3357_v7 }
 0x340   : > { %v3455_v47 = vadd.f32 %v3454_v6, %v3406_v49 }
 0x342   : > { %v3504_v57 = vadd.f32 %v3503_v8, %v3455_v47 }
 0x344   : > { %v3521_v10 = vmax.f32 %v3504_v57, 0.0 }
 0x346   : > { %v3529_v53 = vpack.c.bf16 %v3521_v10, %v3520_v48 }
 0x348   : > { %3637 = vmatmul.bf16.gmra.mxu1 %v3529_v53 }
 0x355   : > { %v3603_v12 = vpop.f32.mrf.mxu1 }
 0x356   : > { %3644 = vst.msk [vmem:[%s5261_s3] sm:$0xff] %vm3643_vm0, %v3603_v12 }
 0x35d   : > { %v3605_v45 = vpop.f32.mrf.mxu1 }
 0x35e   : > { %3645 = vst.msk [vmem:[%s5261_s3 + $0x8] sm:$0xff] %vm3643_vm0, %v3605_v45 }
 0x365   : > { %v3608_v51 = vpop.f32.mrf.mxu1 }
 0x366   : > { %3646 = vst.msk [vmem:[%s5261_s3 + $0x10] sm:$0xff] %vm3643_vm0, %v3608_v51 }
 0x36d   : > { %v3610_v55 = vpop.f32.mrf.mxu1 }
 0x36e   : > { %3647 = vst.msk [vmem:[%s5261_s3 + $0x18] sm:$0xff] %vm3643_vm0, %v3610_v55 }
 0x375   : > { %v3613_v63 = vpop.f32.mrf.mxu1 }
 0x376   : > { %3648 = vst.msk [vmem:[%s5261_s3 + $0x20] sm:$0xff] %vm3643_vm0, %v3613_v63 }
 0x37d   : > { %v3615_v59 = vpop.f32.mrf.mxu1 }
 0x37e   : > { %3649 = vst.msk [vmem:[%s5261_s3 + $0x28] sm:$0xff] %vm3643_vm0, %v3615_v59 }
 0x385   : > { %v3618_v44 = vpop.f32.mrf.mxu1 }
 0x386   : > { %3650 = vst.msk [vmem:[%s5261_s3 + $0x30] sm:$0xff] %vm3643_vm0, %v3618_v44 }
 0x38d   : > { %v3620_v60 = vpop.f32.mrf.mxu1 }
 0x38e   : > { %3651 = vst.msk [vmem:[%s5261_s3 + $0x38] sm:$0xff] %vm3643_vm0, %v3620_v60 }
 0x395   : > { %v3623_v31 = vpop.f32.mrf.mxu1 }
 0x396   : > { %3652 = vst.msk [vmem:[%s5261_s3 + $0x40] sm:$0xff] %vm3643_vm0, %v3623_v31 }
 0x39d   : > { %v3625_v2 = vpop.f32.mrf.mxu1 }
 0x39e   : > { %3653 = vst.msk [vmem:[%s5261_s3 + $0x48] sm:$0xff] %vm3643_vm0, %v3625_v2 }
 0x3a5   : > { %v3628_v4 = vpop.f32.mrf.mxu1 }
 0x3a6   : > { %3654 = vst.msk [vmem:[%s5261_s3 + $0x50] sm:$0xff] %vm3643_vm0, %v3628_v4 }
 0x3ad   : > { %v3630_v28 = vpop.f32.mrf.mxu1 }
 0x3ae   : > { %3655 = vst.msk [vmem:[%s5261_s3 + $0x58] sm:$0xff] %vm3643_vm0, %v3630_v28 }
 0x3b5   : > { %v3633_v17 = vpop.f32.mrf.mxu1 }
 0x3b6   : > { %3656 = vst.msk [vmem:[%s5261_s3 + $0x60] sm:$0xff] %vm3643_vm0, %v3633_v17 }
 0x3bd   : > { %v3635_v13 = vpop.f32.mrf.mxu1 }
 0x3be   : > { %3657 = vst.msk [vmem:[%s5261_s3 + $0x68] sm:$0xff] %vm3643_vm0, %v3635_v13 }
 0x3c5   : > { %v3638_v29 = vpop.f32.mrf.mxu1 }
 0x3c6   : > { %3658 = vst.msk [vmem:[%s5261_s3 + $0x70] sm:$0xff] %vm3643_vm0, %v3638_v29 }
 0x3cd   : > { %v3640_v62 = vpop.f32.mrf.mxu1 }
 0x3ce   : > { %3659 = vst.msk [vmem:[%s5261_s3 + $0x78] sm:$0xff] %vm3643_vm0, %v3640_v62 }
 0x3cf   : > { %4820 = shalt.err (!%p4817_p13)
}
 0x3d0   : > { %s4891_s3 = smov 128   ;;  %s4892_s30 = smov 8  }
 0x3d1   : > { %4717 = dma.vmem_to_hbm [thread:$0]  (%p4984_p3), %s3677_s17, 2048, %s3679_s12, %s3661_s28, %s4891_s3, %s4891_s3, %s4892_s30  }
 0x3d2 PF: > { %p4723_p0 = scmp.ge.s32.totalorder %s4887_s8, 2  ;;  %s3693_s11 = sand.u32 1, %s4859_s24  }
 0x3d3   : > { %s3694_s19 = scalar_lea.sflag [#allocation5], %s3693_s11 }
 0x3d4   : > { %p4720_p1 = pnand %p4723_p0, %p4993_p8 }
 0x3d6   : > { %p4721_p2 = pneg %p4720_p1 }
 0x3d8   : > { %4854 = dma.done.wait (%p4721_p2), %s3694_s19, 2048  }
 0x3d9   : > { %4856 = vsyncadd (%p4721_p2), %s3694_s19, 4294965248  ;;  %s20_s8 = sadd.s32 1, %s4887_s8   ;;  %s5996_s20 = sld [smem:[#allocation11_spill]] }
 0x3da   : > { %p17_p4 = scmp.ge.s32.totalorder %s20_s8, 6   ;;  %s5997_s27 = sld [smem:[#allocation7_spill]] }
 0x3db   : > { %s5998_s28 = sld [smem:[#allocation8_spill]]  ;;  %s6001_s24 = smov %s4863_s25 }
 0x3dc   : > { %s5999_s29 = sld [smem:[#allocation9_spill]]  ;;  %s6002_s25 = smov %s4867_s26 }
 0x3dd   : > { %s6000_s30 = sld [smem:[#allocation10_spill]]  ;;  %19 = sbr.rel (!%p17_p4) target bundleno = 8 (0x8), region = 100 }
 0x3df   : > { %s6003_s26 = smov %s5996_s20 }
 0x3e2   :  { %3700 = vsyncpa [#allocation5], 1 }
 0x3e3   :  { %3702 = vsyncpa [#allocation5 + $0x1], 1 }

</bundles_post_ra>
